<compile_context>
chip_gen: v6e
topology: v6e:2x2x1
jax: 0.10.0
libtpu: 0.0.40
codegen_flags: <defaults>
</compile_context>

<pallas_src>
import jax
import jax.numpy as jnp
from jax.experimental import pallas as pl
from jax.experimental.pallas import tpu as pltpu

EPS = 1e-5


def _fused_scale_conv_bn_kernel(x_ref, s_ref, w_ref, g_ref, b_ref, o_ref):
    # x_ref: (Cin, M)    activations, channels on sublanes, pixels on lanes
    # s_ref: (1, Cin)    per-input-channel SE scale
    # w_ref: (TC, Cin)   1x1-conv weight tile (TC output channels)
    # g_ref: (TC, 1)     BN gamma tile
    # b_ref: (TC, 1)     BN beta tile
    # o_ref: (TC, M)
    # Fold the SE scale into the weight (touches the weight tile, not the activation).
    w_scaled = w_ref[...] * s_ref[...]                        # (TC, Cin)

    # 1x1 conv == matmul on the MXU, f32 accumulation.
    y = jnp.dot(w_scaled, x_ref[...],
                preferred_element_type=jnp.float32)           # (TC, M)

    # BatchNorm2d (training mode): per-output-channel stats over all M = N*H*W
    # pixels, biased variance.  Centered two-pass form for numerical robustness;
    # lane-axis reductions go to the XLU, the extra VPU pass hides under DMA slack.
    m = y.shape[1]
    inv_m = 1.0 / m
    mean = jnp.sum(y, axis=1, keepdims=True) * inv_m          # (TC, 1)
    centered = y - mean                                       # (TC, M)
    var = jnp.sum(centered * centered, axis=1, keepdims=True) * inv_m
    inv_std = jax.lax.rsqrt(var + EPS)                        # (TC, 1)

    # Fused BN affine on the already-centered values: o = (y - mean) * a + beta
    a = g_ref[...] * inv_std                                  # (TC, 1)
    o_ref[...] = (centered * a + b_ref[...]).astype(o_ref.dtype)


def _num_tensorcores() -> int:
    """Best-effort count of TensorCores addressable by one pallas_call (per device).
    Falls back to 1 (the correct, overhead-free path for v5e/v6e) on any failure."""
    try:
        info = pltpu.get_tpu_info()
        for attr in ("num_cores", "num_tensorcores", "tensorcore_count",
                     "core_count", "num_cores_per_chip"):
            n = getattr(info, attr, None)
            if isinstance(n, int) and n >= 1:
                return n
    except Exception:
        pass
    try:
        kind = jax.devices()[0].device_kind.lower()
        # Megacore parts (2 TCs visible to one Pallas call): v4, v5p, v7x.
        if ("v4" in kind) or ("v5p" in kind) or ("7" in kind):
            return 2
    except Exception:
        pass
    return 1


def fused_scale_conv_bn(x_nchw, scale_nc11, w_oi11, gamma, beta):
    """x_nchw: (N, Cin, H, W), scale_nc11: (1, Cin, 1, 1),
       w_oi11: (Cout, Cin, 1, 1), gamma/beta: (Cout,). Returns (N, Cout, H, W)."""
    N, Cin, H, W = x_nchw.shape
    Cout = w_oi11.shape[0]
    M = N * H * W

    # Layout glue (free for N=1: the "transpose" of a size-1 dim is a bitcast).
    x_cm = jnp.moveaxis(x_nchw, 1, 0).reshape(Cin, M)         # (Cin, M)
    s_row = scale_nc11.reshape(1, Cin)
    w_mat = w_oi11.reshape(Cout, Cin)                         # (Cout, Cin)
    g_col = gamma.reshape(Cout, 1)
    b_col = beta.reshape(Cout, 1)

    # Grid selection is generation dependent:
    #   * single-TC parts (v5e/v6e): grid=(1,), full Cout block -> no per-step
    #     overhead, full-height MXU output tile (kernel is HBM-bound anyway).
    #   * multi-TC parts (v7x megacore): exact 2-way per-out-channel split so both
    #     TensorCores work in parallel (BN stats are strictly per output channel).
    ncores = _num_tensorcores()
    if ncores >= 2 and Cout % 2 == 0 and (Cout // 2) % 8 == 0:
        tc = Cout // 2
    else:
        tc = Cout
    grid = (Cout // tc,)

    cost = pl.CostEstimate(
        flops=2 * Cout * Cin * M,
        transcendentals=0,
        bytes_accessed=4 * (Cin * M + Cin + Cout * Cin + 2 * Cout + Cout * M),
    )

    out_cm = pl.pallas_call(
        _fused_scale_conv_bn_kernel,
        out_shape=jax.ShapeDtypeStruct((Cout, M), x_nchw.dtype),
        grid=grid,
        in_specs=[
            pl.BlockSpec((Cin, M), lambda j: (0, 0)),    # x: same block every step
            pl.BlockSpec((1, Cin), lambda j: (0, 0)),    # SE scale
            pl.BlockSpec((tc, Cin), lambda j: (j, 0)),   # weight tile
            pl.BlockSpec((tc, 1), lambda j: (j, 0)),     # gamma tile
            pl.BlockSpec((tc, 1), lambda j: (j, 0)),     # beta tile
        ],
        out_specs=pl.BlockSpec((tc, M), lambda j: (j, 0)),
        compiler_params=pltpu.CompilerParams(
            dimension_semantics=("parallel",)),
        cost_estimate=cost,
    )(x_cm, s_row, w_mat, g_col, b_col)

    # (Cout, M) -> (N, Cout, H, W); free for N=1.
    return jnp.moveaxis(out_cm.reshape(Cout, N, H, W), 0, 1)


def reference(x_nchw, scale_nc11, w_oi11, gamma, beta):
    """Pure-JAX reference of the PyTorch forward (training-mode BN)."""
    xs = x_nchw * scale_nc11
    y = jnp.einsum("nchw,oc->nohw", xs,
                   w_oi11.reshape(w_oi11.shape[0], w_oi11.shape[1]))
    mean = jnp.mean(y, axis=(0, 2, 3), keepdims=True)
    var = jnp.mean((y - mean) ** 2, axis=(0, 2, 3), keepdims=True)
    return (y - mean) / jnp.sqrt(var + EPS) * gamma.reshape(1, -1, 1, 1) \
        + beta.reshape(1, -1, 1, 1)


if __name__ == "__main__":
    # Module-implied shapes: N=1, Cin=1344, H=W=14, Cout=224
    N, Cin, H, W, Cout = 1, 1344, 14, 14, 224

    key = jax.random.PRNGKey(0)
    k1, k2, k3, k4, k5 = jax.random.split(key, 5)

    x461 = jax.random.normal(k1, (N, Cin, H, W), dtype=jnp.float32)
    x466 = jax.random.normal(k2, (1, Cin, 1, 1), dtype=jnp.float32)

    # Conv2d(1344,224,1,1,bias=False) weight + BatchNorm2d(224) affine params
    w = jax.random.normal(k3, (Cout, Cin, 1, 1), dtype=jnp.float32) * 0.02
    gamma = 1.0 + 0.1 * jax.random.normal(k4, (Cout,), dtype=jnp.float32)
    beta = 0.1 * jax.random.normal(k5, (Cout,), dtype=jnp.float32)

    out = fused_scale_conv_bn(x461, x466, w, gamma, beta)
    out = jax.block_until_ready(out)

    ref = reference(x461, x466, w, gamma, beta)
    assert out.shape == (N, Cout, H, W), out.shape
    assert jnp.allclose(out, ref, atol=2e-3, rtol=2e-3), \
        float(jnp.max(jnp.abs(out - ref)))

    print("KERNEL_OK")
</pallas_src>

<mosaic_0001>
module attributes {stable_mosaic.version = 11 : i64} {
  func.func @_fused_scale_conv_bn_kernel(%arg0: i32, %arg1: memref<1344x196xf32, #tpu.memory_space<vmem>>, %arg2: memref<1x1344xf32, #tpu.memory_space<vmem>>, %arg3: memref<224x1344xf32, #tpu.memory_space<vmem>>, %arg4: memref<224x1xf32, #tpu.memory_space<vmem>>, %arg5: memref<224x1xf32, #tpu.memory_space<vmem>>, %arg6: memref<224x196xf32, #tpu.memory_space<vmem>>) attributes {dimension_semantics = [#tpu.dimension_semantics<parallel>], iteration_bounds = array<i64: 1>, scalar_prefetch = 0 : i64, scratch_operands = 0 : i64, tpu.core_type = #tpu.core_type<tc>, window_params = [{pipeline_mode = #tpu.pipeline_mode<synchronous>, transform_indices = @transform_0, window_bounds = array<i64: 1344, 196>}, {pipeline_mode = #tpu.pipeline_mode<synchronous>, transform_indices = @transform_1, window_bounds = array<i64: 1, 1344>}, {transform_indices = @transform_2, window_bounds = array<i64: 224, 1344>}, {transform_indices = @transform_3, window_bounds = array<i64: 224, 1>}, {transform_indices = @transform_4, window_bounds = array<i64: 224, 1>}, {transform_indices = @transform_5, window_bounds = array<i64: 224, 196>}]} {
    %c0 = arith.constant 0 : index
    %c0_0 = arith.constant 0 : index
    %0 = vector.load %arg3[%c0, %c0_0] : memref<224x1344xf32, #tpu.memory_space<vmem>>, vector<224x1344xf32>
    %c0_1 = arith.constant 0 : index
    %c0_2 = arith.constant 0 : index
    %1 = vector.load %arg2[%c0_1, %c0_2] : memref<1x1344xf32, #tpu.memory_space<vmem>>, vector<1x1344xf32>
    %2 = vector.broadcast %1 : vector<1x1344xf32> to vector<224x1344xf32>
    %3 = arith.mulf %0, %2 : vector<224x1344xf32>
    %c0_3 = arith.constant 0 : index
    %c0_4 = arith.constant 0 : index
    %4 = vector.load %arg1[%c0_3, %c0_4] : memref<1344x196xf32, #tpu.memory_space<vmem>>, vector<1344x196xf32>
    %cst = arith.constant dense<0.000000e+00> : vector<224x196xf32>
    %5 = tpu.matmul %3, %4, %cst {dimension_numbers = #tpu.dot_dimension_numbers<[1], [0], [0], [1], [0, 0, 1, 1], [], []>} : vector<224x1344xf32>, vector<1344x196xf32>, vector<224x196xf32> -> vector<224x196xf32>
    %cst_5 = arith.constant dense<0.000000e+00> : vector<224xf32>
    %6 = vector.multi_reduction <add>, %5, %cst_5 [1] : vector<224x196xf32> to vector<224xf32>
    %7 = vector.shape_cast %6 : vector<224xf32> to vector<224x1xf32>
    %cst_6 = arith.constant 0.00510204071 : f32
    %8 = vector.broadcast %cst_6 : f32 to vector<224x1xf32>
    %9 = arith.mulf %7, %8 : vector<224x1xf32>
    %10 = vector.broadcast %9 : vector<224x1xf32> to vector<224x196xf32>
    %11 = arith.subf %5, %10 : vector<224x196xf32>
    %12 = arith.mulf %11, %11 : vector<224x196xf32>
    %cst_7 = arith.constant dense<0.000000e+00> : vector<224xf32>
    %13 = vector.multi_reduction <add>, %12, %cst_7 [1] : vector<224x196xf32> to vector<224xf32>
    %14 = vector.shape_cast %13 : vector<224xf32> to vector<224x1xf32>
    %cst_8 = arith.constant 0.00510204071 : f32
    %15 = vector.broadcast %cst_8 : f32 to vector<224x1xf32>
    %16 = arith.mulf %14, %15 : vector<224x1xf32>
    %cst_9 = arith.constant 9.99999974E-6 : f32
    %17 = vector.broadcast %cst_9 : f32 to vector<224x1xf32>
    %18 = arith.addf %16, %17 : vector<224x1xf32>
    %19 = math.rsqrt %18 : vector<224x1xf32>
    %c0_10 = arith.constant 0 : index
    %c0_11 = arith.constant 0 : index
    %20 = vector.load %arg4[%c0_10, %c0_11] : memref<224x1xf32, #tpu.memory_space<vmem>>, vector<224x1xf32>
    %21 = arith.mulf %20, %19 : vector<224x1xf32>
    %22 = vector.broadcast %21 : vector<224x1xf32> to vector<224x196xf32>
    %23 = arith.mulf %11, %22 : vector<224x196xf32>
    %c0_12 = arith.constant 0 : index
    %c0_13 = arith.constant 0 : index
    %24 = vector.load %arg5[%c0_12, %c0_13] : memref<224x1xf32, #tpu.memory_space<vmem>>, vector<224x1xf32>
    %25 = vector.broadcast %24 : vector<224x1xf32> to vector<224x196xf32>
    %26 = arith.addf %23, %25 : vector<224x196xf32>
    %c0_14 = arith.constant 0 : index
    %c0_15 = arith.constant 0 : index
    %27 = vector.load %arg6[%c0_14, %c0_15] : memref<224x196xf32, #tpu.memory_space<vmem>>, vector<224x196xf32>
    tpu.vector_store %arg6[%c0_14, %c0_15], %26 {strides = array<i32>} : memref<224x196xf32, #tpu.memory_space<vmem>>, vector<224x196xf32>,
    return
  }
  func.func @transform_0(%arg0: i32) -> (i32, i32) {
    %c0_i32 = arith.constant 0 : i32
    %c0_i32_0 = arith.constant 0 : i32
    %c0_i32_1 = arith.constant 0 : i32
    return %c0_i32, %c0_i32_0 : i32, i32
  }
  func.func @transform_1(%arg0: i32) -> (i32, i32) {
    %c0_i32 = arith.constant 0 : i32
    %c0_i32_0 = arith.constant 0 : i32
    %c0_i32_1 = arith.constant 0 : i32
    return %c0_i32, %c0_i32_0 : i32, i32
  }
  func.func @transform_2(%arg0: i32) -> (i32, i32) {
    %c0_i32 = arith.constant 0 : i32
    %c0_i32_0 = arith.constant 0 : i32
    return %arg0, %c0_i32 : i32, i32
  }
  func.func @transform_3(%arg0: i32) -> (i32, i32) {
    %c0_i32 = arith.constant 0 : i32
    %c0_i32_0 = arith.constant 0 : i32
    return %arg0, %c0_i32 : i32, i32
  }
  func.func @transform_4(%arg0: i32) -> (i32, i32) {
    %c0_i32 = arith.constant 0 : i32
    %c0_i32_0 = arith.constant 0 : i32
    return %arg0, %c0_i32 : i32, i32
  }
  func.func @transform_5(%arg0: i32) -> (i32, i32) {
    %c0_i32 = arith.constant 0 : i32
    %c0_i32_0 = arith.constant 0 : i32
    return %arg0, %c0_i32 : i32, i32
  }
}

</mosaic_0001>

<bundles_post_ra>
// kernel: tpu_custom_call.1
= control target key start
LH: loop header
LB: loop body
LE: loop exit
PB: predicated region body
PF: predicated region fallthrough
CT: control target
= control target key end

     0   :  { %vm1031_vm0 = vcmask 523264   ;;  %vm2514_vm1 = vcmask 556032   ;;  %s7329_s0 = inlined_call_operand.vmem [shape: f32[1344,196], index: 0, kind: input, shape index: {}]   ;;  %s7330_s1 = inlined_call_operand.vmem [shape: f32[1,1344], index: 1, kind: input, shape index: {}]   ;;  %s7331_s2 = inlined_call_operand.vmem [shape: f32[224,1344], index: 2, kind: input, shape index: {}]   ;;  %s7332_s4 = inlined_call_operand.vmem [shape: f32[224,1], index: 4, kind: input, shape index: {}]   ;;  %s7333_s3 = inlined_call_operand.vmem [shape: f32[224,1], index: 3, kind: input, shape index: {}]   ;;  %s7334_s5 = inlined_call_operand.vmem [shape: f32[224,196], index: 5, kind: output, shape index: {}]  }
   0x1   :  { %v726_v0 = vld [vmem:[%s7329_s0 + $0xf8] sm:$0xff]  ;;  %v725_v2 = vld [vmem:[%s7329_s0 + $0xf0] sm:$0xff]  ;;  %v724_v4 = vld [vmem:[%s7329_s0 + $0xe8] sm:$0xff] }
   0x2   :  { %v790_v1 = vld [vmem:[%s7329_s0 + $0x2f8] sm:$0xff]  ;;  %1116 = vmatprep.subr.mxu0 %v726_v0  ;;  %v789_v3 = vld [vmem:[%s7329_s0 + $0x2f0] sm:$0xff]  ;;  %v788_v5 = vld [vmem:[%s7329_s0 + $0x2e8] sm:$0xff] }
   0x3   :  { %1349 = vmatprep.subr.mxu1 %v790_v1  ;;  %1117 = vmatpush1.msra.mxu0 %v725_v2  ;;  %v723_v6 = vld [vmem:[%s7329_s0 + $0xe0] sm:$0xff]  ;;  %v722_v8 = vld [vmem:[%s7329_s0 + $0xd8] sm:$0xff]  ;;  %v721_v10 = vld [vmem:[%s7329_s0 + $0xd0] sm:$0xff] }
   0x4   :  { %1350 = vmatpush1.msra.mxu1 %v789_v3  ;;  %v787_v7 = vld [vmem:[%s7329_s0 + $0x2e0] sm:$0xff]  ;;  %1118 = vmatprep.subr.mxu0 %v724_v4  ;;  %v786_v9 = vld [vmem:[%s7329_s0 + $0x2d8] sm:$0xff]  ;;  %v785_v11 = vld [vmem:[%s7329_s0 + $0x2d0] sm:$0xff] }
   0x5   :  { %1351 = vmatprep.subr.mxu1 %v788_v5  ;;  %1119 = vmatpush1.msra.mxu0 %v723_v6  ;;  %v720_v12 = vld [vmem:[%s7329_s0 + $0xc8] sm:$0xff]  ;;  %v719_v14 = vld [vmem:[%s7329_s0 + $0xc0] sm:$0xff]  ;;  %v718_v16 = vld [vmem:[%s7329_s0 + $0xb8] sm:$0xff] }
   0x6   :  { %1352 = vmatpush1.msra.mxu1 %v787_v7  ;;  %v784_v13 = vld [vmem:[%s7329_s0 + $0x2c8] sm:$0xff]  ;;  %1120 = vmatprep.subr.mxu0 %v722_v8  ;;  %v783_v15 = vld [vmem:[%s7329_s0 + $0x2c0] sm:$0xff]  ;;  %v782_v17 = vld [vmem:[%s7329_s0 + $0x2b8] sm:$0xff] }
   0x7   :  { %1353 = vmatprep.subr.mxu1 %v786_v9  ;;  %1121 = vmatpush1.msra.mxu0 %v721_v10  ;;  %v717_v18 = vld [vmem:[%s7329_s0 + $0xb0] sm:$0xff]  ;;  %v716_v20 = vld [vmem:[%s7329_s0 + $0xa8] sm:$0xff]  ;;  %v715_v22 = vld [vmem:[%s7329_s0 + $0xa0] sm:$0xff] }
   0x8   :  { %1354 = vmatpush1.msra.mxu1 %v785_v11  ;;  %1122 = vmatprep.subr.mxu0 %v720_v12  ;;  %v781_v19 = vld [vmem:[%s7329_s0 + $0x2b0] sm:$0xff]  ;;  %v780_v21 = vld [vmem:[%s7329_s0 + $0x2a8] sm:$0xff]  ;;  %v779_v23 = vld [vmem:[%s7329_s0 + $0x2a0] sm:$0xff] }
   0x9   :  { %1355 = vmatprep.subr.mxu1 %v784_v13  ;;  %1123 = vmatpush1.msra.mxu0 %v719_v14  ;;  %v714_v24 = vld [vmem:[%s7329_s0 + $0x98] sm:$0xff]  ;;  %v713_v26 = vld [vmem:[%s7329_s0 + $0x90] sm:$0xff]  ;;  %v712_v28 = vld [vmem:[%s7329_s0 + $0x88] sm:$0xff] }
   0xa   :  { %1356 = vmatpush1.msra.mxu1 %v783_v15  ;;  %1124 = vmatprep.subr.mxu0 %v718_v16  ;;  %v778_v25 = vld [vmem:[%s7329_s0 + $0x298] sm:$0xff]  ;;  %v777_v27 = vld [vmem:[%s7329_s0 + $0x290] sm:$0xff]  ;;  %v776_v29 = vld [vmem:[%s7329_s0 + $0x288] sm:$0xff] }
   0xb   :  { %1357 = vmatprep.subr.mxu1 %v782_v17  ;;  %1125 = vmatpush1.msra.mxu0 %v717_v18  ;;  %v711_v30 = vld [vmem:[%s7329_s0 + $0x80] sm:$0xff]  ;;  %v710_v32 = vld [vmem:[%s7329_s0 + $0x78] sm:$0xff]  ;;  %v709_v34 = vld [vmem:[%s7329_s0 + $0x70] sm:$0xff] }
   0xc   :  { %1358 = vmatpush1.msra.mxu1 %v781_v19  ;;  %1126 = vmatprep.subr.mxu0 %v716_v20  ;;  %v775_v31 = vld [vmem:[%s7329_s0 + $0x280] sm:$0xff]  ;;  %v774_v33 = vld [vmem:[%s7329_s0 + $0x278] sm:$0xff]  ;;  %v773_v35 = vld [vmem:[%s7329_s0 + $0x270] sm:$0xff] }
   0xd   :  { %1359 = vmatprep.subr.mxu1 %v780_v21  ;;  %1127 = vmatpush1.msra.mxu0 %v715_v22  ;;  %v708_v36 = vld [vmem:[%s7329_s0 + $0x68] sm:$0xff]  ;;  %v707_v38 = vld [vmem:[%s7329_s0 + $0x60] sm:$0xff]  ;;  %v706_v40 = vld [vmem:[%s7329_s0 + $0x58] sm:$0xff] }
   0xe   :  { %1360 = vmatpush1.msra.mxu1 %v779_v23  ;;  %1128 = vmatprep.subr.mxu0 %v714_v24  ;;  %v772_v37 = vld [vmem:[%s7329_s0 + $0x268] sm:$0xff]  ;;  %v771_v39 = vld [vmem:[%s7329_s0 + $0x260] sm:$0xff]  ;;  %v770_v41 = vld [vmem:[%s7329_s0 + $0x258] sm:$0xff] }
   0xf   :  { %1361 = vmatprep.subr.mxu1 %v778_v25  ;;  %1129 = vmatpush1.msra.mxu0 %v713_v26  ;;  %v705_v42 = vld [vmem:[%s7329_s0 + $0x50] sm:$0xff]  ;;  %v704_v44 = vld [vmem:[%s7329_s0 + $0x48] sm:$0xff]  ;;  %v703_v46 = vld [vmem:[%s7329_s0 + $0x40] sm:$0xff] }
  0x10   :  { %1362 = vmatpush1.msra.mxu1 %v777_v27  ;;  %1130 = vmatprep.subr.mxu0 %v712_v28  ;;  %v769_v43 = vld [vmem:[%s7329_s0 + $0x250] sm:$0xff]  ;;  %v768_v45 = vld [vmem:[%s7329_s0 + $0x248] sm:$0xff]  ;;  %v767_v47 = vld [vmem:[%s7329_s0 + $0x240] sm:$0xff] }
  0x11   :  { %1363 = vmatprep.subr.mxu1 %v776_v29  ;;  %1131 = vmatpush1.msra.mxu0 %v711_v30  ;;  %v702_v48 = vld [vmem:[%s7329_s0 + $0x38] sm:$0xff]  ;;  %v701_v50 = vld [vmem:[%s7329_s0 + $0x30] sm:$0xff]  ;;  %v700_v52 = vld [vmem:[%s7329_s0 + $0x28] sm:$0xff]  ;;  %v332_v30 = vlaneseq }
  0x12   :  { %1364 = vmatpush1.msra.mxu1 %v775_v31  ;;  %1132 = vmatprep.subr.mxu0 %v710_v32  ;;  %v766_v49 = vld [vmem:[%s7329_s0 + $0x238] sm:$0xff]  ;;  %v765_v51 = vld [vmem:[%s7329_s0 + $0x230] sm:$0xff]  ;;  %v764_v53 = vld [vmem:[%s7329_s0 + $0x228] sm:$0xff] }
  0x13   :  { %1365 = vmatprep.subr.mxu1 %v774_v33  ;;  %1133 = vmatpush1.msra.mxu0 %v709_v34  ;;  %v699_v54 = vld [vmem:[%s7329_s0 + $0x20] sm:$0xff]  ;;  %v698_v56 = vld [vmem:[%s7329_s0 + $0x18] sm:$0xff]  ;;  %v697_v58 = vld [vmem:[%s7329_s0 + $0x10] sm:$0xff] }
  0x14   :  { %1366 = vmatpush1.msra.mxu1 %v773_v35  ;;  %1134 = vmatprep.subr.mxu0 %v708_v36  ;;  %v763_v55 = vld [vmem:[%s7329_s0 + $0x220] sm:$0xff]  ;;  %v762_v57 = vld [vmem:[%s7329_s0 + $0x218] sm:$0xff]  ;;  %v761_v59 = vld [vmem:[%s7329_s0 + $0x210] sm:$0xff] }
  0x15   :  { %1367 = vmatprep.subr.mxu1 %v772_v37  ;;  %1135 = vmatpush1.msra.mxu0 %v707_v38  ;;  %v696_v60 = vld [vmem:[%s7329_s0 + $0x8] sm:$0xff]  ;;  %v695_v62 = vld [vmem:[%s7329_s0] sm:$0xff]  ;;  %v758_v0 = vld [vmem:[%s7329_s0 + $0x1f8] sm:$0xff] }
  0x16   :  { %1368 = vmatpush1.msra.mxu1 %v771_v39  ;;  %1136 = vmatprep.subr.mxu0 %v706_v40  ;;  %v760_v61 = vld [vmem:[%s7329_s0 + $0x208] sm:$0xff]  ;;  %v759_v63 = vld [vmem:[%s7329_s0 + $0x200] sm:$0xff]  ;;  %v822_v1 = vld [vmem:[%s7329_s0 + $0x3f8] sm:$0xff]  ;;  %v3925_v39 = vshrl.u32 %v332_v30, 7 }
  0x17   :  { %1369 = vmatprep.subr.mxu1 %v770_v41  ;;  %1137 = vmatpush1.msra.mxu0 %v705_v42  ;;  %v757_v2 = vld [vmem:[%s7329_s0 + $0x1f0] sm:$0xff]  ;;  %v756_v4 = vld [vmem:[%s7329_s0 + $0x1e8] sm:$0xff]  ;;  %v755_v6 = vld [vmem:[%s7329_s0 + $0x1e0] sm:$0xff] }
  0x18   :  { %1370 = vmatpush1.msra.mxu1 %v769_v43  ;;  %1138 = vmatprep.subr.mxu0 %v704_v44  ;;  %v821_v3 = vld [vmem:[%s7329_s0 + $0x3f0] sm:$0xff]  ;;  %v820_v5 = vld [vmem:[%s7329_s0 + $0x3e8] sm:$0xff]  ;;  %v819_v7 = vld [vmem:[%s7329_s0 + $0x3e0] sm:$0xff] }
  0x19   :  { %1371 = vmatprep.subr.mxu1 %v768_v45  ;;  %1139 = vmatpush1.msra.mxu0 %v703_v46  ;;  %v754_v8 = vld [vmem:[%s7329_s0 + $0x1d8] sm:$0xff]  ;;  %v753_v10 = vld [vmem:[%s7329_s0 + $0x1d0] sm:$0xff]  ;;  %v752_v12 = vld [vmem:[%s7329_s0 + $0x1c8] sm:$0xff]  ;;  %v354_v46 = vsub.s32 5, %v3925_v39 }
  0x1a   :  { %1372 = vmatpush1.msra.mxu1 %v767_v47  ;;  %1140 = vmatprep.subr.mxu0 %v702_v48  ;;  %v818_v9 = vld [vmem:[%s7329_s0 + $0x3d8] sm:$0xff]  ;;  %v817_v11 = vld [vmem:[%s7329_s0 + $0x3d0] sm:$0xff]  ;;  %v816_v13 = vld [vmem:[%s7329_s0 + $0x3c8] sm:$0xff]  ;;  %v362_v47 = vsub.s32 7, %v3925_v39 }
  0x1b   :  { %1373 = vmatprep.subr.mxu1 %v766_v49  ;;  %1141 = vmatpush1.msra.mxu0 %v701_v50  ;;  %v751_v14 = vld [vmem:[%s7329_s0 + $0x1c0] sm:$0xff]  ;;  %v750_v16 = vld [vmem:[%s7329_s0 + $0x1b8] sm:$0xff]  ;;  %v749_v18 = vld [vmem:[%s7329_s0 + $0x1b0] sm:$0xff] }
  0x1c   :  { %1374 = vmatpush1.msra.mxu1 %v765_v51  ;;  %1142 = vmatprep.subr.mxu0 %v700_v52  ;;  %v815_v15 = vld [vmem:[%s7329_s0 + $0x3c0] sm:$0xff]  ;;  %v814_v17 = vld [vmem:[%s7329_s0 + $0x3b8] sm:$0xff]  ;;  %v813_v19 = vld [vmem:[%s7329_s0 + $0x3b0] sm:$0xff]  ;;  %v338_v51 = vsub.s32 1, %v3925_v39  ;;  %v350_v52 = vsub.s32 4, %v3925_v39 }
  0x1d   :  { %1375 = vmatprep.subr.mxu1 %v764_v53  ;;  %1143 = vmatpush1.msra.mxu0 %v699_v54  ;;  %v748_v20 = vld [vmem:[%s7329_s0 + $0x1a8] sm:$0xff]  ;;  %v747_v22 = vld [vmem:[%s7329_s0 + $0x1a0] sm:$0xff]  ;;  %v746_v24 = vld [vmem:[%s7329_s0 + $0x198] sm:$0xff] }
  0x1e   :  { %1376 = vmatpush1.msra.mxu1 %v763_v55  ;;  %1144 = vmatprep.subr.mxu0 %v698_v56  ;;  %v812_v21 = vld [vmem:[%s7329_s0 + $0x3a8] sm:$0xff]  ;;  %v811_v23 = vld [vmem:[%s7329_s0 + $0x3a0] sm:$0xff]  ;;  %v810_v25 = vld [vmem:[%s7329_s0 + $0x398] sm:$0xff]  ;;  %v346_v55 = vsub.s32 3, %v3925_v39 }
  0x1f   :  { %1377 = vmatprep.subr.mxu1 %v762_v57  ;;  %1145 = vmatpush1.msra.mxu0 %v697_v58  ;;  %v745_v26 = vld [vmem:[%s7329_s0 + $0x190] sm:$0xff]  ;;  %v744_v28 = vld [vmem:[%s7329_s0 + $0x188] sm:$0xff]  ;;  %v743_v31 = vld [vmem:[%s7329_s0 + $0x180] sm:$0xff]  ;;  %v358_v57 = vsub.s32 6, %v3925_v39 }
  0x20   :  { %1378 = vmatpush1.msra.mxu1 %v761_v59  ;;  %1146 = vmatprep.subr.mxu0 %v696_v60  ;;  %v809_v27 = vld [vmem:[%s7329_s0 + $0x390] sm:$0xff]  ;;  %v808_v29 = vld [vmem:[%s7329_s0 + $0x388] sm:$0xff]  ;;  %v807_v32 = vld [vmem:[%s7329_s0 + $0x380] sm:$0xff]  ;;  %v334_v60 = vsub.s32 0, %v3925_v39 }
  0x21   :  { %1379 = vmatprep.subr.mxu1 %v760_v61  ;;  %1147 = vmatpush1.msra.mxu0 %v695_v62  ;;  %v742_v33 = vld [vmem:[%s7329_s0 + $0x178] sm:$0xff]  ;;  %v741_v35 = vld [vmem:[%s7329_s0 + $0x170] sm:$0xff]  ;;  %v740_v37 = vld [vmem:[%s7329_s0 + $0x168] sm:$0xff]  ;;  %v342_v61 = vsub.s32 2, %v3925_v39 }
  0x22   :  { %1380 = vmatpush1.msra.mxu1 %v759_v63  ;;  %1148 = vmatprep.subr.mxu0 %v758_v0  ;;  %v806_v34 = vld [vmem:[%s7329_s0 + $0x378] sm:$0xff]  ;;  %v805_v36 = vld [vmem:[%s7329_s0 + $0x370] sm:$0xff]  ;;  %v804_v38 = vld [vmem:[%s7329_s0 + $0x368] sm:$0xff] }
  0x23   :  { %1381 = vmatprep.subr.mxu1 %v822_v1  ;;  %1149 = vmatpush2.msra.mxu0 %v757_v2  ;;  %v739_v40 = vld [vmem:[%s7329_s0 + $0x160] sm:$0xff]  ;;  %v738_v42 = vld [vmem:[%s7329_s0 + $0x158] sm:$0xff]  ;;  %v737_v44 = vld [vmem:[%s7329_s0 + $0x150] sm:$0xff] }
  0x24   :  { %1382 = vmatpush2.msra.mxu1 %v821_v3  ;;  %1150 = vmatprep.subr.mxu0 %v756_v4  ;;  %v803_v41 = vld [vmem:[%s7329_s0 + $0x360] sm:$0xff]  ;;  %v802_v43 = vld [vmem:[%s7329_s0 + $0x358] sm:$0xff]  ;;  %v801_v45 = vld [vmem:[%s7329_s0 + $0x350] sm:$0xff] }
  0x25   :  { %1383 = vmatprep.subr.mxu1 %v820_v5  ;;  %1151 = vmatpush2.msra.mxu0 %v755_v6  ;;  %v736_v48 = vld [vmem:[%s7329_s0 + $0x148] sm:$0xff]  ;;  %v328_v50 = vld [vmem:[%s7330_s1] sm:$0xff]  ;;  %v734_v58 = vld [vmem:[%s7329_s0 + $0x138] sm:$0xff] }
  0x26   :  { %1384 = vmatpush2.msra.mxu1 %v819_v7  ;;  %1152 = vmatprep.subr.mxu0 %v754_v8  ;;  %v800_v49 = vld [vmem:[%s7329_s0 + $0x348] sm:$0xff]  ;;  %v735_v53 = vld [vmem:[%s7329_s0 + $0x140] sm:$0xff]  ;;  %v3965_v56 = vrot.slane %v328_v50, %v354_v46  ;;  %v798_v59 = vld [vmem:[%s7329_s0 + $0x338] sm:$0xff]  ;;  %v3976_v62 = vrot.slane %v328_v50, %v350_v52  ;;  %v3978_v63 = vrot.slane %v328_v50, %v362_v47 }
  0x27   :  { %1385 = vmatprep.subr.mxu1 %v818_v9  ;;  %1153 = vmatpush2.msra.mxu0 %v753_v10  ;;  %v799_v54 = vld [vmem:[%s7329_s0 + $0x340] sm:$0xff]  ;;  %v733_v0 = vld [vmem:[%s7329_s0 + $0x130] sm:$0xff]  ;;  %v3986_v2 = vrot.slane %v328_v50, %v358_v57  ;;  %v732_v3 = vld [vmem:[%s7329_s0 + $0x128] sm:$0xff]  ;;  %v3999_v6 = vrot.slane %v328_v50, %v338_v51  ;;  %v4010_v10 = vrot.slane %v328_v50, %v346_v55 }
  0x28   :  { %1386 = vmatpush2.msra.mxu1 %v817_v11  ;;  %1154 = vmatprep.subr.mxu0 %v752_v12  ;;  %v797_v1 = vld [vmem:[%s7329_s0 + $0x330] sm:$0xff]  ;;  %v796_v4 = vld [vmem:[%s7329_s0 + $0x328] sm:$0xff]  ;;  %v731_v5 = vld [vmem:[%s7329_s0 + $0x120] sm:$0xff] }
  0x29   :  { %1387 = vmatprep.subr.mxu1 %v816_v13  ;;  %1155 = vmatpush2.msra.mxu0 %v751_v14  ;;  %v795_v7 = vld [vmem:[%s7329_s0 + $0x320] sm:$0xff]  ;;  %v730_v8 = vld [vmem:[%s7329_s0 + $0x118] sm:$0xff]  ;;  %v21_v9 = vld [vmem:[%s7331_s2 + $0x8] sm:$0xff]  ;;  %v4023_v14 = vrot.slane %v328_v50, %v334_v60 }
  0x2a   :  { %1388 = vmatpush2.msra.mxu1 %v815_v15  ;;  %1156 = vmatprep.subr.mxu0 %v750_v16  ;;  %v794_v11 = vld [vmem:[%s7329_s0 + $0x318] sm:$0xff]  ;;  %v729_v12 = vld [vmem:[%s7329_s0 + $0x110] sm:$0xff]  ;;  %v4027_v15 = vrot.slane %v328_v50, %v342_v61  ;;  %v33_v30 = vld [vmem:[%s7331_s2 + $0x68] sm:$0xff] }
  0x2b   :  { %1389 = vmatprep.subr.mxu1 %v814_v17  ;;  %1157 = vmatpush2.msra.mxu0 %v749_v18  ;;  %v23_v13 = vld [vmem:[%s7331_s2 + $0x18] sm:$0xff]  ;;  %v793_v16 = vld [vmem:[%s7329_s0 + $0x310] sm:$0xff]  ;;  %v20_v17 = vld [vmem:[%s7331_s2] sm:$0xff] }
  0x2c   :  { %1390 = vmatpush2.msra.mxu1 %v813_v19  ;;  %1158 = vmatprep.subr.mxu0 %v748_v20  ;;  %v22_v18 = vld [vmem:[%s7331_s2 + $0x10] sm:$0xff]  ;;  %v728_v19 = vld [vmem:[%s7329_s0 + $0x108] sm:$0xff]  ;;  %v44_v46 = vld [vmem:[%s7331_s2 + $0xc0] sm:$0xff] }
  0x2d   :  { %1391 = vmatprep.subr.mxu1 %v812_v21  ;;  %1159 = vmatpush2.msra.mxu0 %v747_v22  ;;  %v792_v20 = vld [vmem:[%s7329_s0 + $0x308] sm:$0xff]  ;;  %v388_v21 = vmul.f32 %v3999_v6, %v21_v9  ;;  %v727_v22 = vld [vmem:[%s7329_s0 + $0x100] sm:$0xff]  ;;  %v850_v50 = vld [vmem:[%s7329_s0 + $0x4d8] sm:$0xff]  ;;  %v411_v55 = vmul.f32 %v4027_v15, %v44_v46 }
  0x2e   :  { %1392 = vmatpush2.msra.mxu1 %v811_v23  ;;  %1160 = vmatprep.subr.mxu0 %v746_v24  ;;  %v390_v23 = vmul.f32 %v4010_v10, %v23_v13  ;;  %v32_v24 = vld [vmem:[%s7331_s2 + $0x60] sm:$0xff]  ;;  %v53_v57 = vld [vmem:[%s7331_s2 + $0x108] sm:$0xff] }
  0x2f   :  { %1393 = vmatprep.subr.mxu1 %v810_v25  ;;  %1161 = vmatpush2.msra.mxu0 %v745_v26  ;;  %v791_v25 = vld [vmem:[%s7329_s0 + $0x300] sm:$0xff]  ;;  %v387_v26 = vmul.f32 %v4023_v14, %v20_v17  ;;  %v912_v17 = vld [vmem:[%s7329_s0 + $0x6c8] sm:$0xff] }
  0x30   :  { %1394 = vmatpush2.msra.mxu1 %v809_v27  ;;  %1162 = vmatprep.subr.mxu0 %v744_v28  ;;  %v389_v27 = vmul.f32 %v4027_v15, %v22_v18  ;;  %v34_v28 = vld [vmem:[%s7331_s2 + $0x70] sm:$0xff]  ;;  %v851_v47 = vld [vmem:[%s7329_s0 + $0x4e0] sm:$0xff]  ;;  %v846_v18 = vld [vmem:[%s7329_s0 + $0x4b8] sm:$0xff] }
  0x31   :  { %1395 = vmatprep.subr.mxu1 %v808_v29  ;;  %1163 = vmatpush2.msra.mxu0 %v743_v31  ;;  %v31_v29 = vld [vmem:[%s7331_s2 + $0x58] sm:$0xff]  ;;  %v64_v13 = vld [vmem:[%s7331_s2 + $0x160] sm:$0xff] }
  0x32   :  { %1396 = vmatpush2.msra.mxu1 %v807_v32  ;;  %1164 = vmatprep.subr.mxu0 %v742_v33  ;;  %v854_v31 = vld [vmem:[%s7329_s0 + $0x4f8] sm:$0xff]  ;;  %v399_v33 = vmul.f32 %v3999_v6, %v32_v24  ;;  %v431_v24 = vmul.f32 %v4023_v14, %v64_v13  ;;  %v903_v13 = vld [vmem:[%s7329_s0 + $0x680] sm:$0xff] }
  0x33   :  { %1397 = vmatprep.subr.mxu1 %v806_v34  ;;  %1165 = vmatpush2.msra.mxu0 %v741_v35  ;;  %v918_v32 = vld [vmem:[%s7329_s0 + $0x6f8] sm:$0xff]  ;;  %v853_v34 = vld [vmem:[%s7329_s0 + $0x4f0] sm:$0xff]  ;;  %v401_v35 = vmul.f32 %v4010_v10, %v34_v28  ;;  %v77_v28 = vld [vmem:[%s7331_s2 + $0x1c8] sm:$0xff] }
  0x34   :  { %1398 = vmatpush2.msra.mxu1 %v805_v36  ;;  %1166 = vmatprep.subr.mxu0 %v740_v37  ;;  %v43_v36 = vld [vmem:[%s7331_s2 + $0xb8] sm:$0xff]  ;;  %v917_v37 = vld [vmem:[%s7329_s0 + $0x6f0] sm:$0xff] }
  0x35   :  { %1399 = vmatprep.subr.mxu1 %v804_v38  ;;  %1167 = vmatpush2.msra.mxu0 %v739_v40  ;;  %v398_v38 = vmul.f32 %v4023_v14, %v31_v29  ;;  %v400_v40 = vmul.f32 %v4027_v15, %v33_v30  ;;  %v910_v29 = vld [vmem:[%s7329_s0 + $0x6b8] sm:$0xff]  ;;  %v844_v30 = vld [vmem:[%s7329_s0 + $0x4a8] sm:$0xff] }
  0x36   :  { %1400 = vmatpush2.msra.mxu1 %v803_v41  ;;  %1168 = vmatprep.subr.mxu0 %v738_v42  ;;  %v45_v41 = vld [vmem:[%s7331_s2 + $0xc8] sm:$0xff]  ;;  %v42_v42 = vld [vmem:[%s7331_s2 + $0xb0] sm:$0xff] }
  0x37   :  { %1401 = vmatprep.subr.mxu1 %v802_v43  ;;  %1169 = vmatpush2.msra.mxu0 %v737_v44  ;;  %v852_v43 = vld [vmem:[%s7329_s0 + $0x4e8] sm:$0xff]  ;;  %v409_v52 = vmul.f32 %v4023_v14, %v42_v42  ;;  %v842_v42 = vld [vmem:[%s7329_s0 + $0x498] sm:$0xff] }
  0x38   :  { %1402 = vmatpush2.msra.mxu1 %v801_v45  ;;  %1170 = vmatprep.subr.mxu0 %v736_v48  ;;  %v916_v44 = vld [vmem:[%s7329_s0 + $0x6e8] sm:$0xff]  ;;  %v410_v45 = vmul.f32 %v3999_v6, %v43_v36  ;;  %v412_v48 = vmul.f32 %v4010_v10, %v45_v41  ;;  %v444_v36 = vmul.f32 %v4027_v15, %v77_v28 }
  0x39   :  { %1403 = vmatprep.subr.mxu1 %v800_v49  ;;  %1171 = vmatpush2.msra.mxu0 %v735_v53  ;;  %v54_v49 = vld [vmem:[%s7331_s2 + $0x110] sm:$0xff]  ;;  %v56_v53 = vld [vmem:[%s7331_s2 + $0x120] sm:$0xff]  ;;  %v908_v41 = vld [vmem:[%s7329_s0 + $0x6a8] sm:$0xff] }
  0x3a   :  { %1404 = vmatpush2.msra.mxu1 %v799_v54  ;;  %1172 = vmatprep.subr.mxu0 %v734_v58  ;;  %v915_v54 = vld [vmem:[%s7329_s0 + $0x6e0] sm:$0xff]  ;;  %v849_v58 = vld [vmem:[%s7329_s0 + $0x4d0] sm:$0xff] }
  0x3b   :  { %1405 = vmatprep.subr.mxu1 %v798_v59  ;;  %1173 = vmatpush2.msra.mxu0 %v733_v0  ;;  %v421_v59 = vmul.f32 %v3999_v6, %v54_v49  ;;  %v55_v0 = vld [vmem:[%s7331_s2 + $0x118] sm:$0xff]  ;;  %v98_v49 = vld [vmem:[%s7331_s2 + $0x270] sm:$0xff] }
  0x3c   :  { %1406 = vmatpush2.msra.mxu1 %v797_v1  ;;  %1174 = vmatprep.subr.mxu0 %v732_v3  ;;  %v914_v1 = vld [vmem:[%s7329_s0 + $0x6d8] sm:$0xff]  ;;  %v423_v3 = vmul.f32 %v4010_v10, %v56_v53  ;;  %v422_v9 = vmul.f32 %v4027_v15, %v55_v0  ;;  %v465_v0 = vmul.f32 %v3999_v6, %v98_v49 }
  0x3d   :  { %1407 = vmatprep.subr.mxu1 %v796_v4  ;;  %1175 = vmatpush2.msra.mxu0 %v731_v5  ;;  %v913_v4 = vld [vmem:[%s7329_s0 + $0x6d0] sm:$0xff]  ;;  %v420_v5 = vmul.f32 %v4023_v14, %v53_v57  ;;  %v99_v57 = vld [vmem:[%s7331_s2 + $0x278] sm:$0xff] }
  0x3e   :  { %1408 = vmatpush2.msra.mxu1 %v795_v7  ;;  %1176 = vmatprep.subr.mxu0 %v730_v8  ;;  %v65_v7 = vld [vmem:[%s7331_s2 + $0x168] sm:$0xff] }
  0x3f   :  { %1409 = vmatprep.subr.mxu1 %v794_v11  ;;  %1177 = vmatpush2.msra.mxu0 %v729_v12  ;;  %v848_v8 = vld [vmem:[%s7329_s0 + $0x4c8] sm:$0xff]  ;;  %v67_v11 = vld [vmem:[%s7331_s2 + $0x178] sm:$0xff]  ;;  %v847_v12 = vld [vmem:[%s7329_s0 + $0x4c0] sm:$0xff] }
  0x40   :  { %1410 = vmatpush2.msra.mxu1 %v793_v16  ;;  %1178 = vmatprep.subr.mxu0 %v728_v19  ;;  %v66_v16 = vld [vmem:[%s7331_s2 + $0x170] sm:$0xff]  ;;  %v432_v19 = vmul.f32 %v3999_v6, %v65_v7  ;;  %v466_v7 = vmul.f32 %v4027_v15, %v99_v57  ;;  %v830_v57 = vld [vmem:[%s7329_s0 + $0x438] sm:$0xff] }
  0x41   :  { %1411 = vmatprep.subr.mxu1 %v792_v20  ;;  %1179 = vmatpush2.msra.mxu0 %v727_v22  ;;  %v911_v20 = vld [vmem:[%s7329_s0 + $0x6c0] sm:$0xff] }
  0x42   :  { %1180 = vmatprep.mubr.f32.mxu0 %v388_v21  ;;  %1412 = vmatpush2.msra.mxu1 %v791_v25  ;;  %v434_v21 = vmul.f32 %v4010_v10, %v67_v11  ;;  %v76_v22 = vld [vmem:[%s7331_s2 + $0x1c0] sm:$0xff]  ;;  %v433_v25 = vmul.f32 %v4027_v15, %v66_v16  ;;  %v837_v16 = vld [vmem:[%s7329_s0 + $0x470] sm:$0xff] }
  0x43   :  { %1413 = vmatprep.mubr.f32.mxu1 %v390_v23  ;;  %1181 = vmatmul.mubr.f32.vlgmr.msra.gmra.mxu0 %v387_v26  ;;  %v845_v23 = vld [vmem:[%s7329_s0 + $0x4b0] sm:$0xff]  ;;  %v108_v11 = vld [vmem:[%s7331_s2 + $0x2c0] sm:$0xff] }
  0x44   :  { %1414 = vmatmul.mubr.f32.vlgmr.msra.gmra.mxu1 %v389_v27  ;;  %1582 = vmatprep.subr.mxu0 %v854_v31  ;;  %v78_v26 = vld [vmem:[%s7331_s2 + $0x1d0] sm:$0xff]  ;;  %v75_v27 = vld [vmem:[%s7331_s2 + $0x1b8] sm:$0xff]  ;;  %v443_v31 = vmul.f32 %v3999_v6, %v76_v22  ;;  %v475_v22 = vmul.f32 %v4023_v14, %v108_v11 }
  0x45   :  { %1815 = vmatprep.subr.mxu1 %v918_v32  ;;  %1583 = vmatpush1.msra.mxu0 %v853_v34  ;;  %v909_v32 = vld [vmem:[%s7329_s0 + $0x6b0] sm:$0xff]  ;;  %v843_v34 = vld [vmem:[%s7329_s0 + $0x4a0] sm:$0xff]  ;;  %v894_v11 = vld [vmem:[%s7329_s0 + $0x638] sm:$0xff] }
  0x46   :  { %1186 = vmatprep.mubr.f32.mxu0 %v399_v33  ;;  %1419 = vmatprep.mubr.f32.mxu1 %v401_v35  ;;  %v445_v33 = vmul.f32 %v4010_v10, %v78_v26  ;;  %v442_v35 = vmul.f32 %v4023_v14, %v75_v27  ;;  %v836_v26 = vld [vmem:[%s7329_s0 + $0x468] sm:$0xff] }
  0x47   :  { %1816 = vmatpush1.msra.mxu1 %v917_v37  ;;  %1187 = vmatmul.mubr.f32.gmra.mxu0 %v398_v38  ;;  %v87_v37 = vld [vmem:[%s7331_s2 + $0x218] sm:$0xff]  ;;  %v89_v38 = vld [vmem:[%s7331_s2 + $0x228] sm:$0xff] }
  0x48   :  { %1420 = vmatmul.mubr.f32.gmra.mxu1 %v400_v40  ;;  %1584 = vmatprep.subr.mxu0 %v852_v43  ;;  %v86_v40 = vld [vmem:[%s7331_s2 + $0x210] sm:$0xff]  ;;  %v88_v43 = vld [vmem:[%s7331_s2 + $0x220] sm:$0xff]  ;;  %v454_v46 = vmul.f32 %v3999_v6, %v87_v37  ;;  %v900_v27 = vld [vmem:[%s7329_s0 + $0x668] sm:$0xff] }
  0x49   :  { %1817 = vmatprep.subr.mxu1 %v916_v44  ;;  %1585 = vmatpush1.msra.mxu0 %v851_v47  ;;  %v907_v44 = vld [vmem:[%s7329_s0 + $0x6a0] sm:$0xff]  ;;  %v456_v47 = vmul.f32 %v4010_v10, %v89_v38  ;;  %v455_v53 = vmul.f32 %v4027_v15, %v88_v43  ;;  %v130_v38 = vld [vmem:[%s7331_s2 + $0x370] sm:$0xff]  ;;  %v898_v43 = vld [vmem:[%s7329_s0 + $0x658] sm:$0xff] }
  0x4a   :  { %1192 = vmatprep.mubr.f32.mxu0 %v410_v45  ;;  %1425 = vmatprep.mubr.f32.mxu1 %v412_v48  ;;  %v841_v45 = vld [vmem:[%s7329_s0 + $0x490] sm:$0xff]  ;;  %v453_v48 = vmul.f32 %v4023_v14, %v86_v40 }
  0x4b   :  { %1586 = vmatprep.subr.mxu0 %v850_v50  ;;  %1818 = vmatpush1.msra.mxu1 %v915_v54  ;;  %v100_v50 = vld [vmem:[%s7331_s2 + $0x280] sm:$0xff]  ;;  %v97_v54 = vld [vmem:[%s7331_s2 + $0x268] sm:$0xff]  ;;  %v833_v40 = vld [vmem:[%s7329_s0 + $0x450] sm:$0xff] }
  0x4c   :  { %1193 = vmatmul.mubr.f32.gmra.mxu0 %v409_v52  ;;  %1426 = vmatmul.mubr.f32.gmra.mxu1 %v411_v55  ;;  %v906_v52 = vld [vmem:[%s7329_s0 + $0x698] sm:$0xff]  ;;  %v840_v55 = vld [vmem:[%s7329_s0 + $0x488] sm:$0xff] }
  0x4d   :  { %1587 = vmatpush1.msra.mxu0 %v849_v58  ;;  %1819 = vmatprep.subr.mxu1 %v914_v1  ;;  %v905_v58 = vld [vmem:[%s7329_s0 + $0x690] sm:$0xff]  ;;  %v467_v1 = vmul.f32 %v4010_v10, %v100_v50  ;;  %v144_v50 = vld [vmem:[%s7331_s2 + $0x3e0] sm:$0xff] }
  0x4e   :  { %1198 = vmatprep.mubr.f32.mxu0 %v421_v59  ;;  %1820 = vmatpush1.msra.mxu1 %v913_v4  ;;  %v839_v59 = vld [vmem:[%s7329_s0 + $0x480] sm:$0xff]  ;;  %v109_v4 = vld [vmem:[%s7331_s2 + $0x2c8] sm:$0xff] }
  0x4f   :  { %1431 = vmatprep.mubr.f32.mxu1 %v423_v3  ;;  %1588 = vmatprep.subr.mxu0 %v848_v8  ;;  %v464_v3 = vmul.f32 %v4023_v14, %v97_v54  ;;  %v111_v8 = vld [vmem:[%s7331_s2 + $0x2d8] sm:$0xff] }
  0x50   :  { %1199 = vmatmul.mubr.f32.gmra.mxu0 %v420_v5  ;;  %1432 = vmatmul.mubr.f32.gmra.mxu1 %v422_v9  ;;  %v904_v5 = vld [vmem:[%s7329_s0 + $0x688] sm:$0xff]  ;;  %v838_v9 = vld [vmem:[%s7329_s0 + $0x478] sm:$0xff] }
  0x51   :  { %1589 = vmatpush1.msra.mxu0 %v847_v12  ;;  %1821 = vmatprep.subr.mxu1 %v912_v17  ;;  %v110_v12 = vld [vmem:[%s7331_s2 + $0x2d0] sm:$0xff]  ;;  %v476_v17 = vmul.f32 %v3999_v6, %v109_v4  ;;  %v143_v54 = vld [vmem:[%s7331_s2 + $0x3d8] sm:$0xff] }
  0x52   :  { %1590 = vmatprep.subr.mxu0 %v846_v18  ;;  %1822 = vmatpush1.msra.mxu1 %v911_v20  ;;  %v902_v18 = vld [vmem:[%s7329_s0 + $0x678] sm:$0xff]  ;;  %v120_v20 = vld [vmem:[%s7331_s2 + $0x320] sm:$0xff] }
  0x53   :  { %1204 = vmatprep.mubr.f32.mxu0 %v432_v19  ;;  %1437 = vmatprep.mubr.f32.mxu1 %v434_v21  ;;  %v478_v19 = vmul.f32 %v4010_v10, %v111_v8  ;;  %v901_v21 = vld [vmem:[%s7329_s0 + $0x670] sm:$0xff]  ;;  %v487_v28 = vmul.f32 %v3999_v6, %v120_v20  ;;  %v152_v8 = vld [vmem:[%s7331_s2 + $0x420] sm:$0xff] }
  0x54   :  { %1591 = vmatpush1.msra.mxu0 %v845_v23  ;;  %1438 = vmatmul.mubr.f32.gmra.mxu1 %v433_v25  ;;  %v477_v23 = vmul.f32 %v4027_v15, %v110_v12  ;;  %v119_v25 = vld [vmem:[%s7331_s2 + $0x318] sm:$0xff]  ;;  %v828_v12 = vld [vmem:[%s7329_s0 + $0x428] sm:$0xff] }
  0x55   :  { %1205 = vmatmul.mubr.f32.gmra.mxu0 %v431_v24  ;;  %1823 = vmatprep.subr.mxu1 %v910_v29  ;;  %v122_v24 = vld [vmem:[%s7331_s2 + $0x330] sm:$0xff]  ;;  %v121_v29 = vld [vmem:[%s7331_s2 + $0x328] sm:$0xff] }
  0x56   :  { %1592 = vmatprep.subr.mxu0 %v844_v30  ;;  %1824 = vmatpush1.msra.mxu1 %v909_v32  ;;  %v835_v30 = vld [vmem:[%s7329_s0 + $0x460] sm:$0xff]  ;;  %v131_v32 = vld [vmem:[%s7331_s2 + $0x378] sm:$0xff]  ;;  %v488_v37 = vmul.f32 %v4027_v15, %v121_v29 }
  0x57   :  { %1210 = vmatprep.mubr.f32.mxu0 %v443_v31  ;;  %1443 = vmatprep.mubr.f32.mxu1 %v445_v33  ;;  %v489_v31 = vmul.f32 %v4010_v10, %v122_v24  ;;  %v834_v33 = vld [vmem:[%s7329_s0 + $0x458] sm:$0xff]  ;;  %v892_v24 = vld [vmem:[%s7329_s0 + $0x628] sm:$0xff] }
  0x58   :  { %1593 = vmatpush1.msra.mxu0 %v843_v34  ;;  %1444 = vmatmul.mubr.f32.gmra.mxu1 %v444_v36  ;;  %v486_v34 = vmul.f32 %v4023_v14, %v119_v25  ;;  %v899_v36 = vld [vmem:[%s7329_s0 + $0x660] sm:$0xff]  ;;  %v826_v25 = vld [vmem:[%s7329_s0 + $0x418] sm:$0xff] }
  0x59   :  { %1211 = vmatmul.mubr.f32.gmra.mxu0 %v442_v35  ;;  %1825 = vmatprep.subr.mxu1 %v908_v41  ;;  %v133_v35 = vld [vmem:[%s7331_s2 + $0x388] sm:$0xff]  ;;  %v498_v41 = vmul.f32 %v3999_v6, %v131_v32  ;;  %v175_v32 = vld [vmem:[%s7331_s2 + $0x4d8] sm:$0xff] }
  0x5a   :  { %1594 = vmatprep.subr.mxu0 %v842_v42  ;;  %1826 = vmatpush1.msra.mxu1 %v907_v44  ;;  %v132_v42 = vld [vmem:[%s7331_s2 + $0x380] sm:$0xff]  ;;  %v500_v44 = vmul.f32 %v4010_v10, %v133_v35 }
  0x5b   :  { %1595 = vmatpush1.msra.mxu0 %v841_v45  ;;  %1216 = vmatprep.mubr.f32.mxu0 %v454_v46  ;;  %v897_v45 = vld [vmem:[%s7329_s0 + $0x650] sm:$0xff]  ;;  %v497_v46 = vmul.f32 %v4023_v14, %v130_v38  ;;  %v499_v49 = vmul.f32 %v4027_v15, %v132_v42  ;;  %v176_v38 = vld [vmem:[%s7331_s2 + $0x4e0] sm:$0xff]  ;;  %v542_v42 = vmul.f32 %v3999_v6, %v175_v32 }
  0x5c   :  { %1449 = vmatprep.mubr.f32.mxu1 %v456_v47  ;;  %1827 = vmatprep.subr.mxu1 %v906_v52  ;;  %v142_v47 = vld [vmem:[%s7331_s2 + $0x3d0] sm:$0xff]  ;;  %v831_v52 = vld [vmem:[%s7329_s0 + $0x440] sm:$0xff] }
  0x5d   :  { %1217 = vmatmul.mubr.f32.gmra.mxu0 %v453_v48  ;;  %1450 = vmatmul.mubr.f32.gmra.mxu1 %v455_v53  ;;  %v832_v48 = vld [vmem:[%s7329_s0 + $0x448] sm:$0xff] }
  0x5e   :  { %1596 = vmatprep.subr.mxu0 %v840_v55  ;;  %1828 = vmatpush1.msra.mxu1 %v905_v58  ;;  %v141_v53 = vld [vmem:[%s7331_s2 + $0x3c8] sm:$0xff]  ;;  %v509_v58 = vmul.f32 %v3999_v6, %v142_v47  ;;  %v543_v47 = vmul.f32 %v4027_v15, %v176_v38  ;;  %v878_v38 = vld [vmem:[%s7329_s0 + $0x5b8] sm:$0xff] }
  0x5f   :  { %1597 = vmatpush1.msra.mxu0 %v839_v59  ;;  %1222 = vmatprep.mubr.f32.mxu0 %v465_v0  ;;  %v896_v55 = vld [vmem:[%s7329_s0 + $0x648] sm:$0xff]  ;;  %v895_v59 = vld [vmem:[%s7329_s0 + $0x640] sm:$0xff]  ;;  %v511_v0 = vmul.f32 %v4010_v10, %v144_v50  ;;  %v508_v4 = vmul.f32 %v4023_v14, %v141_v53 }
  0x60   :  { %1455 = vmatprep.mubr.f32.mxu1 %v467_v1  ;;  %1829 = vmatprep.subr.mxu1 %v904_v5  ;;  %v153_v1 = vld [vmem:[%s7331_s2 + $0x428] sm:$0xff]  ;;  %v510_v5 = vmul.f32 %v4027_v15, %v143_v54  ;;  %v887_v53 = vld [vmem:[%s7329_s0 + $0x600] sm:$0xff]  ;;  %v885_v54 = vld [vmem:[%s7329_s0 + $0x5f0] sm:$0xff] }
  0x61   :  { %1223 = vmatmul.mubr.f32.gmra.mxu0 %v464_v3  ;;  %1456 = vmatmul.mubr.f32.gmra.mxu1 %v466_v7  ;;  %v829_v3 = vld [vmem:[%s7329_s0 + $0x430] sm:$0xff]  ;;  %v155_v7 = vld [vmem:[%s7331_s2 + $0x438] sm:$0xff]  ;;  %v185_v50 = vld [vmem:[%s7331_s2 + $0x528] sm:$0xff] }
  0x62   :  { %1598 = vmatprep.subr.mxu0 %v838_v9  ;;  %1830 = vmatpush1.msra.mxu1 %v903_v13  ;;  %v154_v9 = vld [vmem:[%s7331_s2 + $0x430] sm:$0xff]  ;;  %v520_v13 = vmul.f32 %v3999_v6, %v153_v1  ;;  %v552_v1 = vmul.f32 %v4023_v14, %v185_v50  ;;  %v942_v50 = vld [vmem:[%s7329_s0 + $0x7b8] sm:$0xff] }
  0x63   :  { %1599 = vmatpush1.msra.mxu0 %v837_v16  ;;  %1831 = vmatprep.subr.mxu1 %v902_v18  ;;  %v893_v16 = vld [vmem:[%s7329_s0 + $0x630] sm:$0xff]  ;;  %v827_v18 = vld [vmem:[%s7329_s0 + $0x420] sm:$0xff]  ;;  %v521_v20 = vmul.f32 %v4027_v15, %v154_v9 }
  0x64   :  { %1228 = vmatprep.mubr.f32.mxu0 %v476_v17  ;;  %1461 = vmatprep.mubr.f32.mxu1 %v478_v19  ;;  %v522_v17 = vmul.f32 %v4010_v10, %v155_v7  ;;  %v519_v19 = vmul.f32 %v4023_v14, %v152_v8  ;;  %v884_v7 = vld [vmem:[%s7329_s0 + $0x5e8] sm:$0xff] }
  0x65   :  { %1832 = vmatpush1.msra.mxu1 %v901_v21  ;;  %1229 = vmatmul.mubr.f32.gmra.mxu0 %v475_v22  ;;  %v164_v21 = vld [vmem:[%s7331_s2 + $0x480] sm:$0xff]  ;;  %v166_v22 = vld [vmem:[%s7331_s2 + $0x490] sm:$0xff]  ;;  %v948_v8 = vld [vmem:[%s7329_s0 + $0x7e8] sm:$0xff] }
  0x66   :  { %1462 = vmatmul.mubr.f32.gmra.mxu1 %v477_v23  ;;  %1600 = vmatprep.subr.mxu0 %v836_v26  ;;  %v163_v23 = vld [vmem:[%s7331_s2 + $0x478] sm:$0xff]  ;;  %v165_v26 = vld [vmem:[%s7331_s2 + $0x488] sm:$0xff]  ;;  %v531_v29 = vmul.f32 %v3999_v6, %v164_v21 }
  0x67   :  { %1833 = vmatprep.subr.mxu1 %v900_v27  ;;  %1601 = vmatpush1.msra.mxu0 %v835_v30  ;;  %v891_v27 = vld [vmem:[%s7329_s0 + $0x620] sm:$0xff]  ;;  %v533_v30 = vmul.f32 %v4010_v10, %v166_v22  ;;  %v532_v35 = vmul.f32 %v4027_v15, %v165_v26  ;;  %v207_v22 = vld [vmem:[%s7331_s2 + $0x5d8] sm:$0xff] }
  0x68   :  { %1234 = vmatprep.mubr.f32.mxu0 %v487_v28  ;;  %1467 = vmatprep.mubr.f32.mxu1 %v489_v31  ;;  %v825_v28 = vld [vmem:[%s7329_s0 + $0x410] sm:$0xff]  ;;  %v530_v31 = vmul.f32 %v4023_v14, %v163_v23  ;;  %v946_v26 = vld [vmem:[%s7329_s0 + $0x7d8] sm:$0xff] }
  0x69   :  { %1602 = vmatprep.subr.mxu0 %v834_v33  ;;  %1834 = vmatpush1.msra.mxu1 %v899_v36  ;;  %v177_v33 = vld [vmem:[%s7331_s2 + $0x4e8] sm:$0xff]  ;;  %v174_v36 = vld [vmem:[%s7331_s2 + $0x4d0] sm:$0xff] }
  0x6a   :  { %1235 = vmatmul.mubr.f32.gmra.mxu0 %v486_v34  ;;  %1468 = vmatmul.mubr.f32.gmra.mxu1 %v488_v37  ;;  %v890_v34 = vld [vmem:[%s7329_s0 + $0x618] sm:$0xff]  ;;  %v824_v37 = vld [vmem:[%s7329_s0 + $0x408] sm:$0xff]  ;;  %v881_v23 = vld [vmem:[%s7329_s0 + $0x5d0] sm:$0xff] }
  0x6b   :  { %1603 = vmatpush1.msra.mxu0 %v833_v40  ;;  %1835 = vmatprep.subr.mxu1 %v898_v43  ;;  %v889_v40 = vld [vmem:[%s7329_s0 + $0x610] sm:$0xff]  ;;  %v544_v43 = vmul.f32 %v4010_v10, %v177_v33  ;;  %v221_v33 = vld [vmem:[%s7331_s2 + $0x648] sm:$0xff] }
  0x6c   :  { %1240 = vmatprep.mubr.f32.mxu0 %v498_v41  ;;  %1836 = vmatpush1.msra.mxu1 %v897_v45  ;;  %v823_v41 = vld [vmem:[%s7329_s0 + $0x400] sm:$0xff]  ;;  %v186_v45 = vld [vmem:[%s7331_s2 + $0x530] sm:$0xff] }
  0x6d   :  { %1473 = vmatprep.mubr.f32.mxu1 %v500_v44  ;;  %1604 = vmatprep.subr.mxu0 %v832_v48  ;;  %v541_v44 = vmul.f32 %v4023_v14, %v174_v36  ;;  %v188_v48 = vld [vmem:[%s7331_s2 + $0x540] sm:$0xff] }
  0x6e   :  { %1241 = vmatmul.mubr.f32.gmra.mxu0 %v497_v46  ;;  %1474 = vmatmul.mubr.f32.gmra.mxu1 %v499_v49  ;;  %v888_v46 = vld [vmem:[%s7329_s0 + $0x608] sm:$0xff]  ;;  %v886_v49 = vld [vmem:[%s7329_s0 + $0x5f8] sm:$0xff]  ;;  %v220_v36 = vld [vmem:[%s7331_s2 + $0x640] sm:$0xff] }
  0x6f   :  { %1605 = vmatpush1.msra.mxu0 %v831_v52  ;;  %1837 = vmatprep.subr.mxu1 %v896_v55  ;;  %v187_v52 = vld [vmem:[%s7331_s2 + $0x538] sm:$0xff]  ;;  %v553_v55 = vmul.f32 %v3999_v6, %v186_v45 }
  0x70   :  { %1606 = vmatprep.subr.mxu0 %v830_v57  ;;  %1838 = vmatpush1.msra.mxu1 %v895_v59  ;;  %v950_v57 = vld [vmem:[%s7329_s0 + $0x7f8] sm:$0xff]  ;;  %v197_v59 = vld [vmem:[%s7331_s2 + $0x588] sm:$0xff] }
  0x71   :  { %1246 = vmatprep.mubr.f32.mxu0 %v509_v58  ;;  %1479 = vmatprep.mubr.f32.mxu1 %v511_v0  ;;  %v555_v58 = vmul.f32 %v4010_v10, %v188_v48  ;;  %v949_v0 = vld [vmem:[%s7329_s0 + $0x7f0] sm:$0xff]  ;;  %v564_v9 = vmul.f32 %v3999_v6, %v197_v59  ;;  %v229_v48 = vld [vmem:[%s7331_s2 + $0x688] sm:$0xff] }
  0x72   :  { %1607 = vmatpush1.msra.mxu0 %v829_v3  ;;  %1480 = vmatmul.mubr.f32.gmra.mxu1 %v510_v5  ;;  %v554_v3 = vmul.f32 %v4027_v15, %v187_v52  ;;  %v196_v5 = vld [vmem:[%s7331_s2 + $0x580] sm:$0xff]  ;;  %v876_v52 = vld [vmem:[%s7329_s0 + $0x5a8] sm:$0xff] }
  0x73   :  { %1247 = vmatmul.mubr.f32.gmra.mxu0 %v508_v4  ;;  %1839 = vmatprep.subr.mxu1 %v894_v11  ;;  %v199_v4 = vld [vmem:[%s7331_s2 + $0x598] sm:$0xff]  ;;  %v198_v11 = vld [vmem:[%s7331_s2 + $0x590] sm:$0xff] }
  0x74   :  { %1608 = vmatprep.subr.mxu0 %v828_v12  ;;  %1840 = vmatpush1.msra.mxu1 %v893_v16  ;;  %v883_v12 = vld [vmem:[%s7329_s0 + $0x5e0] sm:$0xff]  ;;  %v565_v21 = vmul.f32 %v4027_v15, %v198_v11 }
  0x75   :  { %1252 = vmatprep.mubr.f32.mxu0 %v520_v13  ;;  %1485 = vmatprep.mubr.f32.mxu1 %v522_v17  ;;  %v566_v13 = vmul.f32 %v4010_v10, %v199_v4  ;;  %v208_v16 = vld [vmem:[%s7331_s2 + $0x5e0] sm:$0xff]  ;;  %v882_v17 = vld [vmem:[%s7329_s0 + $0x5d8] sm:$0xff]  ;;  %v940_v4 = vld [vmem:[%s7329_s0 + $0x7a8] sm:$0xff] }
  0x76   :  { %1609 = vmatpush1.msra.mxu0 %v827_v18  ;;  %1486 = vmatmul.mubr.f32.gmra.mxu1 %v521_v20  ;;  %v563_v18 = vmul.f32 %v4023_v14, %v196_v5  ;;  %v947_v20 = vld [vmem:[%s7329_s0 + $0x7e0] sm:$0xff]  ;;  %v874_v5 = vld [vmem:[%s7329_s0 + $0x598] sm:$0xff] }
  0x77   :  { %1253 = vmatmul.mubr.f32.gmra.mxu0 %v519_v19  ;;  %1841 = vmatprep.subr.mxu1 %v892_v24  ;;  %v210_v19 = vld [vmem:[%s7331_s2 + $0x5f0] sm:$0xff]  ;;  %v575_v24 = vmul.f32 %v3999_v6, %v208_v16  ;;  %v252_v16 = vld [vmem:[%s7331_s2 + $0x740] sm:$0xff] }
  0x78   :  { %1610 = vmatprep.subr.mxu0 %v826_v25  ;;  %1842 = vmatpush1.msra.mxu1 %v891_v27  ;;  %v209_v25 = vld [vmem:[%s7331_s2 + $0x5e8] sm:$0xff]  ;;  %v577_v27 = vmul.f32 %v4010_v10, %v210_v19 }
  0x79   :  { %1611 = vmatpush1.msra.mxu0 %v825_v28  ;;  %1258 = vmatprep.mubr.f32.mxu0 %v531_v29  ;;  %v945_v28 = vld [vmem:[%s7329_s0 + $0x7d0] sm:$0xff]  ;;  %v574_v29 = vmul.f32 %v4023_v14, %v207_v22  ;;  %v576_v32 = vmul.f32 %v4027_v15, %v209_v25  ;;  %v253_v22 = vld [vmem:[%s7331_s2 + $0x748] sm:$0xff]  ;;  %v619_v25 = vmul.f32 %v3999_v6, %v252_v16 }
  0x7a   :  { %1491 = vmatprep.mubr.f32.mxu1 %v533_v30  ;;  %1843 = vmatprep.subr.mxu1 %v890_v34  ;;  %v219_v30 = vld [vmem:[%s7331_s2 + $0x638] sm:$0xff]  ;;  %v879_v34 = vld [vmem:[%s7329_s0 + $0x5c0] sm:$0xff] }
  0x7b   :  { %1259 = vmatmul.mubr.f32.gmra.mxu0 %v530_v31  ;;  %1492 = vmatmul.mubr.f32.gmra.mxu1 %v532_v35  ;;  %v880_v31 = vld [vmem:[%s7329_s0 + $0x5c8] sm:$0xff]  ;;  %v218_v35 = vld [vmem:[%s7331_s2 + $0x630] sm:$0xff] }
  0x7c   :  { %1612 = vmatprep.subr.mxu0 %v824_v37  ;;  %1844 = vmatpush1.msra.mxu1 %v889_v40  ;;  %v944_v37 = vld [vmem:[%s7329_s0 + $0x7c8] sm:$0xff]  ;;  %v586_v40 = vmul.f32 %v3999_v6, %v219_v30  ;;  %v585_v45 = vmul.f32 %v4023_v14, %v218_v35  ;;  %v620_v30 = vmul.f32 %v4027_v15, %v253_v22  ;;  %v935_v35 = vld [vmem:[%s7329_s0 + $0x780] sm:$0xff]  ;;  %v862_v22 = vld [vmem:[%s7329_s0 + $0x538] sm:$0xff] }
  0x7d   :  { %1613 = vmatpush1.msra.mxu0 %v823_v41  ;;  %1264 = vmatprep.mubr.f32.mxu0 %v542_v42  ;;  %v943_v41 = vld [vmem:[%s7329_s0 + $0x7c0] sm:$0xff]  ;;  %v588_v42 = vmul.f32 %v4010_v10, %v221_v33  ;;  %v262_v33 = vld [vmem:[%s7331_s2 + $0x790] sm:$0xff] }
  0x7e   :  { %1497 = vmatprep.mubr.f32.mxu1 %v544_v43  ;;  %1845 = vmatprep.subr.mxu1 %v888_v46  ;;  %v230_v43 = vld [vmem:[%s7331_s2 + $0x690] sm:$0xff]  ;;  %v587_v46 = vmul.f32 %v4027_v15, %v220_v36 }
  0x7f   :  { %1265 = vmatmul.mubr.f32.gmra.mxu0 %v541_v44  ;;  %1498 = vmatmul.mubr.f32.gmra.mxu1 %v543_v47  ;;  %v877_v44 = vld [vmem:[%s7329_s0 + $0x5b0] sm:$0xff]  ;;  %v232_v47 = vld [vmem:[%s7331_s2 + $0x6a0] sm:$0xff] }
  0x80   :  { %1614 = vmatprep.subr.mxu0 %v886_v49  ;;  %1846 = vmatpush1.msra.mxu1 %v887_v53  ;;  %v231_v49 = vld [vmem:[%s7331_s2 + $0x698] sm:$0xff]  ;;  %v597_v53 = vmul.f32 %v3999_v6, %v230_v43  ;;  %v869_v36 = vld [vmem:[%s7329_s0 + $0x570] sm:$0xff]  ;;  %v629_v43 = vmul.f32 %v4023_v14, %v262_v33 }
  0x81   :  { %1615 = vmatpush2.msra.mxu0 %v885_v54  ;;  %1847 = vmatprep.subr.mxu1 %v950_v57  ;;  %v941_v54 = vld [vmem:[%s7329_s0 + $0x7b0] sm:$0xff]  ;;  %v875_v57 = vld [vmem:[%s7329_s0 + $0x5a0] sm:$0xff]  ;;  %v598_v59 = vmul.f32 %v4027_v15, %v231_v49  ;;  %v926_v33 = vld [vmem:[%s7329_s0 + $0x738] sm:$0xff] }
  0x82   :  { %1270 = vmatprep.mubr.f32.mxu0 %v553_v55  ;;  %1503 = vmatprep.mubr.f32.mxu1 %v555_v58  ;;  %v599_v55 = vmul.f32 %v4010_v10, %v232_v47  ;;  %v596_v58 = vmul.f32 %v4023_v14, %v229_v48  ;;  %v868_v47 = vld [vmem:[%s7329_s0 + $0x568] sm:$0xff] }
  0x83   :  { %1848 = vmatpush2.msra.mxu1 %v949_v0  ;;  %1271 = vmatmul.mubr.f32.gmra.mxu0 %v552_v1  ;;  %v241_v0 = vld [vmem:[%s7331_s2 + $0x6e8] sm:$0xff]  ;;  %v243_v1 = vld [vmem:[%s7331_s2 + $0x6f8] sm:$0xff] }
  0x84   :  { %1504 = vmatmul.mubr.f32.gmra.mxu1 %v554_v3  ;;  %1616 = vmatprep.subr.mxu0 %v884_v7  ;;  %v240_v3 = vld [vmem:[%s7331_s2 + $0x6e0] sm:$0xff]  ;;  %v242_v7 = vld [vmem:[%s7331_s2 + $0x6f0] sm:$0xff]  ;;  %v608_v11 = vmul.f32 %v3999_v6, %v241_v0  ;;  %v932_v48 = vld [vmem:[%s7329_s0 + $0x768] sm:$0xff] }
  0x85   :  { %1849 = vmatprep.subr.mxu1 %v948_v8  ;;  %1617 = vmatpush2.msra.mxu0 %v883_v12  ;;  %v939_v8 = vld [vmem:[%s7329_s0 + $0x7a0] sm:$0xff]  ;;  %v610_v12 = vmul.f32 %v4010_v10, %v243_v1  ;;  %v609_v19 = vmul.f32 %v4027_v15, %v242_v7  ;;  %v930_v7 = vld [vmem:[%s7329_s0 + $0x758] sm:$0xff] }
  0x86   :  { %1276 = vmatprep.mubr.f32.mxu0 %v564_v9  ;;  %1509 = vmatprep.mubr.f32.mxu1 %v566_v13  ;;  %v873_v9 = vld [vmem:[%s7329_s0 + $0x590] sm:$0xff]  ;;  %v607_v13 = vmul.f32 %v4023_v14, %v240_v3  ;;  %v284_v1 = vld [vmem:[%s7331_s2 + $0x840] sm:$0xff] }
  0x87   :  { %1618 = vmatprep.subr.mxu0 %v882_v17  ;;  %1850 = vmatpush2.msra.mxu1 %v947_v20  ;;  %v254_v17 = vld [vmem:[%s7331_s2 + $0x750] sm:$0xff]  ;;  %v251_v20 = vld [vmem:[%s7331_s2 + $0x738] sm:$0xff] }
  0x88   :  { %1277 = vmatmul.mubr.f32.gmra.mxu0 %v563_v18  ;;  %1510 = vmatmul.mubr.f32.gmra.mxu1 %v565_v21  ;;  %v938_v18 = vld [vmem:[%s7329_s0 + $0x798] sm:$0xff]  ;;  %v872_v21 = vld [vmem:[%s7329_s0 + $0x588] sm:$0xff]  ;;  %v865_v3 = vld [vmem:[%s7329_s0 + $0x550] sm:$0xff] }
  0x89   :  { %1619 = vmatpush2.msra.mxu0 %v881_v23  ;;  %1851 = vmatprep.subr.mxu1 %v946_v26  ;;  %v937_v23 = vld [vmem:[%s7329_s0 + $0x790] sm:$0xff]  ;;  %v621_v26 = vmul.f32 %v4010_v10, %v254_v17 }
  0x8a   :  { %1282 = vmatprep.mubr.f32.mxu0 %v575_v24  ;;  %1852 = vmatpush2.msra.mxu1 %v945_v28  ;;  %v871_v24 = vld [vmem:[%s7329_s0 + $0x580] sm:$0xff]  ;;  %v263_v28 = vld [vmem:[%s7331_s2 + $0x798] sm:$0xff]  ;;  %v298_v17 = vld [vmem:[%s7331_s2 + $0x8b0] sm:$0xff] }
  0x8b   :  { %1515 = vmatprep.mubr.f32.mxu1 %v577_v27  ;;  %1620 = vmatprep.subr.mxu0 %v880_v31  ;;  %v618_v27 = vmul.f32 %v4023_v14, %v251_v20  ;;  %v265_v31 = vld [vmem:[%s7331_s2 + $0x7a8] sm:$0xff] }
  0x8c   :  { %1283 = vmatmul.mubr.f32.gmra.mxu0 %v574_v29  ;;  %1516 = vmatmul.mubr.f32.gmra.mxu1 %v576_v32  ;;  %v936_v29 = vld [vmem:[%s7329_s0 + $0x788] sm:$0xff]  ;;  %v870_v32 = vld [vmem:[%s7329_s0 + $0x578] sm:$0xff] }
  0x8d   :  { %1621 = vmatpush2.msra.mxu0 %v879_v34  ;;  %1853 = vmatprep.subr.mxu1 %v944_v37  ;;  %v264_v34 = vld [vmem:[%s7331_s2 + $0x7a0] sm:$0xff]  ;;  %v630_v37 = vmul.f32 %v3999_v6, %v263_v28  ;;  %v297_v20 = vld [vmem:[%s7331_s2 + $0x8a8] sm:$0xff] }
  0x8e   :  { %1622 = vmatprep.subr.mxu0 %v878_v38  ;;  %1854 = vmatpush2.msra.mxu1 %v943_v41  ;;  %v934_v38 = vld [vmem:[%s7329_s0 + $0x778] sm:$0xff]  ;;  %v274_v41 = vld [vmem:[%s7331_s2 + $0x7f0] sm:$0xff] }
  0x8f   :  { %1288 = vmatprep.mubr.f32.mxu0 %v586_v40  ;;  %1521 = vmatprep.mubr.f32.mxu1 %v588_v42  ;;  %v632_v40 = vmul.f32 %v4010_v10, %v265_v31  ;;  %v933_v42 = vld [vmem:[%s7329_s0 + $0x770] sm:$0xff]  ;;  %v641_v49 = vmul.f32 %v3999_v6, %v274_v41 }
  0x90   :  { %1623 = vmatpush2.msra.mxu0 %v877_v44  ;;  %1522 = vmatmul.mubr.f32.gmra.mxu1 %v587_v46  ;;  %v631_v44 = vmul.f32 %v4027_v15, %v264_v34  ;;  %v273_v46 = vld [vmem:[%s7331_s2 + $0x7e8] sm:$0xff]  ;;  %v306_v31 = vld [vmem:[%s7331_s2 + $0x8f0] sm:$0xff] }
  0x91   :  { %1289 = vmatmul.mubr.f32.gmra.mxu0 %v585_v45  ;;  %1855 = vmatprep.subr.mxu1 %v942_v50  ;;  %v276_v45 = vld [vmem:[%s7331_s2 + $0x800] sm:$0xff]  ;;  %v275_v50 = vld [vmem:[%s7331_s2 + $0x7f8] sm:$0xff]  ;;  %v860_v34 = vld [vmem:[%s7329_s0 + $0x528] sm:$0xff] }
  0x92   :  { %1624 = vmatprep.subr.mxu0 %v876_v52  ;;  %1856 = vmatpush2.msra.mxu1 %v941_v54  ;;  %v867_v52 = vld [vmem:[%s7329_s0 + $0x560] sm:$0xff]  ;;  %v285_v54 = vld [vmem:[%s7331_s2 + $0x848] sm:$0xff]  ;;  %v642_v0 = vmul.f32 %v4027_v15, %v275_v50 }
  0x93   :  { %1294 = vmatprep.mubr.f32.mxu0 %v597_v53  ;;  %1527 = vmatprep.mubr.f32.mxu1 %v599_v55  ;;  %v643_v53 = vmul.f32 %v4010_v10, %v276_v45  ;;  %v866_v55 = vld [vmem:[%s7329_s0 + $0x558] sm:$0xff]  ;;  %v924_v45 = vld [vmem:[%s7329_s0 + $0x728] sm:$0xff] }
  0x94   :  { %1625 = vmatpush2.msra.mxu0 %v875_v57  ;;  %1528 = vmatmul.mubr.f32.gmra.mxu1 %v598_v59  ;;  %v640_v57 = vmul.f32 %v4023_v14, %v273_v46  ;;  %v931_v59 = vld [vmem:[%s7329_s0 + $0x760] sm:$0xff]  ;;  %v858_v46 = vld [vmem:[%s7329_s0 + $0x518] sm:$0xff] }
  0x95   :  { %1295 = vmatmul.mubr.f32.gmra.mxu0 %v596_v58  ;;  %1857 = vmatprep.subr.mxu1 %v940_v4  ;;  %v287_v58 = vld [vmem:[%s7331_s2 + $0x858] sm:$0xff]  ;;  %v652_v4 = vmul.f32 %v3999_v6, %v285_v54  ;;  %v25_v54 = vld [vmem:[%s7331_s2 + $0x28] sm:$0xff] }
  0x96   :  { %1626 = vmatprep.subr.mxu0 %v874_v5  ;;  %1858 = vmatpush2.msra.mxu1 %v939_v8  ;;  %v286_v5 = vld [vmem:[%s7331_s2 + $0x850] sm:$0xff]  ;;  %v654_v8 = vmul.f32 %v4010_v10, %v287_v58  ;;  %v855_v58 = vld [vmem:[%s7329_s0 + $0x500] sm:$0xff] }
  0x97   :  { %1627 = vmatpush2.msra.mxu0 %v873_v9  ;;  %1300 = vmatprep.mubr.f32.mxu0 %v608_v11  ;;  %v929_v9 = vld [vmem:[%s7329_s0 + $0x750] sm:$0xff]  ;;  %v651_v11 = vmul.f32 %v4023_v14, %v284_v1  ;;  %v653_v16 = vmul.f32 %v4027_v15, %v286_v5  ;;  %v920_v1 = vld [vmem:[%s7329_s0 + $0x708] sm:$0xff]  ;;  %v919_v5 = vld [vmem:[%s7329_s0 + $0x700] sm:$0xff] }
  0x98   :  { %1533 = vmatprep.mubr.f32.mxu1 %v610_v12  ;;  %1859 = vmatprep.subr.mxu1 %v938_v18  ;;  %v296_v12 = vld [vmem:[%s7331_s2 + $0x8a0] sm:$0xff] }
  0x99   :  { %1301 = vmatmul.mubr.f32.gmra.mxu0 %v607_v13  ;;  %1534 = vmatmul.mubr.f32.gmra.mxu1 %v609_v19  ;;  %v864_v13 = vld [vmem:[%s7329_s0 + $0x548] sm:$0xff]  ;;  %v863_v18 = vld [vmem:[%s7329_s0 + $0x540] sm:$0xff]  ;;  %v295_v19 = vld [vmem:[%s7331_s2 + $0x898] sm:$0xff] }
  0x9a   :  { %1628 = vmatprep.subr.mxu0 %v872_v21  ;;  %1860 = vmatpush2.msra.mxu1 %v937_v23  ;;  %v928_v21 = vld [vmem:[%s7329_s0 + $0x748] sm:$0xff]  ;;  %v663_v23 = vmul.f32 %v3999_v6, %v296_v12  ;;  %v662_v28 = vmul.f32 %v4023_v14, %v295_v19  ;;  %v38_v12 = vld [vmem:[%s7331_s2 + $0x90] sm:$0xff] }
  0x9b   :  { %1629 = vmatpush2.msra.mxu0 %v871_v24  ;;  %1306 = vmatprep.mubr.f32.mxu0 %v619_v25  ;;  %v927_v24 = vld [vmem:[%s7329_s0 + $0x740] sm:$0xff]  ;;  %v665_v25 = vmul.f32 %v4010_v10, %v298_v17  ;;  %v37_v17 = vld [vmem:[%s7331_s2 + $0x88] sm:$0xff] }
  0x9c   :  { %1539 = vmatprep.mubr.f32.mxu1 %v621_v26  ;;  %1861 = vmatprep.subr.mxu1 %v936_v29  ;;  %v307_v26 = vld [vmem:[%s7331_s2 + $0x8f8] sm:$0xff]  ;;  %v664_v29 = vmul.f32 %v4027_v15, %v297_v20 }
  0x9d   :  { %1307 = vmatmul.mubr.f32.gmra.mxu0 %v618_v27  ;;  %1540 = vmatmul.mubr.f32.gmra.mxu1 %v620_v30  ;;  %v861_v27 = vld [vmem:[%s7329_s0 + $0x530] sm:$0xff]  ;;  %v309_v30 = vld [vmem:[%s7331_s2 + $0x908] sm:$0xff]  ;;  %v47_v20 = vld [vmem:[%s7331_s2 + $0xd8] sm:$0xff] }
  0x9e   :  { %1630 = vmatprep.subr.mxu0 %v870_v32  ;;  %1862 = vmatpush2.msra.mxu1 %v935_v35  ;;  %v308_v32 = vld [vmem:[%s7331_s2 + $0x900] sm:$0xff]  ;;  %v674_v35 = vmul.f32 %v3999_v6, %v307_v26  ;;  %v404_v26 = vmul.f32 %v3986_v2, %v37_v17 }
  0x9f   :  { %1631 = vmatpush2.msra.mxu0 %v869_v36  ;;  %1863 = vmatprep.subr.mxu1 %v934_v38  ;;  %v925_v36 = vld [vmem:[%s7329_s0 + $0x730] sm:$0xff]  ;;  %v859_v38 = vld [vmem:[%s7329_s0 + $0x520] sm:$0xff]  ;;  %v675_v41 = vmul.f32 %v4027_v15, %v308_v32 }
  0xa0   :  { %1312 = vmatprep.mubr.f32.mxu0 %v630_v37  ;;  %1545 = vmatprep.mubr.f32.mxu1 %v632_v40  ;;  %v676_v37 = vmul.f32 %v4010_v10, %v309_v30  ;;  %v673_v40 = vmul.f32 %v4023_v14, %v306_v31  ;;  %v48_v30 = vld [vmem:[%s7331_s2 + $0xe0] sm:$0xff]  ;;  %v978_v31 = vld [vmem:[%s7329_s0 + $0x8d8] sm:$0xff] }
  0xa1   :  { %1864 = vmatpush2.msra.mxu1 %v933_v42  ;;  %1313 = vmatmul.mubr.f32.gmra.mxu0 %v629_v43  ;;  %v318_v42 = vld [vmem:[%s7331_s2 + $0x950] sm:$0xff]  ;;  %v320_v43 = vld [vmem:[%s7331_s2 + $0x960] sm:$0xff] }
  0xa2   :  { %1546 = vmatmul.mubr.f32.gmra.mxu1 %v631_v44  ;;  %1632 = vmatprep.subr.mxu0 %v868_v47  ;;  %v317_v44 = vld [vmem:[%s7331_s2 + $0x948] sm:$0xff]  ;;  %v319_v47 = vld [vmem:[%s7331_s2 + $0x958] sm:$0xff]  ;;  %v685_v50 = vmul.f32 %v3999_v6, %v318_v42  ;;  %v24_v6 = vld [vmem:[%s7331_s2 + $0x20] sm:$0xff] }
  0xa3   :  { %1865 = vmatprep.subr.mxu1 %v932_v48  ;;  %1633 = vmatpush2.msra.mxu0 %v867_v52  ;;  %v923_v48 = vld [vmem:[%s7329_s0 + $0x720] sm:$0xff]  ;;  %v687_v52 = vmul.f32 %v4010_v10, %v320_v43  ;;  %v856_v10 = vld [vmem:[%s7329_s0 + $0x508] sm:$0xff]  ;;  %v59_v43 = vld [vmem:[%s7331_s2 + $0x138] sm:$0xff] }
  0xa4   :  { %1318 = vmatprep.mubr.f32.mxu0 %v641_v49  ;;  %1551 = vmatprep.mubr.f32.mxu1 %v643_v53  ;;  %v857_v49 = vld [vmem:[%s7329_s0 + $0x510] sm:$0xff]  ;;  %v684_v53 = vmul.f32 %v4023_v14, %v317_v44  ;;  %v27_v14 = vld [vmem:[%s7331_s2 + $0x38] sm:$0xff] }
  0xa5   :  { %1634 = vmatprep.subr.mxu0 %v866_v55  ;;  %1866 = vmatpush2.msra.mxu1 %v931_v59  ;;  %v922_v55 = vld [vmem:[%s7329_s0 + $0x718] sm:$0xff]  ;;  %v392_v59 = vmul.f32 %v3965_v56, %v25_v54 }
  0xa6   :  { %1319 = vmatmul.mubr.f32.gmra.mxu0 %v640_v57  ;;  %1552 = vmatmul.mubr.f32.gmra.mxu1 %v642_v0  ;;  %v686_v57 = vmul.f32 %v4027_v15, %v319_v47  ;;  %v921_v15 = vld [vmem:[%s7329_s0 + $0x710] sm:$0xff]  ;;  %v974_v47 = vld [vmem:[%s7329_s0 + $0x8b8] sm:$0xff] }
  0xa7   :  { %1635 = vmatpush2.msra.mxu0 %v865_v3  ;;  %1867 = vmatprep.subr.mxu1 %v930_v7  ;;  %v26_v0 = vld [vmem:[%s7331_s2 + $0x30] sm:$0xff]  ;;  %v391_v3 = vmul.f32 %v3976_v62, %v24_v6  ;;  %v394_v7 = vmul.f32 %v3978_v63, %v27_v14 }
  0xa8   :  { %1324 = vmatprep.mubr.f32.mxu0 %v652_v4  ;;  %1868 = vmatpush2.msra.mxu1 %v929_v9  ;;  %v36_v4 = vld [vmem:[%s7331_s2 + $0x80] sm:$0xff]  ;;  %v982_v9 = vld [vmem:[%s7329_s0 + $0x8f8] sm:$0xff]  ;;  %v82_v14 = vld [vmem:[%s7331_s2 + $0x1f0] sm:$0xff] }
  0xa9   :  { %1557 = vmatprep.mubr.f32.mxu1 %v654_v8  ;;  %1636 = vmatprep.subr.mxu0 %v864_v13  ;;  %v35_v8 = vld [vmem:[%s7331_s2 + $0x78] sm:$0xff]  ;;  %v981_v13 = vld [vmem:[%s7329_s0 + $0x8f0] sm:$0xff] }
  0xaa   :  { %1325 = vmatmul.mubr.f32.gmra.mxu0 %v651_v11  ;;  %1558 = vmatmul.mubr.f32.gmra.mxu1 %v653_v16  ;;  %v393_v11 = vmul.f32 %v3986_v2, %v26_v0  ;;  %v403_v16 = vmul.f32 %v3965_v56, %v36_v4  ;;  %v402_v19 = vmul.f32 %v3976_v62, %v35_v8 }
  0xab   :  { %1637 = vmatpush2.msra.mxu0 %v863_v18  ;;  %1869 = vmatprep.subr.mxu1 %v928_v21  ;;  %v1030_v18 = vld [vmem:[%s7329_s0 + $0xa78] sm:$0xff]  ;;  %v1029_v21 = vld [vmem:[%s7329_s0 + $0xa70] sm:$0xff]  ;;  %v449_v4 = vmul.f32 %v3978_v63, %v82_v14  ;;  %v125_v14 = vld [vmem:[%s7331_s2 + $0x348] sm:$0xff] }
  0xac   :  { %1638 = vmatprep.subr.mxu0 %v862_v22  ;;  %1870 = vmatpush2.msra.mxu1 %v927_v24  ;;  %v405_v22 = vmul.f32 %v3978_v63, %v38_v12  ;;  %v49_v24 = vld [vmem:[%s7331_s2 + $0xe8] sm:$0xff] }
  0xad   :  { %1330 = vmatprep.mubr.f32.mxu0 %v663_v23  ;;  %1563 = vmatprep.mubr.f32.mxu1 %v665_v25  ;;  %v46_v23 = vld [vmem:[%s7331_s2 + $0xd0] sm:$0xff]  ;;  %v980_v25 = vld [vmem:[%s7329_s0 + $0x8e8] sm:$0xff] }
  0xae   :  { %1639 = vmatpush2.msra.mxu0 %v861_v27  ;;  %1564 = vmatmul.mubr.f32.gmra.mxu1 %v664_v29  ;;  %v58_v27 = vld [vmem:[%s7331_s2 + $0x130] sm:$0xff]  ;;  %v414_v29 = vmul.f32 %v3965_v56, %v47_v20  ;;  %v413_v32 = vmul.f32 %v3976_v62, %v46_v23 }
  0xaf   :  { %1331 = vmatmul.mubr.f32.gmra.mxu0 %v662_v28  ;;  %1871 = vmatprep.subr.mxu1 %v926_v33  ;;  %v979_v28 = vld [vmem:[%s7329_s0 + $0x8e0] sm:$0xff]  ;;  %v416_v33 = vmul.f32 %v3978_v63, %v49_v24 }
  0xb0   :  { %1640 = vmatprep.subr.mxu0 %v860_v34  ;;  %1872 = vmatpush2.msra.mxu1 %v925_v36  ;;  %v60_v34 = vld [vmem:[%s7331_s2 + $0x140] sm:$0xff]  ;;  %v57_v36 = vld [vmem:[%s7331_s2 + $0x128] sm:$0xff] }
  0xb1   :  { %1336 = vmatprep.mubr.f32.mxu0 %v674_v35  ;;  %1569 = vmatprep.mubr.f32.mxu1 %v676_v37  ;;  %v425_v35 = vmul.f32 %v3965_v56, %v58_v27  ;;  %v977_v37 = vld [vmem:[%s7329_s0 + $0x8d0] sm:$0xff]  ;;  %v427_v42 = vmul.f32 %v3978_v63, %v60_v34  ;;  %v424_v44 = vmul.f32 %v3976_v62, %v57_v36  ;;  %v104_v24 = vld [vmem:[%s7331_s2 + $0x2a0] sm:$0xff]  ;;  %v101_v27 = vld [vmem:[%s7331_s2 + $0x288] sm:$0xff] }
  0xb2   :  { %1641 = vmatpush2.msra.mxu0 %v859_v38  ;;  %1570 = vmatmul.mubr.f32.gmra.mxu1 %v675_v41  ;;  %v415_v38 = vmul.f32 %v3986_v2, %v48_v30  ;;  %v976_v41 = vld [vmem:[%s7329_s0 + $0x8c8] sm:$0xff]  ;;  %v115_v36 = vld [vmem:[%s7331_s2 + $0x2f8] sm:$0xff] }
  0xb3   :  { %1337 = vmatmul.mubr.f32.gmra.mxu0 %v673_v40  ;;  %1873 = vmatprep.subr.mxu1 %v924_v45  ;;  %v69_v40 = vld [vmem:[%s7331_s2 + $0x188] sm:$0xff]  ;;  %v975_v45 = vld [vmem:[%s7329_s0 + $0x8c0] sm:$0xff] }
  0xb4   :  { %1642 = vmatprep.subr.mxu0 %v858_v46  ;;  %1874 = vmatpush2.msra.mxu1 %v923_v48  ;;  %v71_v46 = vld [vmem:[%s7331_s2 + $0x198] sm:$0xff]  ;;  %v436_v48 = vmul.f32 %v3965_v56, %v69_v40  ;;  %v113_v30 = vld [vmem:[%s7331_s2 + $0x2e8] sm:$0xff]  ;;  %v112_v40 = vld [vmem:[%s7331_s2 + $0x2e0] sm:$0xff] }
  0xb5   :  { %1643 = vmatpush2.msra.mxu0 %v857_v49  ;;  %1342 = vmatprep.mubr.f32.mxu0 %v685_v50  ;;  %v68_v49 = vld [vmem:[%s7331_s2 + $0x180] sm:$0xff]  ;;  %v426_v50 = vmul.f32 %v3986_v2, %v59_v43  ;;  %v438_v54 = vmul.f32 %v3978_v63, %v71_v46  ;;  %v964_v34 = vld [vmem:[%s7329_s0 + $0x868] sm:$0xff]  ;;  %v114_v46 = vld [vmem:[%s7331_s2 + $0x2f0] sm:$0xff] }
  0xb6   :  { %1575 = vmatprep.mubr.f32.mxu1 %v687_v52  ;;  %1875 = vmatprep.subr.mxu1 %v922_v55  ;;  %v973_v52 = vld [vmem:[%s7329_s0 + $0x8b0] sm:$0xff]  ;;  %v1028_v55 = vld [vmem:[%s7329_s0 + $0xa68] sm:$0xff]  ;;  %v435_v6 = vmul.f32 %v3976_v62, %v68_v49  ;;  %v124_v43 = vld [vmem:[%s7331_s2 + $0x340] sm:$0xff] }
  0xb7   :  { %1343 = vmatmul.mubr.f32.gmra.mxu0 %v684_v53  ;;  %1576 = vmatmul.mubr.f32.gmra.mxu1 %v686_v57  ;;  %v80_v53 = vld [vmem:[%s7331_s2 + $0x1e0] sm:$0xff]  ;;  %v70_v57 = vld [vmem:[%s7331_s2 + $0x190] sm:$0xff] }
  0xb8   :  { %1644 = vmatprep.subr.mxu0 %v856_v10  ;;  %1876 = vmatpush2.msra.mxu1 %v921_v15  ;;  %v1027_v10 = vld [vmem:[%s7329_s0 + $0xa60] sm:$0xff]  ;;  %v972_v15 = vld [vmem:[%s7329_s0 + $0x8a8] sm:$0xff]  ;;  %v437_v0 = vmul.f32 %v3986_v2, %v70_v57  ;;  %v126_v49 = vld [vmem:[%s7331_s2 + $0x350] sm:$0xff] }
  0xb9   :  { %1645 = vmatpush2.msra.mxu0 %v855_v58  ;;  %1646 = vmatprep.mubr.f32.mxu0 %v392_v59  ;;  %v447_v58 = vmul.f32 %v3965_v56, %v80_v53  ;;  %v79_v59 = vld [vmem:[%s7331_s2 + $0x1d8] sm:$0xff] }
  0xba   :  { %1877 = vmatprep.subr.mxu1 %v920_v1  ;;  %1879 = vmatprep.mubr.f32.mxu1 %v394_v7  ;;  %v971_v1 = vld [vmem:[%s7329_s0 + $0x8a0] sm:$0xff]  ;;  %v970_v7 = vld [vmem:[%s7329_s0 + $0x898] sm:$0xff]  ;;  %v446_v8 = vmul.f32 %v3976_v62, %v79_v59  ;;  %v137_v59 = vld [vmem:[%s7331_s2 + $0x3a8] sm:$0xff] }
  0xbb   :  { %1647 = vmatmul.mubr.f32.vlgmr.msra.gmra.mxu0 %v391_v3  ;;  %1878 = vmatpush2.msra.mxu1 %v919_v5  ;;  %v91_v3 = vld [vmem:[%s7331_s2 + $0x238] sm:$0xff]  ;;  %v81_v5 = vld [vmem:[%s7331_s2 + $0x1e8] sm:$0xff] }
  0xbc   :  { %2048 = vmatprep.subr.mxu0 %v982_v9  ;;  %1880 = vmatmul.mubr.f32.vlgmr.msra.gmra.mxu1 %v393_v11  ;;  %v969_v9 = vld [vmem:[%s7329_s0 + $0x890] sm:$0xff]  ;;  %v93_v11 = vld [vmem:[%s7331_s2 + $0x248] sm:$0xff]  ;;  %v458_v12 = vmul.f32 %v3965_v56, %v91_v3  ;;  %v448_v17 = vmul.f32 %v3986_v2, %v81_v5  ;;  %v123_v53 = vld [vmem:[%s7331_s2 + $0x338] sm:$0xff]  ;;  %v492_v5 = vmul.f32 %v3986_v2, %v125_v14 }
  0xbd   :  { %2049 = vmatpush1.msra.mxu0 %v981_v13  ;;  %2297 = vmatprep.subr.mxu1 %v1030_v18  ;;  %v90_v13 = vld [vmem:[%s7331_s2 + $0x230] sm:$0xff]  ;;  %v967_v18 = vld [vmem:[%s7329_s0 + $0x880] sm:$0xff]  ;;  %v460_v20 = vmul.f32 %v3978_v63, %v93_v11  ;;  %v135_v57 = vld [vmem:[%s7331_s2 + $0x398] sm:$0xff] }
  0xbe   :  { %1652 = vmatprep.mubr.f32.mxu0 %v403_v16  ;;  %2298 = vmatpush1.msra.mxu1 %v1029_v21  ;;  %v968_v16 = vld [vmem:[%s7329_s0 + $0x888] sm:$0xff]  ;;  %v92_v21 = vld [vmem:[%s7331_s2 + $0x240] sm:$0xff]  ;;  %v457_v23 = vmul.f32 %v3976_v62, %v90_v13  ;;  %v134_v3 = vld [vmem:[%s7331_s2 + $0x390] sm:$0xff] }
  0xbf   :  { %1653 = vmatmul.mubr.f32.gmra.mxu0 %v402_v19  ;;  %1885 = vmatprep.mubr.f32.mxu1 %v405_v22  ;;  %v102_v19 = vld [vmem:[%s7331_s2 + $0x290] sm:$0xff]  ;;  %v966_v22 = vld [vmem:[%s7329_s0 + $0x878] sm:$0xff]  ;;  %v136_v11 = vld [vmem:[%s7331_s2 + $0x3a0] sm:$0xff]  ;;  %v501_v13 = vmul.f32 %v3976_v62, %v134_v3 }
  0xc0   :  { %2050 = vmatprep.subr.mxu0 %v980_v25  ;;  %1886 = vmatmul.mubr.f32.gmra.mxu1 %v404_v26  ;;  %v965_v25 = vld [vmem:[%s7329_s0 + $0x870] sm:$0xff]  ;;  %v469_v26 = vmul.f32 %v3965_v56, %v102_v19  ;;  %v145_v19 = vld [vmem:[%s7331_s2 + $0x3e8] sm:$0xff] }
  0xc1   :  { %2051 = vmatpush1.msra.mxu0 %v979_v28  ;;  %1658 = vmatprep.mubr.f32.mxu0 %v414_v29  ;;  %v1026_v28 = vld [vmem:[%s7329_s0 + $0xa58] sm:$0xff]  ;;  %v459_v29 = vmul.f32 %v3986_v2, %v92_v21  ;;  %v503_v21 = vmul.f32 %v3986_v2, %v136_v11 }
  0xc2   :  { %2052 = vmatprep.subr.mxu0 %v978_v31  ;;  %1891 = vmatprep.mubr.f32.mxu1 %v416_v33  ;;  %v1025_v31 = vld [vmem:[%s7329_s0 + $0xa50] sm:$0xff]  ;;  %v103_v33 = vld [vmem:[%s7331_s2 + $0x298] sm:$0xff] }
  0xc3   :  { %1659 = vmatmul.mubr.f32.gmra.mxu0 %v413_v32  ;;  %2299 = vmatprep.subr.mxu1 %v1028_v55  ;;  %v471_v32 = vmul.f32 %v3978_v63, %v104_v24  ;;  %v481_v55 = vmul.f32 %v3986_v2, %v114_v46 }
  0xc4   :  { %2053 = vmatpush1.msra.mxu0 %v977_v37  ;;  %1664 = vmatprep.mubr.f32.mxu0 %v425_v35  ;;  %v468_v35 = vmul.f32 %v3976_v62, %v101_v27  ;;  %v963_v37 = vld [vmem:[%s7329_s0 + $0x860] sm:$0xff]  ;;  %v512_v27 = vmul.f32 %v3976_v62, %v145_v19 }
  0xc5   :  { %1892 = vmatmul.mubr.f32.gmra.mxu1 %v415_v38  ;;  %2054 = vmatprep.subr.mxu0 %v976_v41  ;;  %v480_v38 = vmul.f32 %v3965_v56, %v113_v30  ;;  %v962_v41 = vld [vmem:[%s7329_s0 + $0x858] sm:$0xff] }
  0xc6   :  { %1897 = vmatprep.mubr.f32.mxu1 %v427_v42  ;;  %2055 = vmatpush1.msra.mxu0 %v975_v45  ;;  %v470_v42 = vmul.f32 %v3986_v2, %v103_v33  ;;  %v482_v45 = vmul.f32 %v3978_v63, %v115_v36 }
  0xc7   :  { %1665 = vmatmul.mubr.f32.gmra.mxu0 %v424_v44  ;;  %2056 = vmatprep.subr.mxu0 %v974_v47  ;;  %v961_v44 = vld [vmem:[%s7329_s0 + $0x850] sm:$0xff]  ;;  %v960_v47 = vld [vmem:[%s7329_s0 + $0x848] sm:$0xff] }
  0xc8   :  { %1670 = vmatprep.mubr.f32.mxu0 %v436_v48  ;;  %2057 = vmatpush1.msra.mxu0 %v973_v52  ;;  %v479_v48 = vmul.f32 %v3976_v62, %v112_v40  ;;  %v491_v52 = vmul.f32 %v3965_v56, %v124_v43 }
  0xc9   :  { %1898 = vmatmul.mubr.f32.gmra.mxu1 %v426_v50  ;;  %2058 = vmatprep.subr.mxu0 %v972_v15  ;;  %v959_v50 = vld [vmem:[%s7329_s0 + $0x840] sm:$0xff]  ;;  %v1024_v15 = vld [vmem:[%s7329_s0 + $0xa48] sm:$0xff] }
  0xca   :  { %1903 = vmatprep.mubr.f32.mxu1 %v438_v54  ;;  %2300 = vmatpush1.msra.mxu1 %v1027_v10  ;;  %v958_v54 = vld [vmem:[%s7329_s0 + $0x838] sm:$0xff]  ;;  %v493_v10 = vmul.f32 %v3978_v63, %v126_v49 }
  0xcb   :  { %1671 = vmatmul.mubr.f32.gmra.mxu0 %v435_v6  ;;  %2301 = vmatprep.subr.mxu1 %v1026_v28  ;;  %v957_v6 = vld [vmem:[%s7329_s0 + $0x830] sm:$0xff]  ;;  %v159_v28 = vld [vmem:[%s7331_s2 + $0x458] sm:$0xff] }
  0xcc   :  { %1676 = vmatprep.mubr.f32.mxu0 %v447_v58  ;;  %2059 = vmatpush1.msra.mxu0 %v971_v1  ;;  %v490_v58 = vmul.f32 %v3976_v62, %v123_v53  ;;  %v502_v1 = vmul.f32 %v3965_v56, %v135_v57  ;;  %v526_v36 = vmul.f32 %v3978_v63, %v159_v28 }
  0xcd   :  { %1904 = vmatmul.mubr.f32.gmra.mxu1 %v437_v0  ;;  %2060 = vmatprep.subr.mxu0 %v970_v7  ;;  %v1023_v0 = vld [vmem:[%s7329_s0 + $0xa40] sm:$0xff]  ;;  %v146_v7 = vld [vmem:[%s7331_s2 + $0x3f0] sm:$0xff] }
  0xce   :  { %1909 = vmatprep.mubr.f32.mxu1 %v449_v4  ;;  %2061 = vmatpush1.msra.mxu0 %v969_v9  ;;  %v956_v4 = vld [vmem:[%s7329_s0 + $0x828] sm:$0xff]  ;;  %v504_v9 = vmul.f32 %v3978_v63, %v137_v59 }
  0xcf   :  { %1677 = vmatmul.mubr.f32.gmra.mxu0 %v446_v8  ;;  %2062 = vmatprep.subr.mxu0 %v968_v16  ;;  %v955_v8 = vld [vmem:[%s7329_s0 + $0x820] sm:$0xff] }
  0xd0   :  { %1682 = vmatprep.mubr.f32.mxu0 %v458_v12  ;;  %2063 = vmatpush1.msra.mxu0 %v967_v18  ;;  %v954_v12 = vld [vmem:[%s7329_s0 + $0x818] sm:$0xff]  ;;  %v148_v16 = vld [vmem:[%s7331_s2 + $0x400] sm:$0xff]  ;;  %v513_v18 = vmul.f32 %v3965_v56, %v146_v7 }
  0xd1   :  { %1910 = vmatmul.mubr.f32.gmra.mxu1 %v448_v17  ;;  %2064 = vmatprep.subr.mxu0 %v966_v22  ;;  %v953_v17 = vld [vmem:[%s7329_s0 + $0x810] sm:$0xff]  ;;  %v157_v22 = vld [vmem:[%s7331_s2 + $0x448] sm:$0xff]  ;;  %v515_v24 = vmul.f32 %v3978_v63, %v148_v16 }
  0xd2   :  { %1915 = vmatprep.mubr.f32.mxu1 %v460_v20  ;;  %2065 = vmatpush1.msra.mxu0 %v965_v25  ;;  %v952_v20 = vld [vmem:[%s7329_s0 + $0x808] sm:$0xff]  ;;  %v147_v25 = vld [vmem:[%s7331_s2 + $0x3f8] sm:$0xff]  ;;  %v524_v30 = vmul.f32 %v3965_v56, %v157_v22 }
  0xd3   :  { %1683 = vmatmul.mubr.f32.gmra.mxu0 %v457_v23  ;;  %2302 = vmatpush1.msra.mxu1 %v1025_v31  ;;  %v951_v23 = vld [vmem:[%s7329_s0 + $0x800] sm:$0xff]  ;;  %v514_v33 = vmul.f32 %v3986_v2, %v147_v25 }
  0xd4   :  { %1688 = vmatprep.mubr.f32.mxu0 %v469_v26  ;;  %2066 = vmatprep.subr.mxu0 %v964_v34  ;;  %v1014_v26 = vld [vmem:[%s7329_s0 + $0x9f8] sm:$0xff]  ;;  %v156_v31 = vld [vmem:[%s7331_s2 + $0x440] sm:$0xff] }
  0xd5   :  { %1916 = vmatmul.mubr.f32.gmra.mxu1 %v459_v29  ;;  %2067 = vmatpush1.msra.mxu0 %v963_v37  ;;  %v1013_v29 = vld [vmem:[%s7329_s0 + $0x9f0] sm:$0xff]  ;;  %v168_v34 = vld [vmem:[%s7331_s2 + $0x4a0] sm:$0xff]  ;;  %v523_v40 = vmul.f32 %v3976_v62, %v156_v31 }
  0xd6   :  { %1921 = vmatprep.mubr.f32.mxu1 %v471_v32  ;;  %2068 = vmatprep.subr.mxu0 %v962_v41  ;;  %v1022_v32 = vld [vmem:[%s7329_s0 + $0xa38] sm:$0xff]  ;;  %v158_v37 = vld [vmem:[%s7331_s2 + $0x450] sm:$0xff]  ;;  %v535_v43 = vmul.f32 %v3965_v56, %v168_v34 }
  0xd7   :  { %1689 = vmatmul.mubr.f32.gmra.mxu0 %v468_v35  ;;  %2303 = vmatprep.subr.mxu1 %v1024_v15  ;;  %v1021_v35 = vld [vmem:[%s7329_s0 + $0xa30] sm:$0xff]  ;;  %v525_v46 = vmul.f32 %v3986_v2, %v158_v37 }
  0xd8   :  { %1694 = vmatprep.mubr.f32.mxu0 %v480_v38  ;;  %2069 = vmatpush1.msra.mxu0 %v961_v44  ;;  %v1012_v38 = vld [vmem:[%s7329_s0 + $0x9e8] sm:$0xff]  ;;  %v170_v41 = vld [vmem:[%s7331_s2 + $0x4b0] sm:$0xff]  ;;  %v167_v44 = vld [vmem:[%s7331_s2 + $0x498] sm:$0xff] }
  0xd9   :  { %1922 = vmatmul.mubr.f32.gmra.mxu1 %v470_v42  ;;  %2070 = vmatprep.subr.mxu0 %v960_v47  ;;  %v1011_v42 = vld [vmem:[%s7329_s0 + $0x9e0] sm:$0xff]  ;;  %v179_v47 = vld [vmem:[%s7331_s2 + $0x4f8] sm:$0xff]  ;;  %v537_v49 = vmul.f32 %v3978_v63, %v170_v41  ;;  %v534_v53 = vmul.f32 %v3976_v62, %v167_v44  ;;  %v190_v15 = vld [vmem:[%s7331_s2 + $0x550] sm:$0xff] }
  0xda   :  { %1927 = vmatprep.mubr.f32.mxu1 %v482_v45  ;;  %2071 = vmatpush1.msra.mxu0 %v959_v50  ;;  %v1010_v45 = vld [vmem:[%s7329_s0 + $0x9d8] sm:$0xff]  ;;  %v169_v50 = vld [vmem:[%s7331_s2 + $0x4a8] sm:$0xff]  ;;  %v546_v57 = vmul.f32 %v3965_v56, %v179_v47  ;;  %v557_v7 = vmul.f32 %v3965_v56, %v190_v15 }
  0xdb   :  { %1695 = vmatmul.mubr.f32.gmra.mxu0 %v479_v48  ;;  %2072 = vmatprep.subr.mxu0 %v958_v54  ;;  %v1009_v48 = vld [vmem:[%s7329_s0 + $0x9d0] sm:$0xff]  ;;  %v181_v54 = vld [vmem:[%s7331_s2 + $0x508] sm:$0xff]  ;;  %v536_v14 = vmul.f32 %v3986_v2, %v169_v50 }
  0xdc   :  { %1700 = vmatprep.mubr.f32.mxu0 %v491_v52  ;;  %2073 = vmatpush1.msra.mxu0 %v957_v6  ;;  %v1008_v52 = vld [vmem:[%s7329_s0 + $0x9c8] sm:$0xff]  ;;  %v178_v6 = vld [vmem:[%s7331_s2 + $0x4f0] sm:$0xff]  ;;  %v548_v59 = vmul.f32 %v3978_v63, %v181_v54 }
  0xdd   :  { %1928 = vmatmul.mubr.f32.gmra.mxu1 %v481_v55  ;;  %2074 = vmatprep.subr.mxu0 %v956_v4  ;;  %v1007_v55 = vld [vmem:[%s7329_s0 + $0x9c0] sm:$0xff]  ;;  %v545_v3 = vmul.f32 %v3976_v62, %v178_v6 }
  0xde   :  { %1933 = vmatprep.mubr.f32.mxu1 %v493_v10  ;;  %2304 = vmatpush1.msra.mxu1 %v1023_v0  ;;  %v1006_v10 = vld [vmem:[%s7329_s0 + $0x9b8] sm:$0xff]  ;;  %v180_v0 = vld [vmem:[%s7331_s2 + $0x500] sm:$0xff] }
  0xdf   :  { %1701 = vmatmul.mubr.f32.gmra.mxu0 %v490_v58  ;;  %2305 = vmatprep.subr.mxu1 %v1022_v32  ;;  %v1005_v58 = vld [vmem:[%s7329_s0 + $0x9b0] sm:$0xff]  ;;  %v192_v4 = vld [vmem:[%s7331_s2 + $0x560] sm:$0xff]  ;;  %v547_v11 = vmul.f32 %v3986_v2, %v180_v0 }
  0xe0   :  { %1706 = vmatprep.mubr.f32.mxu0 %v502_v1  ;;  %2075 = vmatpush1.msra.mxu0 %v955_v8  ;;  %v1020_v1 = vld [vmem:[%s7329_s0 + $0xa28] sm:$0xff]  ;;  %v559_v16 = vmul.f32 %v3978_v63, %v192_v4  ;;  %v214_v32 = vld [vmem:[%s7331_s2 + $0x610] sm:$0xff] }
  0xe1   :  { %1934 = vmatmul.mubr.f32.gmra.mxu1 %v492_v5  ;;  %2076 = vmatprep.subr.mxu0 %v954_v12  ;;  %v1019_v5 = vld [vmem:[%s7329_s0 + $0xa20] sm:$0xff]  ;;  %v189_v8 = vld [vmem:[%s7331_s2 + $0x548] sm:$0xff]  ;;  %v581_v41 = vmul.f32 %v3978_v63, %v214_v32 }
  0xe2   :  { %1939 = vmatprep.mubr.f32.mxu1 %v504_v9  ;;  %2077 = vmatpush1.msra.mxu0 %v953_v17  ;;  %v1004_v9 = vld [vmem:[%s7329_s0 + $0x9a8] sm:$0xff]  ;;  %v191_v17 = vld [vmem:[%s7331_s2 + $0x558] sm:$0xff]  ;;  %v556_v19 = vmul.f32 %v3976_v62, %v189_v8 }
  0xe3   :  { %1707 = vmatmul.mubr.f32.gmra.mxu0 %v501_v13  ;;  %2078 = vmatprep.subr.mxu0 %v952_v20  ;;  %v201_v12 = vld [vmem:[%s7331_s2 + $0x5a8] sm:$0xff]  ;;  %v1003_v13 = vld [vmem:[%s7329_s0 + $0x9a0] sm:$0xff]  ;;  %v203_v20 = vld [vmem:[%s7331_s2 + $0x5b8] sm:$0xff]  ;;  %v558_v25 = vmul.f32 %v3986_v2, %v191_v17 }
  0xe4   :  { %1712 = vmatprep.mubr.f32.mxu0 %v513_v18  ;;  %2079 = vmatpush1.msra.mxu0 %v951_v23  ;;  %v1002_v18 = vld [vmem:[%s7329_s0 + $0x998] sm:$0xff]  ;;  %v568_v22 = vmul.f32 %v3965_v56, %v201_v12  ;;  %v200_v23 = vld [vmem:[%s7331_s2 + $0x5a0] sm:$0xff]  ;;  %v570_v28 = vmul.f32 %v3978_v63, %v203_v20 }
  0xe5   :  { %1940 = vmatmul.mubr.f32.gmra.mxu1 %v503_v21  ;;  %2080 = vmatprep.subr.mxu0 %v1014_v26  ;;  %v1001_v21 = vld [vmem:[%s7329_s0 + $0x990] sm:$0xff]  ;;  %v212_v26 = vld [vmem:[%s7331_s2 + $0x600] sm:$0xff]  ;;  %v567_v31 = vmul.f32 %v3976_v62, %v200_v23 }
  0xe6   :  { %1945 = vmatprep.mubr.f32.mxu1 %v515_v24  ;;  %2081 = vmatpush2.msra.mxu0 %v1013_v29  ;;  %v1000_v24 = vld [vmem:[%s7329_s0 + $0x988] sm:$0xff]  ;;  %v202_v29 = vld [vmem:[%s7331_s2 + $0x5b0] sm:$0xff]  ;;  %v579_v34 = vmul.f32 %v3965_v56, %v212_v26  ;;  %v244_v17 = vld [vmem:[%s7331_s2 + $0x700] sm:$0xff] }
  0xe7   :  { %1713 = vmatmul.mubr.f32.gmra.mxu0 %v512_v27  ;;  %2306 = vmatpush1.msra.mxu1 %v1021_v35  ;;  %v999_v27 = vld [vmem:[%s7329_s0 + $0x980] sm:$0xff]  ;;  %v211_v35 = vld [vmem:[%s7331_s2 + $0x5f8] sm:$0xff]  ;;  %v569_v37 = vmul.f32 %v3986_v2, %v202_v29 }
  0xe8   :  { %1718 = vmatprep.mubr.f32.mxu0 %v524_v30  ;;  %2082 = vmatprep.subr.mxu0 %v1012_v38  ;;  %v998_v30 = vld [vmem:[%s7329_s0 + $0x978] sm:$0xff]  ;;  %v578_v44 = vmul.f32 %v3976_v62, %v211_v35 }
  0xe9   :  { %1946 = vmatmul.mubr.f32.gmra.mxu1 %v514_v33  ;;  %2083 = vmatpush2.msra.mxu0 %v1011_v42  ;;  %v997_v33 = vld [vmem:[%s7329_s0 + $0x970] sm:$0xff]  ;;  %v223_v38 = vld [vmem:[%s7331_s2 + $0x658] sm:$0xff]  ;;  %v213_v42 = vld [vmem:[%s7331_s2 + $0x608] sm:$0xff] }
  0xea   :  { %1951 = vmatprep.mubr.f32.mxu1 %v526_v36  ;;  %2084 = vmatprep.subr.mxu0 %v1010_v45  ;;  %v1018_v36 = vld [vmem:[%s7329_s0 + $0xa18] sm:$0xff]  ;;  %v225_v45 = vld [vmem:[%s7331_s2 + $0x668] sm:$0xff]  ;;  %v590_v47 = vmul.f32 %v3965_v56, %v223_v38  ;;  %v580_v50 = vmul.f32 %v3986_v2, %v213_v42 }
  0xeb   :  { %1719 = vmatmul.mubr.f32.gmra.mxu0 %v523_v40  ;;  %2307 = vmatprep.subr.mxu1 %v1020_v1  ;;  %v1017_v40 = vld [vmem:[%s7329_s0 + $0xa10] sm:$0xff]  ;;  %v592_v54 = vmul.f32 %v3978_v63, %v225_v45  ;;  %v245_v1 = vld [vmem:[%s7331_s2 + $0x708] sm:$0xff]  ;;  %v255_v35 = vld [vmem:[%s7331_s2 + $0x758] sm:$0xff] }
  0xec   :  { %1724 = vmatprep.mubr.f32.mxu0 %v535_v43  ;;  %2085 = vmatpush2.msra.mxu0 %v1009_v48  ;;  %v996_v43 = vld [vmem:[%s7329_s0 + $0x968] sm:$0xff]  ;;  %v222_v48 = vld [vmem:[%s7331_s2 + $0x650] sm:$0xff]  ;;  %v612_v12 = vmul.f32 %v3965_v56, %v245_v1 }
  0xed   :  { %1952 = vmatmul.mubr.f32.gmra.mxu1 %v525_v46  ;;  %2086 = vmatprep.subr.mxu0 %v1008_v52  ;;  %v995_v46 = vld [vmem:[%s7329_s0 + $0x960] sm:$0xff]  ;;  %v234_v52 = vld [vmem:[%s7331_s2 + $0x6b0] sm:$0xff]  ;;  %v589_v6 = vmul.f32 %v3976_v62, %v222_v48  ;;  %v269_v48 = vld [vmem:[%s7331_s2 + $0x7c8] sm:$0xff] }
  0xee   :  { %1957 = vmatprep.mubr.f32.mxu1 %v537_v49  ;;  %2087 = vmatpush2.msra.mxu0 %v1007_v55  ;;  %v994_v49 = vld [vmem:[%s7329_s0 + $0x958] sm:$0xff]  ;;  %v224_v55 = vld [vmem:[%s7331_s2 + $0x660] sm:$0xff]  ;;  %v601_v15 = vmul.f32 %v3965_v56, %v234_v52  ;;  %v266_v52 = vld [vmem:[%s7331_s2 + $0x7b0] sm:$0xff] }
  0xef   :  { %1725 = vmatmul.mubr.f32.gmra.mxu0 %v534_v53  ;;  %2088 = vmatprep.subr.mxu0 %v1006_v10  ;;  %v993_v53 = vld [vmem:[%s7329_s0 + $0x950] sm:$0xff]  ;;  %v236_v10 = vld [vmem:[%s7331_s2 + $0x6c0] sm:$0xff]  ;;  %v591_v0 = vmul.f32 %v3986_v2, %v224_v55 }
  0xf0   :  { %1730 = vmatprep.mubr.f32.mxu0 %v546_v57  ;;  %2089 = vmatpush2.msra.mxu0 %v1005_v58  ;;  %v992_v57 = vld [vmem:[%s7329_s0 + $0x948] sm:$0xff]  ;;  %v603_v4 = vmul.f32 %v3978_v63, %v236_v10  ;;  %v278_v55 = vld [vmem:[%s7331_s2 + $0x810] sm:$0xff]  ;;  %v268_v10 = vld [vmem:[%s7331_s2 + $0x7c0] sm:$0xff] }
  0xf1   :  { %1958 = vmatmul.mubr.f32.gmra.mxu1 %v536_v14  ;;  %2090 = vmatprep.subr.mxu0 %v1004_v9  ;;  %v991_v14 = vld [vmem:[%s7329_s0 + $0x940] sm:$0xff]  ;;  %v233_v58 = vld [vmem:[%s7331_s2 + $0x6a8] sm:$0xff]  ;;  %v247_v9 = vld [vmem:[%s7331_s2 + $0x718] sm:$0xff]  ;;  %v645_v1 = vmul.f32 %v3965_v56, %v278_v55 }
  0xf2   :  { %1963 = vmatprep.mubr.f32.mxu1 %v548_v59  ;;  %2308 = vmatpush1.msra.mxu1 %v1019_v5  ;;  %v990_v59 = vld [vmem:[%s7329_s0 + $0x938] sm:$0xff]  ;;  %v600_v8 = vmul.f32 %v3976_v62, %v233_v58  ;;  %v614_v23 = vmul.f32 %v3978_v63, %v247_v9  ;;  %v310_v55 = vld [vmem:[%s7331_s2 + $0x910] sm:$0xff] }
  0xf3   :  { %1731 = vmatmul.mubr.f32.gmra.mxu0 %v545_v3  ;;  %2309 = vmatprep.subr.mxu1 %v1018_v36  ;;  %v989_v3 = vld [vmem:[%s7329_s0 + $0x930] sm:$0xff]  ;;  %v235_v5 = vld [vmem:[%s7331_s2 + $0x6b8] sm:$0xff]  ;;  %v984_v36 = vld [vmem:[%s7329_s0 + $0x908] sm:$0xff] }
  0xf4   :  { %1736 = vmatprep.mubr.f32.mxu0 %v557_v7  ;;  %2091 = vmatpush2.msra.mxu0 %v1003_v13  ;;  %v1016_v7 = vld [vmem:[%s7329_s0 + $0xa08] sm:$0xff] }
  0xf5   :  { %1964 = vmatmul.mubr.f32.gmra.mxu1 %v547_v11  ;;  %2092 = vmatprep.subr.mxu0 %v1002_v18  ;;  %v1015_v11 = vld [vmem:[%s7329_s0 + $0xa00] sm:$0xff]  ;;  %v988_v18 = vld [vmem:[%s7329_s0 + $0x928] sm:$0xff] }
  0xf6   :  { %1969 = vmatprep.mubr.f32.mxu1 %v559_v16  ;;  %2093 = vmatpush2.msra.mxu0 %v1001_v21  ;;  %v256_v21 = vld [vmem:[%s7331_s2 + $0x760] sm:$0xff] }
  0xf7   :  { %1737 = vmatmul.mubr.f32.gmra.mxu0 %v556_v19  ;;  %2094 = vmatprep.subr.mxu0 %v1000_v24  ;;  %v602_v19 = vmul.f32 %v3986_v2, %v235_v5  ;;  %v246_v24 = vld [vmem:[%s7331_s2 + $0x710] sm:$0xff]  ;;  %v623_v32 = vmul.f32 %v3965_v56, %v256_v21  ;;  %v635_v5 = vmul.f32 %v3986_v2, %v268_v10 }
  0xf8   :  { %1742 = vmatprep.mubr.f32.mxu0 %v568_v22  ;;  %2095 = vmatpush2.msra.mxu0 %v999_v27  ;;  %v987_v22 = vld [vmem:[%s7329_s0 + $0x920] sm:$0xff]  ;;  %v986_v27 = vld [vmem:[%s7329_s0 + $0x918] sm:$0xff] }
  0xf9   :  { %1970 = vmatmul.mubr.f32.gmra.mxu1 %v558_v25  ;;  %2096 = vmatprep.subr.mxu0 %v998_v30  ;;  %v258_v30 = vld [vmem:[%s7331_s2 + $0x770] sm:$0xff] }
  0xfa   :  { %1975 = vmatprep.mubr.f32.mxu1 %v570_v28  ;;  %2097 = vmatpush2.msra.mxu0 %v997_v33  ;;  %v611_v28 = vmul.f32 %v3976_v62, %v244_v17  ;;  %v625_v42 = vmul.f32 %v3978_v63, %v258_v30  ;;  %v290_v30 = vld [vmem:[%s7331_s2 + $0x870] sm:$0xff] }
  0xfb   :  { %1743 = vmatmul.mubr.f32.gmra.mxu0 %v567_v31  ;;  %2310 = vmatpush1.msra.mxu1 %v1017_v40  ;;  %v985_v31 = vld [vmem:[%s7329_s0 + $0x910] sm:$0xff]  ;;  %v267_v40 = vld [vmem:[%s7331_s2 + $0x7b8] sm:$0xff] }
  0xfc   :  { %1748 = vmatprep.mubr.f32.mxu0 %v579_v34  ;;  %2098 = vmatprep.subr.mxu0 %v996_v43  ;;  %v257_v43 = vld [vmem:[%s7331_s2 + $0x768] sm:$0xff] }
  0xfd   :  { %1976 = vmatmul.mubr.f32.gmra.mxu1 %v569_v37  ;;  %2099 = vmatpush2.msra.mxu0 %v995_v46  ;;  %v613_v37 = vmul.f32 %v3986_v2, %v246_v24  ;;  %v622_v46 = vmul.f32 %v3976_v62, %v255_v35 }
  0xfe   :  { %1981 = vmatprep.mubr.f32.mxu1 %v581_v41  ;;  %2100 = vmatprep.subr.mxu0 %v994_v49  ;;  %v983_v41 = vld [vmem:[%s7329_s0 + $0x900] sm:$0xff]  ;;  %v634_v49 = vmul.f32 %v3965_v56, %v267_v40  ;;  %v657_v40 = vmul.f32 %v3986_v2, %v290_v30 }
  0xff   :  { %1749 = vmatmul.mubr.f32.gmra.mxu0 %v578_v44  ;;  %2311 = vmatprep.subr.mxu1 %v1016_v7 }
 0x100   :  { %1754 = vmatprep.mubr.f32.mxu0 %v590_v47  ;;  %2101 = vmatpush2.msra.mxu0 %v993_v53  ;;  %v624_v53 = vmul.f32 %v3986_v2, %v257_v43  ;;  %v311_v43 = vld [vmem:[%s7331_s2 + $0x918] sm:$0xff] }
 0x101   :  { %1982 = vmatmul.mubr.f32.gmra.mxu1 %v580_v50  ;;  %2102 = vmatprep.subr.mxu0 %v992_v57 }
 0x102   :  { %1987 = vmatprep.mubr.f32.mxu1 %v592_v54  ;;  %2103 = vmatpush2.msra.mxu0 %v991_v14 }
 0x103   :  { %1755 = vmatmul.mubr.f32.gmra.mxu0 %v589_v6  ;;  %2104 = vmatprep.subr.mxu0 %v990_v59  ;;  %v1182_v13 = vpop.f32.mrf.mxu0  ;;  %v636_v6 = vmul.f32 %v3978_v63, %v269_v48  ;;  %v280_v59 = vld [vmem:[%s7331_s2 + $0x820] sm:$0xff] }
 0x104   :  { %1760 = vmatprep.mubr.f32.mxu0 %v601_v15  ;;  %v1415_v16 = vpop.f32.mrf.mxu1  ;;  %2105 = vmatpush2.msra.mxu0 %v989_v3  ;;  %v633_v15 = vmul.f32 %v3976_v62, %v266_v52  ;;  %v313_v52 = vld [vmem:[%s7331_s2 + $0x928] sm:$0xff] }
 0x105   :  { %1988 = vmatmul.mubr.f32.gmra.mxu1 %v591_v0  ;;  %v5425_v20 = vadd.f32 %v1415_v16, %v1182_v13  ;;  %v1184_v25 = vpop.f32.mrf.mxu0  ;;  %2106 = vmatprep.subr.mxu0 %v988_v18  ;;  %v291_v18 = vld [vmem:[%s7331_s2 + $0x878] sm:$0xff] }
 0x106   :  { %1993 = vmatprep.mubr.f32.mxu1 %v603_v4  ;;  %v1417_v26 = vpop.f32.mrf.mxu1  ;;  %2312 = vmatpush1.msra.mxu1 %v1015_v11  ;;  %v277_v4 = vld [vmem:[%s7331_s2 + $0x808] sm:$0xff]  ;;  %v647_v11 = vmul.f32 %v3978_v63, %v280_v59  ;;  %v680_v59 = vmul.f32 %v3978_v63, %v313_v52 }
 0x107   :  { %1761 = vmatmul.mubr.f32.gmra.mxu0 %v600_v8  ;;  %v5441_v29 = vadd.f32 %v1417_v26, %v1184_v25  ;;  %v1188_v33 = vpop.f32.mrf.mxu0  ;;  %v289_v8 = vld [vmem:[%s7331_s2 + $0x868] sm:$0xff]  ;;  %v644_v16 = vmul.f32 %v3976_v62, %v277_v4  ;;  %v300_v26 = vld [vmem:[%s7331_s2 + $0x8c0] sm:$0xff]  ;;  %v677_v4 = vmul.f32 %v3976_v62, %v310_v55 }
 0x108   :  { %1766 = vmatprep.mubr.f32.mxu0 %v612_v12  ;;  %v1421_v34 = vpop.f32.mrf.mxu1  ;;  %2107 = vmatpush2.msra.mxu0 %v987_v22  ;;  %v279_v12 = vld [vmem:[%s7331_s2 + $0x818] sm:$0xff]  ;;  %v656_v21 = vmul.f32 %v3965_v56, %v289_v8  ;;  %v288_v22 = vld [vmem:[%s7331_s2 + $0x860] sm:$0xff] }
 0x109   :  { %1994 = vmatmul.mubr.f32.gmra.mxu1 %v602_v19  ;;  %v5457_v38 = vadd.f32 %v1421_v34, %v1188_v33  ;;  %2108 = vmatprep.subr.mxu0 %v986_v27  ;;  %v1190_v44 = vpop.f32.mrf.mxu0  ;;  %v302_v34 = vld [vmem:[%s7331_s2 + $0x8d0] sm:$0xff] }
 0x10a   :  { %1999 = vmatprep.mubr.f32.mxu1 %v614_v23  ;;  %v1423_v45 = vpop.f32.mrf.mxu1  ;;  %2109 = vmatpush2.msra.mxu0 %v985_v31  ;;  %v646_v23 = vmul.f32 %v3986_v2, %v279_v12  ;;  %v655_v31 = vmul.f32 %v3976_v62, %v288_v22  ;;  %v321_v12 = vld [vmem:[%s7331_s2 + $0x968] sm:$0xff] }
 0x10b   :  { %1767 = vmatmul.mubr.f32.gmra.mxu0 %v611_v28  ;;  %v5470_v47 = vadd.f32 %v1423_v45, %v1190_v44  ;;  %2110 = vmatprep.subr.mxu0 %v984_v36  ;;  %v658_v28 = vmul.f32 %v3978_v63, %v291_v18  ;;  %v667_v36 = vmul.f32 %v3965_v56, %v300_v26 }
 0x10c   :  { %1772 = vmatprep.mubr.f32.mxu0 %v623_v32  ;;  %v1194_v50 = vpop.f32.mrf.mxu0  ;;  %2111 = vmatpush2.msra.mxu0 %v983_v41  ;;  %v1427_v54 = vpop.f32.mrf.mxu1  ;;  %v669_v45 = vmul.f32 %v3978_v63, %v302_v34 }
 0x10d   :  { %2000 = vmatmul.mubr.f32.gmra.mxu1 %v613_v37  ;;  %v5483_v57 = vadd.f32 %v1427_v54, %v1194_v50  ;;  %v299_v37 = vld [vmem:[%s7331_s2 + $0x8b8] sm:$0xff]  ;;  %v678_v54 = vmul.f32 %v3965_v56, %v311_v43 }
 0x10e   :  { %2005 = vmatprep.mubr.f32.mxu1 %v625_v42  ;;  %v1196_v14 = vpop.f32.mrf.mxu0  ;;  %v1429_v58 = vpop.f32.mrf.mxu1  ;;  %v666_v48 = vmul.f32 %v3976_v62, %v299_v37 }
 0x10f   :  { %1773 = vmatmul.mubr.f32.gmra.mxu0 %v622_v46  ;;  %v5493_v0 = vadd.f32 %v1429_v58, %v1196_v14  ;;  %v301_v46 = vld [vmem:[%s7331_s2 + $0x8c8] sm:$0xff]  ;;  %v322_v14 = vld [vmem:[%s7331_s2 + $0x970] sm:$0xff] }
 0x110   :  { %1778 = vmatprep.mubr.f32.mxu0 %v634_v49  ;;  %v1200_v3 = vpop.f32.mrf.mxu0  ;;  %v1433_v7 = vpop.f32.mrf.mxu1 }
 0x111   :  { %2006 = vmatmul.mubr.f32.gmra.mxu1 %v624_v53  ;;  %v5503_v9 = vadd.f32 %v1433_v7, %v1200_v3  ;;  %v324_v7 = vld [vmem:[%s7331_s2 + $0x980] sm:$0xff] }
 0x112   :  { %2011 = vmatprep.mubr.f32.mxu1 %v636_v6  ;;  %v1202_v13 = vpop.f32.mrf.mxu0  ;;  %v1435_v17 = vpop.f32.mrf.mxu1  ;;  %v668_v6 = vmul.f32 %v3986_v2, %v301_v46  ;;  %v691_v22 = vmul.f32 %v3978_v63, %v324_v7  ;;  %v28_v63 = vld [vmem:[%s7331_s2 + $0x40] sm:$0xff]  ;;  %v7335_v46 = vmov 0.0  }
 0x113   :  { %1779 = vmatmul.mubr.f32.gmra.mxu0 %v633_v15  ;;  %v5513_v19 = vadd.f32 %v1435_v17, %v1202_v13  ;;  %v329_v15 = vld [vmem:[%s7330_s1 + $0x8] sm:$0x7] }
 0x114   :  { %1784 = vmatprep.mubr.f32.mxu0 %v645_v1  ;;  %v1439_v25 = vpop.f32.mrf.mxu1  ;;  %v312_v1 = vld [vmem:[%s7331_s2 + $0x920] sm:$0xff]  ;;  %v5582_v13 = vrot.slane %v329_v15, %v338_v51  ;;  %v5599_v26 = vrot.slane %v329_v15, %v334_v60 }
 0x115   :  { %2012 = vmatmul.mubr.f32.gmra.mxu1 %v635_v5  ;;  %v1206_v24 = vpop.f32.mrf.mxu0  ;;  %v40_v60 = vld [vmem:[%s7331_s2 + $0xa0] sm:$0xff] }
 0x116   :  { %2017 = vmatprep.mubr.f32.mxu1 %v647_v11  ;;  %v5523_v27 = vadd.f32 %v1439_v25, %v1206_v24  ;;  %v1441_v33 = vpop.f32.mrf.mxu1  ;;  %v689_v11 = vmul.f32 %v3965_v56, %v322_v14  ;;  %v688_v24 = vmul.f32 %v3976_v62, %v321_v12  ;;  %v5610_v62 = vrot.slane %v329_v15, %v342_v61 }
 0x117   :  { %1785 = vmatmul.mubr.f32.gmra.mxu0 %v644_v16  ;;  %v1208_v32 = vpop.f32.mrf.mxu0  ;;  %v679_v16 = vmul.f32 %v3986_v2, %v312_v1 }
 0x118   :  { %1790 = vmatprep.mubr.f32.mxu0 %v656_v21  ;;  %v5533_v35 = vadd.f32 %v1441_v33, %v1208_v32  ;;  %v1445_v42 = vpop.f32.mrf.mxu1  ;;  %v29_v21 = vld [vmem:[%s7331_s2 + $0x48] sm:$0xff] }
 0x119   :  { %2018 = vmatmul.mubr.f32.gmra.mxu1 %v646_v23  ;;  %v1212_v41 = vpop.f32.mrf.mxu0  ;;  %v323_v23 = vld [vmem:[%s7331_s2 + $0x978] sm:$0xff]  ;;  %v396_v30 = vmul.f32 %v5582_v13, %v29_v21 }
 0x11a   :  { %2023 = vmatprep.mubr.f32.mxu1 %v658_v28  ;;  %v5543_v44 = vadd.f32 %v1445_v42, %v1212_v41  ;;  %v1447_v50 = vpop.f32.mrf.mxu1  ;;  %v39_v41 = vld [vmem:[%s7331_s2 + $0x98] sm:$0xff] }
 0x11b   :  { %1791 = vmatmul.mubr.f32.gmra.mxu0 %v655_v31  ;;  %v1214_v49 = vpop.f32.mrf.mxu0  ;;  %v690_v31 = vmul.f32 %v3986_v2, %v323_v23  ;;  %v395_v2 = vmul.f32 %v5599_v26, %v28_v63  ;;  %v406_v52 = vmul.f32 %v5599_v26, %v39_v41  ;;  %v63_v23 = vld [vmem:[%s7331_s2 + $0x158] sm:$0xff] }
 0x11c   :  { %1796 = vmatprep.mubr.f32.mxu0 %v667_v36  ;;  %v5553_v53 = vadd.f32 %v1447_v50, %v1214_v49  ;;  %v30_v36 = vld [vmem:[%s7331_s2 + $0x50] sm:$0xff]  ;;  %v41_v49 = vld [vmem:[%s7331_s2 + $0xa8] sm:$0xff] }
 0x11d   :  { %2024 = vmatmul.mubr.f32.gmra.mxu1 %v657_v40  ;;  %v1218_v10 = vpop.f32.mrf.mxu0  ;;  %v1451_v58 = vpop.f32.mrf.mxu1  ;;  %v407_v40 = vmul.f32 %v5582_v13, %v40_v60  ;;  %v397_v42 = vmul.f32 %v5610_v62, %v30_v36  ;;  %v408_v14 = vmul.f32 %v5610_v62, %v41_v49  ;;  %v430_v60 = vmul.f32 %v5610_v62, %v63_v23  ;;  %v84_v36 = vld [vmem:[%s7331_s2 + $0x200] sm:$0xff]  ;;  %v3216_v23 = vld [vmem:[%s7332_s4 + $0x8] sm:$0xff] }
 0x11e   :  { %2029 = vmatprep.mubr.f32.mxu1 %v669_v45  ;;  %v5570_v3 = vadd.f32 %v1451_v58, %v1218_v10  ;;  %v51_v45 = vld [vmem:[%s7331_s2 + $0xf8] sm:$0xff]  ;;  %v50_v10 = vld [vmem:[%s7331_s2 + $0xf0] sm:$0xff] }
 0x11f   :  { %1797 = vmatmul.mubr.f32.gmra.mxu0 %v666_v48  ;;  %v1220_v5 = vpop.f32.mrf.mxu0  ;;  %v1453_v8 = vpop.f32.mrf.mxu1  ;;  %v62_v58 = vld [vmem:[%s7331_s2 + $0x150] sm:$0xff]  ;;  %v417_v7 = vmul.f32 %v5599_v26, %v50_v10  ;;  %v85_v10 = vld [vmem:[%s7331_s2 + $0x208] sm:$0xff] }
 0x120   :  { %1802 = vmatprep.mubr.f32.mxu0 %v678_v54  ;;  %v5585_v17 = vadd.f32 %v1453_v8, %v1220_v5  ;;  %v429_v12 = vmul.f32 %v5582_v13, %v62_v58 }
 0x121   :  { %2030 = vmatmul.mubr.f32.gmra.mxu1 %v668_v6  ;;  %v1224_v18 = vpop.f32.mrf.mxu0  ;;  %v1457_v56 = vpop.f32.mrf.mxu1  ;;  %v418_v6 = vmul.f32 %v5582_v13, %v51_v45  ;;  %v451_v45 = vmul.f32 %v5582_v13, %v84_v36 }
 0x122   :  { %2035 = vmatprep.mubr.f32.mxu1 %v680_v59  ;;  %v5594_v51 = vadd.f32 %v1457_v56, %v1224_v18  ;;  %v73_v56 = vld [vmem:[%s7331_s2 + $0x1a8] sm:$0xff] }
 0x123   :  { %1803 = vmatmul.mubr.f32.gmra.mxu0 %v677_v4  ;;  %v1226_v25 = vpop.f32.mrf.mxu0  ;;  %v1459_v28 = vpop.f32.mrf.mxu1  ;;  %v52_v4 = vld [vmem:[%s7331_s2 + $0x100] sm:$0xff]  ;;  %v440_v63 = vmul.f32 %v5582_v13, %v73_v56 }
 0x124   :  { %1808 = vmatprep.mubr.f32.mxu0 %v689_v11  ;;  %v5606_v32 = vadd.f32 %v1459_v28, %v1226_v25  ;;  %v419_v18 = vmul.f32 %v5610_v62, %v52_v4  ;;  %v94_v4 = vld [vmem:[%s7331_s2 + $0x250] sm:$0xff]  ;;  %v3215_v56 = vld [vmem:[%s7332_s4] sm:$0xff] }
 0x125   :  { %2036 = vmatmul.mubr.f32.gmra.mxu1 %v679_v16  ;;  %v1230_v33 = vpop.f32.mrf.mxu0  ;;  %v61_v16 = vld [vmem:[%s7331_s2 + $0x148] sm:$0xff] }
 0x126   :  { %2041 = vmatprep.mubr.f32.mxu1 %v691_v22  ;;  %v1463_v34 = vpop.f32.mrf.mxu1  ;;  %v428_v28 = vmul.f32 %v5599_v26, %v61_v16  ;;  %v3588_v16 = vmov 0  }
 0x127   :  { %1809 = vmatmul.mubr.f32.gmra.mxu0 %v688_v24  ;;  %v5618_v37 = vadd.f32 %v1463_v34, %v1230_v33  ;;  %v1232_v39 = vpop.f32.mrf.mxu0  ;;  %3529 = vset.pattern.permute.xlu1 %v3588_v16 }
 0x128   :  { %2112 = vmatprep.mubr.f32.mxu0 %v396_v30  ;;  %v1465_v61 = vpop.f32.mrf.mxu1  ;;  %3530 = vset.pattern.permute.xlu0 %v3588_v16 }
 0x129   :  { %2042 = vmatmul.mubr.f32.gmra.mxu1 %v690_v31  ;;  %v5626_v43 = vadd.f32 %v1465_v61, %v1232_v39  ;;  %v72_v31 = vld [vmem:[%s7331_s2 + $0x1a0] sm:$0xff]  ;;  %v74_v39 = vld [vmem:[%s7331_s2 + $0x1b0] sm:$0xff]  ;;  %3245 = vperm.xlu1 %3529, %v3215_v56  }
 0x12a   :  { %2345 = vmatprep.mubr.f32.mxu1 %v7335_v46  ;;  %v1236_v48 = vpop.f32.mrf.mxu0  ;;  %v1469_v50 = vpop.f32.mrf.mxu1  ;;  %v439_v41 = vmul.f32 %v5599_v26, %v72_v31  ;;  %v441_v49 = vmul.f32 %v5610_v62, %v74_v39  ;;  %3250 = vperm.xlu0 %3530, %v3216_v23   ;;  %v117_v39 = vld [vmem:[%s7331_s2 + $0x308] sm:$0xff]  ;;  %v127_v23 = vld [vmem:[%s7331_s2 + $0x358] sm:$0xff] }
 0x12b   :  { %2113 = vmatmul.mubr.f32.vlgmr.msra.gmra.mxu0 %v395_v2  ;;  %v5636_v54 = vadd.f32 %v1469_v50, %v1236_v48  ;;  %v83_v48 = vld [vmem:[%s7331_s2 + $0x1f8] sm:$0xff] }
 0x12c   :  { %2118 = vmatprep.mubr.f32.mxu0 %v407_v40  ;;  %v1238_v55 = vpop.f32.mrf.mxu0  ;;  %v1471_v15 = vpop.f32.mrf.mxu1 }
 0x12d   :  { %3499 = vmatmul.mubr.msk.f32.vlgmr.msra.gmra.mxu1 %vm1031_vm0, %v397_v42  ;;  %v5648_v59 = vadd.f32 %v1471_v15, %v1238_v55  ;;  %v95_v55 = vld [vmem:[%s7331_s2 + $0x258] sm:$0xff]  ;;  %v450_v15 = vmul.f32 %v5599_v26, %v83_v48 }
 0x12e   :  { %2351 = vmatprep.mubr.f32.mxu1 %v7335_v46  ;;  %v1242_v1 = vpop.f32.mrf.mxu0  ;;  %v1475_v5 = vpop.f32.mrf.mxu1 }
 0x12f   :  { %2119 = vmatmul.mubr.f32.gmra.mxu0 %v406_v52  ;;  %v5654_v8 = vadd.f32 %v1475_v5, %v1242_v1  ;;  %v462_v1 = vmul.f32 %v5582_v13, %v95_v55  ;;  %v484_v55 = vmul.f32 %v5582_v13, %v117_v39  ;;  %v3222_v39 = vld [vmem:[%s7332_s4 + $0x38] sm:$0xff] }
 0x130   :  { %2124 = vmatprep.mubr.f32.mxu0 %v418_v6  ;;  %v1244_v11 = vpop.f32.mrf.mxu0  ;;  %v1477_v21 = vpop.f32.mrf.mxu1 }
 0x131   :  { %3500 = vmatmul.mubr.msk.f32.gmra.mxu1 %vm1031_vm0, %v408_v14  ;;  %v5666_v22 = vadd.f32 %v1477_v21, %v1244_v11  ;;  %v96_v21 = vld [vmem:[%s7331_s2 + $0x260] sm:$0xff] }
 0x132   :  { %2357 = vmatprep.mubr.f32.mxu1 %v7335_v46  ;;  %v1481_v25 = vpop.f32.mrf.mxu1 }
 0x133   :  { %2125 = vmatmul.mubr.f32.gmra.mxu0 %v417_v7  ;;  %v1248_v24 = vpop.f32.mrf.mxu0  ;;  %v452_v7 = vmul.f32 %v5610_v62, %v85_v10  ;;  %v116_v10 = vld [vmem:[%s7331_s2 + $0x300] sm:$0xff] }
 0x134   :  { %2130 = vmatprep.mubr.f32.mxu0 %v429_v12  ;;  %v5672_v30 = vadd.f32 %v1481_v25, %v1248_v24  ;;  %v1483_v34 = vpop.f32.mrf.mxu1  ;;  %v106_v12 = vld [vmem:[%s7331_s2 + $0x2b0] sm:$0xff] }
 0x135   :  { %3501 = vmatmul.mubr.msk.f32.gmra.mxu1 %vm1031_vm0, %v419_v18  ;;  %v1250_v33 = vpop.f32.mrf.mxu0  ;;  %v473_v31 = vmul.f32 %v5582_v13, %v106_v12  ;;  %v3220_v12 = vld [vmem:[%s7332_s4 + $0x28] sm:$0xff] }
 0x136   :  { %2363 = vmatprep.mubr.f32.mxu1 %v7335_v46  ;;  %v5684_v2 = vadd.f32 %v1483_v34, %v1250_v33  ;;  %v1487_v40 = vpop.f32.mrf.mxu1  ;;  %v463_v34 = vmul.f32 %v5610_v62, %v96_v21 }
 0x137   :  { %2131 = vmatmul.mubr.f32.gmra.mxu0 %v428_v28  ;;  %v1254_v61 = vpop.f32.mrf.mxu0  ;;  %v461_v28 = vmul.f32 %v5599_v26, %v94_v4 }
 0x138   :  { %2136 = vmatprep.mubr.f32.mxu0 %v440_v63  ;;  %v5690_v42 = vadd.f32 %v1487_v40, %v1254_v61  ;;  %v1489_v52 = vpop.f32.mrf.mxu1  ;;  %v107_v40 = vld [vmem:[%s7331_s2 + $0x2b8] sm:$0xff] }
 0x139   :  { %3502 = vmatmul.mubr.msk.f32.gmra.mxu1 %vm1031_vm0, %v430_v60  ;;  %v1256_v50 = vpop.f32.mrf.mxu0  ;;  %v105_v60 = vld [vmem:[%s7331_s2 + $0x2a8] sm:$0xff] }
 0x13a   :  { %2369 = vmatprep.mubr.f32.mxu1 %v7335_v46  ;;  %v5702_v6 = vadd.f32 %v1489_v52, %v1256_v50 }
 0x13b   :  { %2137 = vmatmul.mubr.f32.gmra.mxu0 %v439_v41  ;;  %v1260_v14 = vpop.f32.mrf.mxu0  ;;  %v1493_v58 = vpop.f32.mrf.mxu1  ;;  %v3217_v41 = vld [vmem:[%s7332_s4 + $0x10] sm:$0xff] }
 0x13c   :  { %2142 = vmatprep.mubr.f32.mxu0 %v451_v45  ;;  %v5713_v5 = vadd.f32 %v1493_v58, %v1260_v14  ;;  %v3218_v45 = vld [vmem:[%s7332_s4 + $0x18] sm:$0xff]  ;;  %3255 = vperm.xlu1 %3529, %v3217_v41   ;;  %v128_v58 = vld [vmem:[%s7331_s2 + $0x360] sm:$0xff] }
 0x13d   :  { %3503 = vmatmul.mubr.msk.f32.gmra.mxu1 %vm1031_vm0, %v441_v49  ;;  %v1262_v11 = vpop.f32.mrf.mxu0  ;;  %v1495_v18 = vpop.f32.mrf.mxu1  ;;  %v472_v49 = vmul.f32 %v5599_v26, %v105_v60  ;;  %3260 = vperm.xlu0 %3530, %v3218_v45   ;;  %v495_v56 = vmul.f32 %v5582_v13, %v128_v58 }
 0x13e   :  { %2375 = vmatprep.mubr.f32.mxu1 %v7335_v46  ;;  %v5729_v24 = vadd.f32 %v1495_v18, %v1262_v11  ;;  %v3219_v11 = vld [vmem:[%s7332_s4 + $0x20] sm:$0xff]  ;;  %v483_v18 = vmul.f32 %v5599_v26, %v116_v10  ;;  %v150_v10 = vld [vmem:[%s7331_s2 + $0x410] sm:$0xff] }
 0x13f   :  { %2143 = vmatmul.mubr.f32.gmra.mxu0 %v450_v15  ;;  %v1266_v25 = vpop.f32.mrf.mxu0  ;;  %v1499_v63 = vpop.f32.mrf.mxu1  ;;  %v474_v15 = vmul.f32 %v5610_v62, %v107_v40  ;;  %v494_v40 = vmul.f32 %v5599_v26, %v127_v23 }
 0x140   :  { %2148 = vmatprep.mubr.f32.mxu0 %v462_v1  ;;  %v5737_v33 = vadd.f32 %v1499_v63, %v1266_v25  ;;  %3265 = vperm.xlu1 %3529, %v3219_v11   ;;  %v139_v63 = vld [vmem:[%s7331_s2 + $0x3b8] sm:$0xff] }
 0x141   :  { %3504 = vmatmul.mubr.msk.f32.gmra.mxu1 %vm1031_vm0, %v452_v7  ;;  %v1268_v36 = vpop.f32.mrf.mxu0  ;;  %v1501_v61 = vpop.f32.mrf.mxu1  ;;  %v118_v7 = vld [vmem:[%s7331_s2 + $0x310] sm:$0xff]  ;;  %3270 = vperm.xlu0 %3530, %v3220_v12  }
 0x142   :  { %2381 = vmatprep.mubr.f32.mxu1 %v7335_v46  ;;  %v5753_v48 = vadd.f32 %v1501_v61, %v1268_v36  ;;  %v3221_v36 = vld [vmem:[%s7332_s4 + $0x30] sm:$0xff] }
 0x143   :  { %2149 = vmatmul.mubr.f32.gmra.mxu0 %v461_v28  ;;  %v1272_v50 = vpop.f32.mrf.mxu0  ;;  %v485_v28 = vmul.f32 %v5610_v62, %v118_v7  ;;  %v3224_v7 = vld [vmem:[%s7332_s4 + $0x48] sm:$0xff] }
 0x144   :  { %2154 = vmatprep.mubr.f32.mxu0 %v473_v31  ;;  %v1505_v52 = vpop.f32.mrf.mxu1  ;;  %3275 = vperm.xlu1 %3529, %v3221_v36   ;;  %v3225_v36 = vld [vmem:[%s7332_s4 + $0x50] sm:$0xff] }
 0x145   :  { %3505 = vmatmul.mubr.msk.f32.gmra.mxu1 %vm1031_vm0, %v463_v34  ;;  %v5761_v14 = vadd.f32 %v1505_v52, %v1272_v50  ;;  %v1274_v1 = vpop.f32.mrf.mxu0  ;;  %v129_v34 = vld [vmem:[%s7331_s2 + $0x368] sm:$0xff]  ;;  %v138_v50 = vld [vmem:[%s7331_s2 + $0x3b0] sm:$0xff]  ;;  %3280 = vperm.xlu0 %3530, %v3222_v39   ;;  %v3226_v39 = vld [vmem:[%s7332_s4 + $0x58] sm:$0xff] }
 0x146   :  { %2387 = vmatprep.mubr.f32.mxu1 %v7335_v46  ;;  %v1507_v4 = vpop.f32.mrf.mxu1  ;;  %v505_v12 = vmul.f32 %v5599_v26, %v138_v50 }
 0x147   :  { %2155 = vmatmul.mubr.f32.gmra.mxu0 %v472_v49  ;;  %v5777_v16 = vadd.f32 %v1507_v4, %v1274_v1  ;;  %v506_v49 = vmul.f32 %v5582_v13, %v139_v63  ;;  %v140_v1 = vld [vmem:[%s7331_s2 + $0x3c0] sm:$0xff]  ;;  %v161_v63 = vld [vmem:[%s7331_s2 + $0x468] sm:$0xff] }
 0x148   :  { %2160 = vmatprep.mubr.f32.mxu0 %v484_v55  ;;  %v1278_v21 = vpop.f32.mrf.mxu0  ;;  %v1511_v25 = vpop.f32.mrf.mxu1  ;;  %v496_v55 = vmul.f32 %v5610_v62, %v129_v34  ;;  %v3223_v4 = vld [vmem:[%s7332_s4 + $0x40] sm:$0xff]  ;;  %v151_v34 = vld [vmem:[%s7331_s2 + $0x418] sm:$0xff]  ;;  %v528_v50 = vmul.f32 %v5582_v13, %v161_v63 }
 0x149   :  { %3506 = vmatmul.mubr.msk.f32.gmra.mxu1 %vm1031_vm0, %v474_v15  ;;  %v5789_v31 = vadd.f32 %v1511_v25, %v1278_v21  ;;  %3285 = vperm.xlu1 %3529, %v3223_v4   ;;  %v517_v21 = vmul.f32 %v5582_v13, %v150_v10  ;;  %v171_v63 = vld [vmem:[%s7331_s2 + $0x4b8] sm:$0xff] }
 0x14a   :  { %2393 = vmatprep.mubr.f32.mxu1 %v7335_v46  ;;  %v1280_v60 = vpop.f32.mrf.mxu0  ;;  %v1513_v61 = vpop.f32.mrf.mxu1  ;;  %3290 = vperm.xlu0 %3530, %v3224_v7   ;;  %v162_v7 = vld [vmem:[%s7331_s2 + $0x470] sm:$0xff] }
 0x14b   :  { %2161 = vmatmul.mubr.f32.gmra.mxu0 %v483_v18  ;;  %v5802_v41 = vadd.f32 %v1513_v61, %v1280_v60 }
 0x14c   :  { %2166 = vmatprep.mubr.f32.mxu0 %v495_v56  ;;  %v1284_v45 = vpop.f32.mrf.mxu0  ;;  %v1517_v52 = vpop.f32.mrf.mxu1  ;;  %v149_v56 = vld [vmem:[%s7331_s2 + $0x408] sm:$0xff] }
 0x14d   :  { %3507 = vmatmul.mubr.msk.f32.gmra.mxu1 %vm1031_vm0, %v485_v28  ;;  %v5813_v15 = vadd.f32 %v1517_v52, %v1284_v45  ;;  %v507_v28 = vmul.f32 %v5610_v62, %v140_v1  ;;  %v516_v45 = vmul.f32 %v5599_v26, %v149_v56  ;;  %3295 = vperm.xlu1 %3529, %v3225_v36   ;;  %v160_v52 = vld [vmem:[%s7331_s2 + $0x460] sm:$0xff] }
 0x14e   :  { %2399 = vmatprep.mubr.f32.mxu1 %v7335_v46  ;;  %v1286_v58 = vpop.f32.mrf.mxu0  ;;  %v1519_v11 = vpop.f32.mrf.mxu1  ;;  %3300 = vperm.xlu0 %3530, %v3226_v39   ;;  %v172_v1 = vld [vmem:[%s7331_s2 + $0x4c0] sm:$0xff]  ;;  %v529_v36 = vmul.f32 %v5610_v62, %v162_v7  ;;  %v183_v39 = vld [vmem:[%s7331_s2 + $0x518] sm:$0xff] }
 0x14f   :  { %2167 = vmatmul.mubr.f32.gmra.mxu0 %v494_v40  ;;  %v5826_v18 = vadd.f32 %v1519_v11, %v1286_v58  ;;  %v518_v58 = vmul.f32 %v5610_v62, %v151_v34  ;;  %v3227_v11 = vld [vmem:[%s7332_s4 + $0x60] sm:$0xff] }
 0x150   :  { %2172 = vmatprep.mubr.f32.mxu0 %v506_v49  ;;  %v1523_v25 = vpop.f32.mrf.mxu1 }
 0x151   :  { %3508 = vmatmul.mubr.msk.f32.gmra.mxu1 %vm1031_vm0, %v496_v55  ;;  %v1290_v23 = vpop.f32.mrf.mxu0  ;;  %3305 = vperm.xlu1 %3529, %v3227_v11  }
 0x152   :  { %v5837_v60 = vadd.f32 %v1523_v25, %v1290_v23  ;;  %2405 = vmatprep.mubr.f32.mxu1 %v7335_v46  ;;  %v1525_v40 = vpop.f32.mrf.mxu1  ;;  %v527_v23 = vmul.f32 %v5599_v26, %v160_v52 }
 0x153   :  { %2173 = vmatmul.mubr.f32.gmra.mxu0 %v505_v12  ;;  %v1292_v61 = vpop.f32.mrf.mxu0  ;;  %v3228_v12 = vld [vmem:[%s7332_s4 + $0x68] sm:$0xff] }
 0x154   :  { %v5850_v49 = vadd.f32 %v1525_v40, %v1292_v61  ;;  %2178 = vmatprep.mubr.f32.mxu0 %v517_v21  ;;  %v1529_v10 = vpop.f32.mrf.mxu1  ;;  %3310 = vperm.xlu0 %3530, %v3228_v12   ;;  %v173_v40 = vld [vmem:[%s7331_s2 + $0x4c8] sm:$0xff] }
 0x155   :  { %3509 = vmatmul.mubr.msk.f32.gmra.mxu1 %vm1031_vm0, %v507_v28  ;;  %v1296_v55 = vpop.f32.mrf.mxu0  ;;  %v539_v28 = vmul.f32 %v5582_v13, %v172_v1  ;;  %v182_v1 = vld [vmem:[%s7331_s2 + $0x510] sm:$0xff]  ;;  %v540_v12 = vmul.f32 %v5610_v62, %v173_v40 }
 0x156   :  { %v5861_v4 = vadd.f32 %v1529_v10, %v1296_v55  ;;  %2411 = vmatprep.mubr.f32.mxu1 %v7335_v46  ;;  %v1531_v56 = vpop.f32.mrf.mxu1  ;;  %v538_v55 = vmul.f32 %v5599_v26, %v171_v63 }
 0x157   :  { %2179 = vmatmul.mubr.f32.gmra.mxu0 %v516_v45  ;;  %v1298_v21 = vpop.f32.mrf.mxu0  ;;  %v3229_v45 = vld [vmem:[%s7332_s4 + $0x70] sm:$0xff] }
 0x158   :  { %v5874_v25 = vadd.f32 %v1531_v56, %v1298_v21  ;;  %2184 = vmatprep.mubr.f32.mxu0 %v528_v50  ;;  %3315 = vperm.xlu1 %3529, %v3229_v45   ;;  %v194_v21 = vld [vmem:[%s7331_s2 + $0x570] sm:$0xff] }
 0x159   :  { %3510 = vmatmul.mubr.msk.f32.gmra.mxu1 %vm1031_vm0, %v518_v58  ;;  %v1302_v34 = vpop.f32.mrf.mxu0  ;;  %v1535_v61 = vpop.f32.mrf.mxu1  ;;  %v550_v58 = vmul.f32 %v5582_v13, %v183_v39  ;;  %v561_v39 = vmul.f32 %v5582_v13, %v194_v21 }
 0x15a   :  { %2417 = vmatprep.mubr.f32.mxu1 %v7335_v46  ;;  %v5892_v50 = vadd.f32 %v1535_v61, %v1302_v34  ;;  %v549_v34 = vmul.f32 %v5599_v26, %v182_v1  ;;  %v193_v61 = vld [vmem:[%s7331_s2 + $0x568] sm:$0xff] }
 0x15b   :  { %2185 = vmatmul.mubr.f32.gmra.mxu0 %v527_v23  ;;  %v1304_v52 = vpop.f32.mrf.mxu0  ;;  %v1537_v10 = vpop.f32.mrf.mxu1  ;;  %v184_v23 = vld [vmem:[%s7331_s2 + $0x520] sm:$0xff] }
 0x15c   :  { %2190 = vmatprep.mubr.f32.mxu0 %v539_v28  ;;  %v5900_v7 = vadd.f32 %v1537_v10, %v1304_v52  ;;  %v551_v45 = vmul.f32 %v5610_v62, %v184_v23  ;;  %v205_v52 = vld [vmem:[%s7331_s2 + $0x5c8] sm:$0xff]  ;;  %v204_v23 = vld [vmem:[%s7331_s2 + $0x5c0] sm:$0xff] }
 0x15d   :  { %3511 = vmatmul.mubr.msk.f32.gmra.mxu1 %vm1031_vm0, %v529_v36  ;;  %v1308_v11 = vpop.f32.mrf.mxu0  ;;  %v1541_v56 = vpop.f32.mrf.mxu1 }
 0x15e   :  { %2423 = vmatprep.mubr.f32.mxu1 %v7335_v46  ;;  %v5910_v28 = vadd.f32 %v1541_v56, %v1308_v11  ;;  %v560_v11 = vmul.f32 %v5599_v26, %v193_v61  ;;  %v572_v56 = vmul.f32 %v5582_v13, %v205_v52 }
 0x15f   :  { %2191 = vmatmul.mubr.f32.gmra.mxu0 %v538_v55  ;;  %v1310_v63 = vpop.f32.mrf.mxu0  ;;  %v1543_v36 = vpop.f32.mrf.mxu1 }
 0x160   :  { %2196 = vmatprep.mubr.f32.mxu0 %v550_v58  ;;  %v5918_v40 = vadd.f32 %v1543_v36, %v1310_v63  ;;  %v195_v58 = vld [vmem:[%s7331_s2 + $0x578] sm:$0xff] }
 0x161   :  { %3512 = vmatmul.mubr.msk.f32.gmra.mxu1 %vm1031_vm0, %v540_v12  ;;  %v1314_v55 = vpop.f32.mrf.mxu0  ;;  %v562_v36 = vmul.f32 %v5610_v62, %v195_v58 }
 0x162   :  { %v1547_v10 = vpop.f32.mrf.mxu1  ;;  %2429 = vmatprep.mubr.f32.mxu1 %v7335_v46 }
 0x163   :  { %v5928_v1 = vadd.f32 %v1547_v10, %v1314_v55  ;;  %2197 = vmatmul.mubr.f32.gmra.mxu0 %v549_v34  ;;  %v1316_v12 = vpop.f32.mrf.mxu0  ;;  %v216_v34 = vld [vmem:[%s7331_s2 + $0x620] sm:$0xff]  ;;  %v571_v55 = vmul.f32 %v5599_v26, %v204_v23 }
 0x164   :  { %v1549_v21 = vpop.f32.mrf.mxu1  ;;  %2202 = vmatprep.mubr.f32.mxu0 %v561_v39  ;;  %v206_v39 = vld [vmem:[%s7331_s2 + $0x5d0] sm:$0xff]  ;;  %v583_v58 = vmul.f32 %v5582_v13, %v216_v34 }
 0x165   :  { %7374 = vst [vmem:[#allocation2_spill] sm:$0xff] %v5928_v1  ;;  %3513 = vmatmul.mubr.msk.f32.gmra.mxu1 %vm1031_vm0, %v551_v45  ;;  %v5936_v63 = vadd.f32 %v1549_v21, %v1316_v12  ;;  %v215_v12 = vld [vmem:[%s7331_s2 + $0x618] sm:$0xff] }
 0x166   :  { %v1320_v61 = vpop.f32.mrf.mxu0  ;;  %2435 = vmatprep.mubr.f32.mxu1 %v7335_v46  ;;  %v1553_v52 = vpop.f32.mrf.mxu1  ;;  %v573_v46 = vmul.f32 %v5610_v62, %v206_v39 }
 0x167   :  { %7375 = vst [vmem:[#allocation3_spill] sm:$0xff] %v5936_v63  ;;  %2203 = vmatmul.mubr.f32.gmra.mxu0 %v560_v11  ;;  %v5947_v45 = vadd.f32 %v1553_v52, %v1320_v61  ;;  %v227_v11 = vld [vmem:[%s7331_s2 + $0x678] sm:$0xff]  ;;  %v7378_v52 = vmov 0.0  }
 0x168   :  { %v1322_v10 = vpop.f32.mrf.mxu0  ;;  %2208 = vmatprep.mubr.f32.mxu0 %v572_v56  ;;  %v1555_v21 = vpop.f32.mrf.mxu1  ;;  %v217_v56 = vld [vmem:[%s7331_s2 + $0x628] sm:$0xff]  ;;  %v594_v63 = vmul.f32 %v5582_v13, %v227_v11 }
 0x169   :  { %7376 = vst [vmem:[#allocation4_spill] sm:$0xff] %v5947_v45  ;;  %3514 = vmatmul.mubr.msk.f32.gmra.mxu1 %vm1031_vm0, %v562_v36  ;;  %v5958_v23 = vadd.f32 %v1555_v21, %v1322_v10  ;;  %v582_v36 = vmul.f32 %v5599_v26, %v215_v12  ;;  %v226_v10 = vld [vmem:[%s7331_s2 + $0x670] sm:$0xff] }
 0x16a   :  { %v1326_v61 = vpop.f32.mrf.mxu0  ;;  %2441 = vmatprep.mubr.f32.mxu1 %v7378_v52  ;;  %v1559_v34 = vpop.f32.mrf.mxu1 }
 0x16b   :  { %7377 = vst [vmem:[#allocation5_spill] sm:$0xff] %v5958_v23  ;;  %2209 = vmatmul.mubr.f32.gmra.mxu0 %v571_v55  ;;  %v5965_v45 = vadd.f32 %v1559_v34, %v1326_v61  ;;  %v584_v23 = vmul.f32 %v5610_v62, %v217_v56  ;;  %v238_v55 = vld [vmem:[%s7331_s2 + $0x6d0] sm:$0xff] }
 0x16c   :  { %v1328_v39 = vpop.f32.mrf.mxu0  ;;  %2214 = vmatprep.mubr.f32.mxu0 %v583_v58  ;;  %v1561_v21 = vpop.f32.mrf.mxu1  ;;  %v228_v58 = vld [vmem:[%s7331_s2 + $0x680] sm:$0xff]  ;;  %v605_v56 = vmul.f32 %v5582_v13, %v238_v55 }
 0x16d   :  { %7379 = vst [vmem:[#allocation6_spill] sm:$0xff] %v5965_v45  ;;  %3515 = vmatmul.mubr.msk.f32.gmra.mxu1 %vm1031_vm0, %v573_v46  ;;  %v5976_v12 = vadd.f32 %v1561_v21, %v1328_v39  ;;  %v593_v46 = vmul.f32 %v5599_v26, %v226_v10  ;;  %v237_v39 = vld [vmem:[%s7331_s2 + $0x6c8] sm:$0xff]  ;;  %v595_v45 = vmul.f32 %v5610_v62, %v228_v58 }
 0x16e   :  { %2447 = vmatprep.mubr.f32.mxu1 %v7378_v52  ;;  %v1565_v61 = vpop.f32.mrf.mxu1 }
 0x16f   :  { %7380 = vst [vmem:[#allocation7_spill] sm:$0xff] %v5976_v12  ;;  %v1332_v11 = vpop.f32.mrf.mxu0  ;;  %2215 = vmatmul.mubr.f32.gmra.mxu0 %v582_v36  ;;  %v249_v36 = vld [vmem:[%s7331_s2 + $0x728] sm:$0xff] }
 0x170   :  { %v5983_v34 = vadd.f32 %v1565_v61, %v1332_v11  ;;  %2220 = vmatprep.mubr.f32.mxu0 %v594_v63  ;;  %v1567_v12 = vpop.f32.mrf.mxu1  ;;  %v239_v63 = vld [vmem:[%s7331_s2 + $0x6d8] sm:$0xff]  ;;  %v616_v58 = vmul.f32 %v5582_v13, %v249_v36 }
 0x171   :  { %3516 = vmatmul.mubr.msk.f32.gmra.mxu1 %vm1031_vm0, %v584_v23  ;;  %v1334_v21 = vpop.f32.mrf.mxu0  ;;  %v604_v23 = vmul.f32 %v5599_v26, %v237_v39 }
 0x172   :  { %7381 = vst [vmem:[#allocation8_spill] sm:$0xff] %v5983_v34  ;;  %v5994_v10 = vadd.f32 %v1567_v12, %v1334_v21  ;;  %2453 = vmatprep.mubr.f32.mxu1 %v7378_v52  ;;  %v1571_v11 = vpop.f32.mrf.mxu1  ;;  %v248_v12 = vld [vmem:[%s7331_s2 + $0x720] sm:$0xff]  ;;  %v606_v34 = vmul.f32 %v5610_v62, %v239_v63 }
 0x173   :  { %v1338_v55 = vpop.f32.mrf.mxu0  ;;  %2221 = vmatmul.mubr.f32.gmra.mxu0 %v593_v46  ;;  %v260_v46 = vld [vmem:[%s7331_s2 + $0x780] sm:$0xff] }
 0x174   :  { %7382 = vst [vmem:[#allocation9_spill] sm:$0xff] %v5994_v10  ;;  %v6001_v61 = vadd.f32 %v1571_v11, %v1338_v55  ;;  %2226 = vmatprep.mubr.f32.mxu0 %v605_v56  ;;  %v1573_v10 = vpop.f32.mrf.mxu1  ;;  %v250_v56 = vld [vmem:[%s7331_s2 + $0x730] sm:$0xff]  ;;  %v627_v63 = vmul.f32 %v5582_v13, %v260_v46  ;;  %v259_v11 = vld [vmem:[%s7331_s2 + $0x778] sm:$0xff] }
 0x175   :  { %3517 = vmatmul.mubr.msk.f32.gmra.mxu1 %vm1031_vm0, %v595_v45  ;;  %v1340_v21 = vpop.f32.mrf.mxu0  ;;  %v615_v45 = vmul.f32 %v5599_v26, %v248_v12 }
 0x176   :  { %7383 = vst [vmem:[#allocation10_spill] sm:$0xff] %v6001_v61  ;;  %v6012_v39 = vadd.f32 %v1573_v10, %v1340_v21  ;;  %2459 = vmatprep.mubr.f32.mxu1 %v7378_v52 }
 0x177   :  { %v1344_v36 = vpop.f32.mrf.mxu0  ;;  %2227 = vmatmul.mubr.f32.gmra.mxu0 %v604_v23  ;;  %v1577_v55 = vpop.f32.mrf.mxu1  ;;  %v271_v23 = vld [vmem:[%s7331_s2 + $0x7d8] sm:$0xff] }
 0x178   :  { %7384 = vst [vmem:[#allocation11_spill] sm:$0xff] %v6012_v39  ;;  %2232 = vmatprep.mubr.f32.mxu0 %v616_v58  ;;  %v6023_v10 = vadd.f32 %v1577_v55, %v1344_v36  ;;  %v617_v39 = vmul.f32 %v5610_v62, %v250_v56  ;;  %v261_v58 = vld [vmem:[%s7331_s2 + $0x788] sm:$0xff]  ;;  %v638_v56 = vmul.f32 %v5582_v13, %v271_v23 }
 0x179   :  { %3518 = vmatmul.mubr.msk.f32.gmra.mxu1 %vm1031_vm0, %v606_v34  ;;  %v1346_v21 = vpop.f32.mrf.mxu0  ;;  %v1579_v12 = vpop.f32.mrf.mxu1  ;;  %v626_v34 = vmul.f32 %v5599_v26, %v259_v11 }
 0x17a   :  { %7385 = vst [vmem:[#allocation12_spill] sm:$0xff] %v6023_v10  ;;  %2465 = vmatprep.mubr.f32.mxu1 %v7378_v52  ;;  %v6034_v46 = vadd.f32 %v1579_v12, %v1346_v21  ;;  %v270_v10 = vld [vmem:[%s7331_s2 + $0x7d0] sm:$0xff]  ;;  %v628_v21 = vmul.f32 %v5610_v62, %v261_v58 }
 0x17b   :  { %v1648_v36 = vpop.f32.mrf.mxu0  ;;  %2233 = vmatmul.mubr.f32.gmra.mxu0 %v615_v45  ;;  %v282_v45 = vld [vmem:[%s7331_s2 + $0x830] sm:$0xff] }
 0x17c   :  { %v1649_v55 = vadd.f32 %v1648_v36, %v5425_v20  ;;  %2238 = vmatprep.mubr.f32.mxu0 %v627_v63  ;;  %v1881_v61 = vpop.f32.mrf.mxu1  ;;  %v272_v63 = vld [vmem:[%s7331_s2 + $0x7e0] sm:$0xff] }
 0x17d   :  { %3519 = vmatmul.mubr.msk.f32.gmra.mxu1 %vm1031_vm0, %v617_v39  ;;  %v1650_v1 = vpop.f32.mrf.mxu0  ;;  %v637_v39 = vmul.f32 %v5599_v26, %v270_v10  ;;  %v293_v10 = vld [vmem:[%s7331_s2 + $0x888] sm:$0xff] }
 0x17e   :  { %v6047_v11 = vadd.f32 %v1881_v61, %v1649_v55  ;;  %v1651_v20 = vadd.f32 %v1650_v1, %v5441_v29  ;;  %2471 = vmatprep.mubr.f32.mxu1 %v7378_v52  ;;  %v1883_v23 = vpop.f32.mrf.mxu1  ;;  %v649_v61 = vmul.f32 %v5582_v13, %v282_v45  ;;  %v281_v29 = vld [vmem:[%s7331_s2 + $0x828] sm:$0xff] }
 0x17f   :  { %v1654_v12 = vpop.f32.mrf.mxu0  ;;  %2239 = vmatmul.mubr.f32.gmra.mxu0 %v626_v34 }
 0x180   :  { %7386 = vst [vmem:[#allocation13_spill] sm:$0xff] %v6047_v11  ;;  %v6055_v58 = vadd.f32 %v1883_v23, %v1651_v20  ;;  %v1655_v36 = vadd.f32 %v1654_v12, %v5457_v38  ;;  %2244 = vmatprep.mubr.f32.mxu0 %v638_v56  ;;  %v1887_v1 = vpop.f32.mrf.mxu1  ;;  %v639_v11 = vmul.f32 %v5610_v62, %v272_v63  ;;  %v283_v56 = vld [vmem:[%s7331_s2 + $0x838] sm:$0xff] }
 0x181   :  { %3520 = vmatmul.mubr.msk.f32.gmra.mxu1 %vm1031_vm0, %v628_v21  ;;  %v1656_v55 = vpop.f32.mrf.mxu0  ;;  %v648_v21 = vmul.f32 %v5599_v26, %v281_v29  ;;  %v660_v12 = vmul.f32 %v5582_v13, %v293_v10 }
 0x182   :  { %v6067_v34 = vadd.f32 %v1887_v1, %v1655_v36  ;;  %v1657_v38 = vadd.f32 %v1656_v55, %v5470_v47  ;;  %2477 = vmatprep.mubr.f32.mxu1 %v7378_v52  ;;  %v1889_v45 = vpop.f32.mrf.mxu1  ;;  %v292_v47 = vld [vmem:[%s7331_s2 + $0x880] sm:$0xff]  ;;  %v650_v55 = vmul.f32 %v5610_v62, %v283_v56 }
 0x183   :  { %v1660_v20 = vpop.f32.mrf.mxu0  ;;  %2245 = vmatmul.mubr.f32.gmra.mxu0 %v637_v39  ;;  %v304_v39 = vld [vmem:[%s7331_s2 + $0x8e0] sm:$0xff] }
 0x184   :  { %v6075_v63 = vadd.f32 %v1889_v45, %v1657_v38  ;;  %v1661_v23 = vadd.f32 %v1660_v20, %v5483_v57  ;;  %2250 = vmatprep.mubr.f32.mxu0 %v649_v61  ;;  %v294_v61 = vld [vmem:[%s7331_s2 + $0x890] sm:$0xff]  ;;  %v671_v20 = vmul.f32 %v5582_v13, %v304_v39 }
 0x185   :  { %v1893_v36 = vpop.f32.mrf.mxu1  ;;  %3521 = vmatmul.mubr.msk.f32.gmra.mxu1 %vm1031_vm0, %v639_v11  ;;  %v1662_v1 = vpop.f32.mrf.mxu0  ;;  %v659_v11 = vmul.f32 %v5599_v26, %v292_v47 }
 0x186   :  { %v6087_v29 = vadd.f32 %v1893_v36, %v1661_v23  ;;  %v1663_v57 = vadd.f32 %v1662_v1, %v5493_v0  ;;  %2483 = vmatprep.mubr.f32.mxu1 %v7378_v52  ;;  %v303_v0 = vld [vmem:[%s7331_s2 + $0x8d8] sm:$0xff]  ;;  %v661_v1 = vmul.f32 %v5610_v62, %v294_v61 }
 0x187   :  { %v1895_v10 = vpop.f32.mrf.mxu1  ;;  %v1666_v38 = vpop.f32.mrf.mxu0  ;;  %2251 = vmatmul.mubr.f32.gmra.mxu0 %v648_v21  ;;  %v315_v21 = vld [vmem:[%s7331_s2 + $0x938] sm:$0xff] }
 0x188   :  { %v6095_v56 = vadd.f32 %v1895_v10, %v1663_v57  ;;  %v1667_v45 = vadd.f32 %v1666_v38, %v5503_v9  ;;  %2256 = vmatprep.mubr.f32.mxu0 %v660_v12  ;;  %v305_v12 = vld [vmem:[%s7331_s2 + $0x8e8] sm:$0xff]  ;;  %v682_v38 = vmul.f32 %v5582_v13, %v315_v21 }
 0x189   :  { %v1899_v23 = vpop.f32.mrf.mxu1  ;;  %3522 = vmatmul.mubr.msk.f32.gmra.mxu1 %vm1031_vm0, %v650_v55  ;;  %v1668_v36 = vpop.f32.mrf.mxu0  ;;  %v670_v55 = vmul.f32 %v5599_v26, %v303_v0 }
 0x18a   :  { %v6107_v47 = vadd.f32 %v1899_v23, %v1667_v45  ;;  %v1669_v9 = vadd.f32 %v1668_v36, %v5513_v19  ;;  %2489 = vmatprep.mubr.f32.mxu1 %v7378_v52  ;;  %v314_v19 = vld [vmem:[%s7331_s2 + $0x930] sm:$0xff]  ;;  %v672_v36 = vmul.f32 %v5610_v62, %v305_v12 }
 0x18b   :  { %v1901_v39 = vpop.f32.mrf.mxu1  ;;  %v1672_v57 = vpop.f32.mrf.mxu0  ;;  %2257 = vmatmul.mubr.f32.gmra.mxu0 %v659_v11  ;;  %v326_v11 = vld [vmem:[%s7331_s2 + $0x990] sm:$0xff] }
 0x18c   :  { %v6115_v61 = vadd.f32 %v1901_v39, %v1669_v9  ;;  %v1673_v10 = vadd.f32 %v1672_v57, %v5523_v27  ;;  %2262 = vmatprep.mubr.f32.mxu0 %v671_v20  ;;  %v316_v20 = vld [vmem:[%s7331_s2 + $0x940] sm:$0xff]  ;;  %v693_v57 = vmul.f32 %v5582_v13, %v326_v11 }
 0x18d   :  { %v1905_v45 = vpop.f32.mrf.mxu1  ;;  %3523 = vmatmul.mubr.msk.f32.gmra.mxu1 %vm1031_vm0, %v661_v1  ;;  %v1674_v23 = vpop.f32.mrf.mxu0  ;;  %v681_v1 = vmul.f32 %v5599_v26, %v314_v19 }
 0x18e   :  { %v6127_v0 = vadd.f32 %v1905_v45, %v1673_v10  ;;  %v1675_v27 = vadd.f32 %v1674_v23, %v5533_v35  ;;  %2495 = vmatprep.mubr.f32.mxu1 %v7378_v52  ;;  %v325_v35 = vld [vmem:[%s7331_s2 + $0x988] sm:$0xff]  ;;  %v683_v23 = vmul.f32 %v5610_v62, %v316_v20 }
 0x18f   :  { %v1907_v21 = vpop.f32.mrf.mxu1  ;;  %v1678_v9 = vpop.f32.mrf.mxu0  ;;  %2263 = vmatmul.mubr.f32.gmra.mxu0 %v670_v55  ;;  %v692_v11 = vmul.f32 %v5599_v26, %v325_v35 }
 0x190   :  { %v6135_v12 = vadd.f32 %v1907_v21, %v1675_v27  ;;  %v1679_v39 = vadd.f32 %v1678_v9, %v5543_v44  ;;  %2268 = vmatprep.mubr.f32.mxu0 %v682_v38  ;;  %v327_v44 = vld [vmem:[%s7331_s2 + $0x998] sm:$0xff] }
 0x191   :  { %v1911_v10 = vpop.f32.mrf.mxu1  ;;  %3524 = vmatmul.mubr.msk.f32.gmra.mxu1 %vm1031_vm0, %v672_v36  ;;  %v1680_v45 = vpop.f32.mrf.mxu0 }
 0x192   :  { %v6144_v55 = vadd.f32 %v1911_v10, %v1679_v39  ;;  %v1681_v19 = vadd.f32 %v1680_v45, %v5553_v53  ;;  %2501 = vmatprep.mubr.f32.mxu1 %v7378_v52  ;;  %v694_v53 = vmul.f32 %v5610_v62, %v327_v44 }
 0x193   :  { %v1913_v13 = vpop.f32.mrf.mxu1  ;;  %v1684_v38 = vpop.f32.mrf.mxu0  ;;  %2269 = vmatmul.mubr.f32.gmra.mxu0 %v681_v1 }
 0x194   :  { %v6152_v27 = vadd.f32 %v1913_v13, %v1681_v19  ;;  %v1685_v36 = vadd.f32 %v1684_v38, %v5570_v3  ;;  %2274 = vmatprep.mubr.f32.mxu0 %v693_v57 }
 0x195   :  { %v1917_v20 = vpop.f32.mrf.mxu1  ;;  %v1686_v21 = vpop.f32.mrf.mxu0  ;;  %3525 = vmatmul.mubr.msk.f32.gmra.mxu1 %vm1031_vm0, %v683_v23 }
 0x196   :  { %v6157_v9 = vadd.f32 %v1917_v20, %v1685_v36  ;;  %v1687_v39 = vadd.f32 %v1686_v21, %v5585_v17  ;;  %2507 = vmatprep.mubr.f32.mxu1 %v7378_v52 }
 0x197   :  { %v1919_v1 = vpop.f32.mrf.mxu1  ;;  %v1690_v10 = vpop.f32.mrf.mxu0  ;;  %2275 = vmatmul.mubr.f32.gmra.mxu0 %v692_v11 }
 0x198   :  { %v6161_v26 = vadd.f32 %v1919_v1, %v1687_v39  ;;  %v1691_v3 = vadd.f32 %v1690_v10, %v5594_v51 }
 0x199   :  { %v1923_v57 = vpop.f32.mrf.mxu1  ;;  %v1692_v35 = vpop.f32.mrf.mxu0  ;;  %3526 = vmatmul.mubr.msk.f32.gmra.mxu1 %vm1031_vm0, %v694_v53 }
 0x19a   :  { %v6165_v45 = vadd.f32 %v1923_v57, %v1691_v3  ;;  %v1693_v62 = vadd.f32 %v1692_v35, %v5606_v32 }
 0x19b   :  { %v1925_v23 = vpop.f32.mrf.mxu1  ;;  %v1696_v19 = vpop.f32.mrf.mxu0 }
 0x19c   :  { %v6168_v17 = vadd.f32 %v1925_v23, %v1693_v62  ;;  %v1697_v52 = vadd.f32 %v1696_v19, %v5618_v37 }
 0x19d   :  { %v1929_v44 = vpop.f32.mrf.mxu1  ;;  %v1698_v13 = vpop.f32.mrf.mxu0 }
 0x19e   :  { %v6171_v38 = vadd.f32 %v1929_v44, %v1697_v52  ;;  %v1699_v51 = vadd.f32 %v1698_v13, %v5626_v43 }
 0x19f   :  { %v1931_v11 = vpop.f32.mrf.mxu1  ;;  %v1702_v36 = vpop.f32.mrf.mxu0 }
 0x1a0   :  { %v6174_v20 = vadd.f32 %v1931_v11, %v1699_v51  ;;  %v1703_v21 = vadd.f32 %v1702_v36, %v5636_v54 }
 0x1a1   :  { %v1935_v53 = vpop.f32.mrf.mxu1  ;;  %v1704_v32 = vpop.f32.mrf.mxu0 }
 0x1a2   :  { %v6177_v39 = vadd.f32 %v1935_v53, %v1703_v21  ;;  %v1705_v1 = vadd.f32 %v1704_v32, %v5648_v59 }
 0x1a3   :  { %v1937_v10 = vpop.f32.mrf.mxu1  ;;  %v1708_v37 = vpop.f32.mrf.mxu0 }
 0x1a4   :  { %v6180_v3 = vadd.f32 %v1937_v10, %v1705_v1  ;;  %v1709_v57 = vadd.f32 %v1708_v37, %v5654_v8 }
 0x1a5   :  { %v1941_v35 = vpop.f32.mrf.mxu1  ;;  %v1710_v43 = vpop.f32.mrf.mxu0 }
 0x1a6   :  { %v6183_v62 = vadd.f32 %v1941_v35, %v1709_v57  ;;  %v1711_v23 = vadd.f32 %v1710_v43, %v5666_v22 }
 0x1a7   :  { %v1943_v19 = vpop.f32.mrf.mxu1  ;;  %v1714_v54 = vpop.f32.mrf.mxu0 }
 0x1a8   :  { %v6186_v52 = vadd.f32 %v1943_v19, %v1711_v23  ;;  %v1715_v44 = vadd.f32 %v1714_v54, %v5672_v30 }
 0x1a9   :  { %v1947_v13 = vpop.f32.mrf.mxu1  ;;  %v1716_v59 = vpop.f32.mrf.mxu0 }
 0x1aa   :  { %v6189_v51 = vadd.f32 %v1947_v13, %v1715_v44  ;;  %v1717_v11 = vadd.f32 %v1716_v59, %v5684_v2 }
 0x1ab   :  { %v1949_v36 = vpop.f32.mrf.mxu1  ;;  %v1720_v8 = vpop.f32.mrf.mxu0 }
 0x1ac   :  { %v6192_v21 = vadd.f32 %v1949_v36, %v1717_v11  ;;  %v1721_v53 = vadd.f32 %v1720_v8, %v5690_v42 }
 0x1ad   :  { %v1953_v32 = vpop.f32.mrf.mxu1  ;;  %v1722_v22 = vpop.f32.mrf.mxu0 }
 0x1ae   :  { %v6195_v1 = vadd.f32 %v1953_v32, %v1721_v53  ;;  %v1723_v10 = vadd.f32 %v1722_v22, %v5702_v6 }
 0x1af   :  { %v1955_v37 = vpop.f32.mrf.mxu1  ;;  %v1726_v30 = vpop.f32.mrf.mxu0 }
 0x1b0   :  { %v6198_v57 = vadd.f32 %v1955_v37, %v1723_v10  ;;  %v1727_v35 = vadd.f32 %v1726_v30, %v5713_v5 }
 0x1b1   :  { %v1959_v43 = vpop.f32.mrf.mxu1  ;;  %v1728_v2 = vpop.f32.mrf.mxu0 }
 0x1b2   :  { %v6201_v23 = vadd.f32 %v1959_v43, %v1727_v35  ;;  %v1729_v19 = vadd.f32 %v1728_v2, %v5729_v24 }
 0x1b3   :  { %v1961_v54 = vpop.f32.mrf.mxu1  ;;  %v1732_v42 = vpop.f32.mrf.mxu0 }
 0x1b4   :  { %v6204_v44 = vadd.f32 %v1961_v54, %v1729_v19  ;;  %v1733_v13 = vadd.f32 %v1732_v42, %v5737_v33 }
 0x1b5   :  { %v1965_v59 = vpop.f32.mrf.mxu1  ;;  %v1734_v6 = vpop.f32.mrf.mxu0 }
 0x1b6   :  { %v6207_v11 = vadd.f32 %v1965_v59, %v1733_v13  ;;  %v1735_v36 = vadd.f32 %v1734_v6, %v5753_v48 }
 0x1b7   :  { %v1967_v8 = vpop.f32.mrf.mxu1  ;;  %v1738_v5 = vpop.f32.mrf.mxu0 }
 0x1b8   :  { %v6210_v53 = vadd.f32 %v1967_v8, %v1735_v36  ;;  %v1739_v32 = vadd.f32 %v1738_v5, %v5761_v14 }
 0x1b9   :  { %v1971_v22 = vpop.f32.mrf.mxu1  ;;  %v1740_v24 = vpop.f32.mrf.mxu0 }
 0x1ba   :  { %v6213_v10 = vadd.f32 %v1971_v22, %v1739_v32  ;;  %v1741_v37 = vadd.f32 %v1740_v24, %v5777_v16 }
 0x1bb   :  { %v1973_v30 = vpop.f32.mrf.mxu1  ;;  %v1744_v33 = vpop.f32.mrf.mxu0 }
 0x1bc   :  { %v6216_v35 = vadd.f32 %v1973_v30, %v1741_v37  ;;  %v1745_v43 = vadd.f32 %v1744_v33, %v5789_v31 }
 0x1bd   :  { %v1977_v2 = vpop.f32.mrf.mxu1  ;;  %v1746_v48 = vpop.f32.mrf.mxu0 }
 0x1be   :  { %v6219_v19 = vadd.f32 %v1977_v2, %v1745_v43  ;;  %v1747_v54 = vadd.f32 %v1746_v48, %v5802_v41 }
 0x1bf   :  { %v1979_v42 = vpop.f32.mrf.mxu1  ;;  %v1750_v14 = vpop.f32.mrf.mxu0 }
 0x1c0   :  { %v6222_v13 = vadd.f32 %v1979_v42, %v1747_v54  ;;  %v1751_v59 = vadd.f32 %v1750_v14, %v5813_v15 }
 0x1c1   :  { %v1983_v6 = vpop.f32.mrf.mxu1  ;;  %v1752_v16 = vpop.f32.mrf.mxu0 }
 0x1c2   :  { %v6225_v36 = vadd.f32 %v1983_v6, %v1751_v59  ;;  %v1753_v8 = vadd.f32 %v1752_v16, %v5826_v18 }
 0x1c3   :  { %v1985_v5 = vpop.f32.mrf.mxu1  ;;  %v1756_v31 = vpop.f32.mrf.mxu0 }
 0x1c4   :  { %v6228_v32 = vadd.f32 %v1985_v5, %v1753_v8  ;;  %v1757_v22 = vadd.f32 %v1756_v31, %v5837_v60 }
 0x1c5   :  { %v1989_v24 = vpop.f32.mrf.mxu1  ;;  %v1758_v41 = vpop.f32.mrf.mxu0 }
 0x1c6   :  { %v6231_v37 = vadd.f32 %v1989_v24, %v1757_v22  ;;  %v1759_v30 = vadd.f32 %v1758_v41, %v5850_v49 }
 0x1c7   :  { %v1991_v33 = vpop.f32.mrf.mxu1  ;;  %v1762_v15 = vpop.f32.mrf.mxu0 }
 0x1c8   :  { %v6234_v43 = vadd.f32 %v1991_v33, %v1759_v30  ;;  %v1763_v2 = vadd.f32 %v1762_v15, %v5861_v4 }
 0x1c9   :  { %v1995_v48 = vpop.f32.mrf.mxu1  ;;  %v1764_v18 = vpop.f32.mrf.mxu0 }
 0x1ca   :  { %v6237_v54 = vadd.f32 %v1995_v48, %v1763_v2  ;;  %v1765_v42 = vadd.f32 %v1764_v18, %v5874_v25  ;;  %v7387_v48 = vld [vmem:[#allocation2_spill] sm:$0xff] }
 0x1cb   :  { %v1997_v14 = vpop.f32.mrf.mxu1  ;;  %v1768_v60 = vpop.f32.mrf.mxu0 }
 0x1cc   :  { %v6240_v59 = vadd.f32 %v1997_v14, %v1765_v42  ;;  %v1769_v6 = vadd.f32 %v1768_v60, %v5892_v50  ;;  %v7388_v60 = vld [vmem:[#allocation3_spill] sm:$0xff] }
 0x1cd   :  { %v2001_v16 = vpop.f32.mrf.mxu1  ;;  %v1770_v49 = vpop.f32.mrf.mxu0 }
 0x1ce   :  { %v6243_v8 = vadd.f32 %v2001_v16, %v1769_v6  ;;  %v1771_v5 = vadd.f32 %v1770_v49, %v5900_v7 }
 0x1cf   :  { %v2003_v31 = vpop.f32.mrf.mxu1  ;;  %v1774_v4 = vpop.f32.mrf.mxu0 }
 0x1d0   :  { %v6246_v22 = vadd.f32 %v2003_v31, %v1771_v5  ;;  %v1775_v24 = vadd.f32 %v1774_v4, %v5910_v28  ;;  %v7390_v5 = vld [vmem:[#allocation4_spill] sm:$0xff] }
 0x1d1   :  { %v2007_v41 = vpop.f32.mrf.mxu1  ;;  %v1776_v25 = vpop.f32.mrf.mxu0 }
 0x1d2   :  { %v6249_v30 = vadd.f32 %v2007_v41, %v1775_v24  ;;  %v1777_v33 = vadd.f32 %v1776_v25, %v5918_v40  ;;  %v7392_v41 = vld [vmem:[#allocation5_spill] sm:$0xff] }
 0x1d3   :  { %v2009_v15 = vpop.f32.mrf.mxu1  ;;  %v1780_v50 = vpop.f32.mrf.mxu0 }
 0x1d4   :  { %v6252_v2 = vadd.f32 %v2009_v15, %v1777_v33  ;;  %v1781_v18 = vadd.f32 %v1780_v50, %v7387_v48  ;;  %v7394_v48 = vld [vmem:[#allocation6_spill] sm:$0xff] }
 0x1d5   :  { %v2013_v42 = vpop.f32.mrf.mxu1  ;;  %v1782_v7 = vpop.f32.mrf.mxu0 }
 0x1d6   :  { %v6255_v14 = vadd.f32 %v2013_v42, %v1781_v18  ;;  %v1783_v6 = vadd.f32 %v1782_v7, %v7388_v60 }
 0x1d7   :  { %v2015_v16 = vpop.f32.mrf.mxu1  ;;  %v1786_v28 = vpop.f32.mrf.mxu0 }
 0x1d8   :  { %v6258_v49 = vadd.f32 %v2015_v16, %v1783_v6  ;;  %v1787_v31 = vadd.f32 %v1786_v28, %v7390_v5  ;;  %v7396_v6 = vld [vmem:[#allocation7_spill] sm:$0xff] }
 0x1d9   :  { %v2019_v4 = vpop.f32.mrf.mxu1  ;;  %v1788_v40 = vpop.f32.mrf.mxu0 }
 0x1da   :  { %7389 = vst [vmem:[#allocation2_spill] sm:$0xff] %v6258_v49  ;;  %v6261_v24 = vadd.f32 %v2019_v4, %v1787_v31  ;;  %v1789_v25 = vadd.f32 %v1788_v40, %v7392_v41  ;;  %v7398_v31 = vld [vmem:[#allocation8_spill] sm:$0xff] }
 0x1db   :  { %v2021_v33 = vpop.f32.mrf.mxu1  ;;  %v1792_v15 = vpop.f32.mrf.mxu0 }
 0x1dc   :  { %7391 = vst [vmem:[#allocation3_spill] sm:$0xff] %v6261_v24  ;;  %v6264_v50 = vadd.f32 %v2021_v33, %v1789_v25  ;;  %v1793_v18 = vadd.f32 %v1792_v15, %v7394_v48  ;;  %v7400_v25 = vld [vmem:[#allocation9_spill] sm:$0xff] }
 0x1dd   :  { %v2025_v42 = vpop.f32.mrf.mxu1  ;;  %v1794_v7 = vpop.f32.mrf.mxu0 }
 0x1de   :  { %7393 = vst [vmem:[#allocation4_spill] sm:$0xff] %v6264_v50  ;;  %v6267_v60 = vadd.f32 %v2025_v42, %v1793_v18  ;;  %v1795_v16 = vadd.f32 %v1794_v7, %v7396_v6  ;;  %v7401_v18 = vld [vmem:[#allocation10_spill] sm:$0xff] }
 0x1df   :  { %v2027_v49 = vpop.f32.mrf.mxu1  ;;  %v1798_v28 = vpop.f32.mrf.mxu0 }
 0x1e0   :  { %7395 = vst [vmem:[#allocation5_spill] sm:$0xff] %v6267_v60  ;;  %v6270_v5 = vadd.f32 %v2027_v49, %v1795_v16  ;;  %v1799_v4 = vadd.f32 %v1798_v28, %v7398_v31  ;;  %v7403_v49 = vld [vmem:[#allocation11_spill] sm:$0xff] }
 0x1e1   :  { %v2031_v24 = vpop.f32.mrf.mxu1  ;;  %v1800_v40 = vpop.f32.mrf.mxu0 }
 0x1e2   :  { %7397 = vst [vmem:[#allocation6_spill] sm:$0xff] %v6270_v5  ;;  %v6273_v41 = vadd.f32 %v2031_v24, %v1799_v4  ;;  %v1801_v33 = vadd.f32 %v1800_v40, %v7400_v25  ;;  %v7404_v24 = vld [vmem:[#allocation12_spill] sm:$0xff] }
 0x1e3   :  { %v2033_v50 = vpop.f32.mrf.mxu1  ;;  %v1804_v15 = vpop.f32.mrf.mxu0 }
 0x1e4   :  { %7399 = vst [vmem:[#allocation7_spill] sm:$0xff] %v6273_v41  ;;  %v6276_v48 = vadd.f32 %v2033_v50, %v1801_v33  ;;  %v1805_v42 = vadd.f32 %v1804_v15, %v7401_v18 }
 0x1e5   :  { %v2037_v60 = vpop.f32.mrf.mxu1  ;;  %v1806_v7 = vpop.f32.mrf.mxu0 }
 0x1e6   :  { %v6279_v6 = vadd.f32 %v2037_v60, %v1805_v42  ;;  %v1807_v16 = vadd.f32 %v1806_v7, %v7403_v49  ;;  %v7406_v60 = vld [vmem:[#allocation13_spill] sm:$0xff] }
 0x1e7   :  { %v2039_v5 = vpop.f32.mrf.mxu1  ;;  %v1810_v28 = vpop.f32.mrf.mxu0 }
 0x1e8   :  { %7402 = vst [vmem:[#allocation8_spill] sm:$0xff] %v6279_v6  ;;  %v6282_v31 = vadd.f32 %v2039_v5, %v1807_v16  ;;  %v1811_v4 = vadd.f32 %v1810_v28, %v7404_v24 }
 0x1e9   :  { %v2043_v41 = vpop.f32.mrf.mxu1  ;;  %v1812_v40 = vpop.f32.mrf.mxu0 }
 0x1ea   :  { %v6285_v25 = vadd.f32 %v2043_v41, %v1811_v4  ;;  %v1813_v50 = vadd.f32 %v1812_v40, %v6034_v46 }
 0x1eb   :  { %v2045_v33 = vpop.f32.mrf.mxu1  ;;  %v2114_v15 = vpop.f32.mrf.mxu0 }
 0x1ec   :  { %7405 = vst [vmem:[#allocation9_spill] sm:$0xff] %v6285_v25  ;;  %v6288_v18 = vadd.f32 %v2045_v33, %v1813_v50  ;;  %v2115_v42 = vadd.f32 %v2114_v15, %v7406_v60 }
 0x1ed   :  { %v2347_v6 = vpop.f32.mrf.mxu1  ;;  %v2116_v7 = vpop.f32.mrf.mxu0 }
 0x1ee   :  { %v2117_v49 = vadd.f32 %v2116_v7, %v6055_v58  ;;  %v6294_v24 = vadd.f32 %v2347_v6, %v2115_v42 }
 0x1ef   :  { %v2349_v5 = vpop.f32.mrf.mxu1  ;;  %v2120_v16 = vpop.f32.mrf.mxu0 }
 0x1f0   :  { %v6292_v28 = vadd.f32 %v2349_v5, %v2117_v49  ;;  %v2121_v41 = vadd.f32 %v2120_v16, %v6067_v34 }
 0x1f1   :  { %v2353_v46 = vpop.f32.mrf.mxu1  ;;  %v2122_v4 = vpop.f32.mrf.mxu0 }
 0x1f2   :  { %v2123_v40 = vadd.f32 %v2122_v4, %v6075_v63  ;;  %v2515_v50 = vsel %vm2514_vm1, %v6292_v28, 0.0  ;;  %v6303_v7 = vadd.f32 %v2353_v46, %v2121_v41 }
 0x1f3   :  { %v2355_v33 = vpop.f32.mrf.mxu1  ;;  %v2126_v15 = vpop.f32.mrf.mxu0  ;;  %v2516_v58 = vadd.f32 %v2515_v50, %v6294_v24 }
 0x1f4   :  { %v6301_v60 = vadd.f32 %v2355_v33, %v2123_v40  ;;  %v2127_v6 = vadd.f32 %v2126_v15, %v6087_v29 }
 0x1f5   :  { %v2359_v42 = vpop.f32.mrf.mxu1  ;;  %v2128_v49 = vpop.f32.mrf.mxu0  ;;  %2517 = vadd.xlane.f32.xlu0 %v2516_v58 }
 0x1f6   :  { %v2129_v34 = vadd.f32 %v2128_v49, %v6095_v56  ;;  %v2519_v63 = vsel %vm2514_vm1, %v6301_v60, 0.0  ;;  %v6312_v40 = vadd.f32 %v2359_v42, %v2127_v6 }
 0x1f7   :  { %v2361_v5 = vpop.f32.mrf.mxu1  ;;  %v2132_v16 = vpop.f32.mrf.mxu0  ;;  %v2520_v4 = vadd.f32 %v2519_v63, %v6303_v7 }
 0x1f8   :  { %v6310_v25 = vadd.f32 %v2361_v5, %v2129_v34  ;;  %v2133_v41 = vadd.f32 %v2132_v16, %v6107_v47 }
 0x1f9   :  { %v2365_v46 = vpop.f32.mrf.mxu1  ;;  %v2134_v29 = vpop.f32.mrf.mxu0  ;;  %2521 = vadd.xlane.f32.xlu0 %v2520_v4 }
 0x1fa   :  { %v2135_v50 = vadd.f32 %v2134_v29, %v6115_v61  ;;  %v2523_v56 = vsel %vm2514_vm1, %v6310_v25, 0.0  ;;  %v6321_v34 = vadd.f32 %v2365_v46, %v2133_v41 }
 0x1fb   :  { %v2367_v33 = vpop.f32.mrf.mxu1  ;;  %v2138_v15 = vpop.f32.mrf.mxu0  ;;  %v2524_v58 = vadd.f32 %v2523_v56, %v6312_v40 }
 0x1fc   :  { %v6319_v49 = vadd.f32 %v2367_v33, %v2135_v50  ;;  %v2139_v6 = vadd.f32 %v2138_v15, %v6127_v0 }
 0x1fd   :  { %v2371_v42 = vpop.f32.mrf.mxu1  ;;  %v2140_v47 = vpop.f32.mrf.mxu0  ;;  %2525 = vadd.xlane.f32.xlu1 %v2524_v58 }
 0x1fe   :  { %v2141_v63 = vadd.f32 %v2140_v47, %v6135_v12  ;;  %v2527_v61 = vsel %vm2514_vm1, %v6319_v49, 0.0  ;;  %v6330_v50 = vadd.f32 %v2371_v42, %v2139_v6 }
 0x1ff   :  { %v2373_v5 = vpop.f32.mrf.mxu1  ;;  %v2144_v16 = vpop.f32.mrf.mxu0  ;;  %v2528_v4 = vadd.f32 %v2527_v61, %v6321_v34 }
 0x200   :  { %v6328_v29 = vadd.f32 %v2373_v5, %v2141_v63  ;;  %v2145_v41 = vadd.f32 %v2144_v16, %v6144_v55 }
 0x201   :  { %v2377_v46 = vpop.f32.mrf.mxu1  ;;  %v2146_v0 = vpop.f32.mrf.mxu0  ;;  %2529 = vadd.xlane.f32.xlu1 %v2528_v4 }
 0x202   :  { %v2147_v56 = vadd.f32 %v2146_v0, %v6152_v27  ;;  %v2531_v12 = vsel %vm2514_vm1, %v6328_v29, 0.0  ;;  %v6339_v63 = vadd.f32 %v2377_v46, %v2145_v41 }
 0x203   :  { %v2379_v33 = vpop.f32.mrf.mxu1  ;;  %v2150_v15 = vpop.f32.mrf.mxu0  ;;  %v2532_v58 = vadd.f32 %v2531_v12, %v6330_v50 }
 0x204   :  { %v6337_v47 = vadd.f32 %v2379_v33, %v2147_v56  ;;  %v2151_v6 = vadd.f32 %v2150_v15, %v6157_v9 }
 0x205   :  { %v2383_v42 = vpop.f32.mrf.mxu1  ;;  %v2152_v55 = vpop.f32.mrf.mxu0  ;;  %2533 = vadd.xlane.f32.xlu0 %v2532_v58 }
 0x206   :  { %v2153_v61 = vadd.f32 %v2152_v55, %v6161_v26  ;;  %v2535_v27 = vsel %vm2514_vm1, %v6337_v47, 0.0  ;;  %v6348_v56 = vadd.f32 %v2383_v42, %v2151_v6 }
 0x207   :  { %v2385_v5 = vpop.f32.mrf.mxu1  ;;  %v2156_v16 = vpop.f32.mrf.mxu0  ;;  %v2536_v4 = vadd.f32 %v2535_v27, %v6339_v63 }
 0x208   :  { %v6346_v0 = vadd.f32 %v2385_v5, %v2153_v61  ;;  %v2157_v41 = vadd.f32 %v2156_v16, %v6165_v45 }
 0x209   :  { %v2389_v46 = vpop.f32.mrf.mxu1  ;;  %v2158_v9 = vpop.f32.mrf.mxu0  ;;  %2537 = vadd.xlane.f32.xlu1 %v2536_v4 }
 0x20a   :  { %v2159_v12 = vadd.f32 %v2158_v9, %v6168_v17  ;;  %v2539_v26 = vsel %vm2514_vm1, %v6346_v0, 0.0  ;;  %v6357_v61 = vadd.f32 %v2389_v46, %v2157_v41 }
 0x20b   :  { %v2391_v33 = vpop.f32.mrf.mxu1  ;;  %v2162_v15 = vpop.f32.mrf.mxu0  ;;  %v2540_v58 = vadd.f32 %v2539_v26, %v6348_v56 }
 0x20c   :  { %v6355_v55 = vadd.f32 %v2391_v33, %v2159_v12  ;;  %v2163_v6 = vadd.f32 %v2162_v15, %v6171_v38 }
 0x20d   :  { %v2395_v42 = vpop.f32.mrf.mxu1  ;;  %v2164_v45 = vpop.f32.mrf.mxu0  ;;  %2541 = vadd.xlane.f32.xlu0 %v2540_v58 }
 0x20e   :  { %v2165_v27 = vadd.f32 %v2164_v45, %v6174_v20  ;;  %v2543_v17 = vsel %vm2514_vm1, %v6355_v55, 0.0  ;;  %v6366_v12 = vadd.f32 %v2395_v42, %v2163_v6 }
 0x20f   :  { %v2397_v5 = vpop.f32.mrf.mxu1  ;;  %v2168_v16 = vpop.f32.mrf.mxu0  ;;  %v2544_v4 = vadd.f32 %v2543_v17, %v6357_v61 }
 0x210   :  { %v6364_v9 = vadd.f32 %v2397_v5, %v2165_v27  ;;  %v2169_v41 = vadd.f32 %v2168_v16, %v6177_v39 }
 0x211   :  { %v2401_v46 = vpop.f32.mrf.mxu1  ;;  %v2170_v38 = vpop.f32.mrf.mxu0  ;;  %2545 = vadd.xlane.f32.xlu1 %v2544_v4 }
 0x212   :  { %v2171_v26 = vadd.f32 %v2170_v38, %v6180_v3  ;;  %v2547_v20 = vsel %vm2514_vm1, %v6364_v9, 0.0  ;;  %v6375_v27 = vadd.f32 %v2401_v46, %v2169_v41 }
 0x213   :  { %v2403_v33 = vpop.f32.mrf.mxu1  ;;  %v2174_v15 = vpop.f32.mrf.mxu0  ;;  %v2548_v58 = vadd.f32 %v2547_v20, %v6366_v12 }
 0x214   :  { %v6373_v45 = vadd.f32 %v2403_v33, %v2171_v26  ;;  %v2175_v6 = vadd.f32 %v2174_v15, %v6183_v62 }
 0x215   :  { %v2407_v42 = vpop.f32.mrf.mxu1  ;;  %v2176_v39 = vpop.f32.mrf.mxu0  ;;  %2549 = vadd.xlane.f32.xlu0 %v2548_v58 }
 0x216   :  { %v2177_v17 = vadd.f32 %v2176_v39, %v6186_v52  ;;  %v2551_v3 = vsel %vm2514_vm1, %v6373_v45, 0.0  ;;  %v6384_v26 = vadd.f32 %v2407_v42, %v2175_v6 }
 0x217   :  { %v2409_v5 = vpop.f32.mrf.mxu1  ;;  %v2180_v16 = vpop.f32.mrf.mxu0  ;;  %v2552_v4 = vadd.f32 %v2551_v3, %v6375_v27 }
 0x218   :  { %v6382_v38 = vadd.f32 %v2409_v5, %v2177_v17  ;;  %v2181_v41 = vadd.f32 %v2180_v16, %v6189_v51 }
 0x219   :  { %v2413_v46 = vpop.f32.mrf.mxu1  ;;  %v2182_v62 = vpop.f32.mrf.mxu0  ;;  %2553 = vadd.xlane.f32.xlu1 %v2552_v4 }
 0x21a   :  { %v2183_v20 = vadd.f32 %v2182_v62, %v6192_v21  ;;  %v2555_v52 = vsel %vm2514_vm1, %v6382_v38, 0.0  ;;  %v6393_v17 = vadd.f32 %v2413_v46, %v2181_v41 }
 0x21b   :  { %v2415_v33 = vpop.f32.mrf.mxu1  ;;  %v2186_v15 = vpop.f32.mrf.mxu0  ;;  %v2556_v58 = vadd.f32 %v2555_v52, %v6384_v26 }
 0x21c   :  { %v6391_v39 = vadd.f32 %v2415_v33, %v2183_v20  ;;  %v2187_v6 = vadd.f32 %v2186_v15, %v6195_v1 }
 0x21d   :  { %v2419_v42 = vpop.f32.mrf.mxu1  ;;  %v2188_v51 = vpop.f32.mrf.mxu0  ;;  %2557 = vadd.xlane.f32.xlu0 %v2556_v58 }
 0x21e   :  { %v2189_v3 = vadd.f32 %v2188_v51, %v6198_v57  ;;  %v2559_v21 = vsel %vm2514_vm1, %v6391_v39, 0.0  ;;  %v6402_v20 = vadd.f32 %v2419_v42, %v2187_v6 }
 0x21f   :  { %v2421_v5 = vpop.f32.mrf.mxu1  ;;  %v2192_v16 = vpop.f32.mrf.mxu0  ;;  %v2560_v4 = vadd.f32 %v2559_v21, %v6393_v17 }
 0x220   :  { %v6400_v62 = vadd.f32 %v2421_v5, %v2189_v3  ;;  %v2193_v41 = vadd.f32 %v2192_v16, %v6201_v23 }
 0x221   :  { %v2425_v46 = vpop.f32.mrf.mxu1  ;;  %v2194_v1 = vpop.f32.mrf.mxu0  ;;  %2561 = vadd.xlane.f32.xlu1 %v2560_v4 }
 0x222   :  { %v2195_v52 = vadd.f32 %v2194_v1, %v6204_v44  ;;  %v2563_v57 = vsel %vm2514_vm1, %v6400_v62, 0.0  ;;  %v6411_v3 = vadd.f32 %v2425_v46, %v2193_v41 }
 0x223   :  { %v2427_v33 = vpop.f32.mrf.mxu1  ;;  %v2198_v15 = vpop.f32.mrf.mxu0  ;;  %v2564_v58 = vadd.f32 %v2563_v57, %v6402_v20 }
 0x224   :  { %v6409_v51 = vadd.f32 %v2427_v33, %v2195_v52  ;;  %v2199_v6 = vadd.f32 %v2198_v15, %v6207_v11 }
 0x225   :  { %v2431_v42 = vpop.f32.mrf.mxu1  ;;  %v2200_v23 = vpop.f32.mrf.mxu0  ;;  %2565 = vadd.xlane.f32.xlu0 %v2564_v58 }
 0x226   :  { %v2201_v21 = vadd.f32 %v2200_v23, %v6210_v53  ;;  %v2567_v44 = vsel %vm2514_vm1, %v6409_v51, 0.0  ;;  %v6420_v52 = vadd.f32 %v2431_v42, %v2199_v6 }
 0x227   :  { %v2433_v5 = vpop.f32.mrf.mxu1  ;;  %v2204_v16 = vpop.f32.mrf.mxu0  ;;  %v2568_v4 = vadd.f32 %v2567_v44, %v6411_v3 }
 0x228   :  { %v6418_v1 = vadd.f32 %v2433_v5, %v2201_v21  ;;  %v2205_v41 = vadd.f32 %v2204_v16, %v6213_v10 }
 0x229   :  { %v2437_v46 = vpop.f32.mrf.mxu1  ;;  %v2206_v11 = vpop.f32.mrf.mxu0  ;;  %2569 = vadd.xlane.f32.xlu1 %v2568_v4 }
 0x22a   :  { %v2207_v57 = vadd.f32 %v2206_v11, %v6216_v35  ;;  %v2571_v53 = vsel %vm2514_vm1, %v6418_v1, 0.0  ;;  %v6429_v21 = vadd.f32 %v2437_v46, %v2205_v41 }
 0x22b   :  { %v2439_v33 = vpop.f32.mrf.mxu1  ;;  %v2210_v15 = vpop.f32.mrf.mxu0  ;;  %v2572_v58 = vadd.f32 %v2571_v53, %v6420_v52 }
 0x22c   :  { %v6427_v23 = vadd.f32 %v2439_v33, %v2207_v57  ;;  %v2211_v6 = vadd.f32 %v2210_v15, %v6219_v19 }
 0x22d   :  { %v2443_v42 = vpop.f32.mrf.mxu1  ;;  %v2212_v10 = vpop.f32.mrf.mxu0  ;;  %2573 = vadd.xlane.f32.xlu0 %v2572_v58 }
 0x22e   :  { %v2213_v44 = vadd.f32 %v2212_v10, %v6222_v13  ;;  %v2575_v35 = vsel %vm2514_vm1, %v6427_v23, 0.0  ;;  %v6438_v57 = vadd.f32 %v2443_v42, %v2211_v6 }
 0x22f   :  { %v2445_v5 = vpop.f32.mrf.mxu1  ;;  %v2216_v16 = vpop.f32.mrf.mxu0  ;;  %v2576_v4 = vadd.f32 %v2575_v35, %v6429_v21 }
 0x230   :  { %v6436_v11 = vadd.f32 %v2445_v5, %v2213_v44  ;;  %v2217_v41 = vadd.f32 %v2216_v16, %v6225_v36 }
 0x231   :  { %v2449_v46 = vpop.f32.mrf.mxu1  ;;  %v2218_v19 = vpop.f32.mrf.mxu0  ;;  %2577 = vadd.xlane.f32.xlu1 %v2576_v4 }
 0x232   :  { %v2219_v53 = vadd.f32 %v2218_v19, %v6228_v32  ;;  %v2579_v13 = vsel %vm2514_vm1, %v6436_v11, 0.0  ;;  %v6447_v44 = vadd.f32 %v2449_v46, %v2217_v41 }
 0x233   :  { %v2451_v33 = vpop.f32.mrf.mxu1  ;;  %v2222_v15 = vpop.f32.mrf.mxu0  ;;  %v2580_v58 = vadd.f32 %v2579_v13, %v6438_v57 }
 0x234   :  { %v6445_v10 = vadd.f32 %v2451_v33, %v2219_v53  ;;  %v2223_v6 = vadd.f32 %v2222_v15, %v6231_v37 }
 0x235   :  { %v2455_v42 = vpop.f32.mrf.mxu1  ;;  %v2224_v36 = vpop.f32.mrf.mxu0  ;;  %2581 = vadd.xlane.f32.xlu0 %v2580_v58 }
 0x236   :  { %v2225_v35 = vadd.f32 %v2224_v36, %v6234_v43  ;;  %v2583_v32 = vsel %vm2514_vm1, %v6445_v10, 0.0  ;;  %v6456_v53 = vadd.f32 %v2455_v42, %v2223_v6 }
 0x237   :  { %v2457_v5 = vpop.f32.mrf.mxu1  ;;  %v2228_v16 = vpop.f32.mrf.mxu0  ;;  %v2584_v4 = vadd.f32 %v2583_v32, %v6447_v44 }
 0x238   :  { %v6454_v19 = vadd.f32 %v2457_v5, %v2225_v35  ;;  %v2229_v41 = vadd.f32 %v2228_v16, %v6237_v54 }
 0x239   :  { %v2461_v46 = vpop.f32.mrf.mxu1  ;;  %v2230_v37 = vpop.f32.mrf.mxu0  ;;  %2585 = vadd.xlane.f32.xlu1 %v2584_v4 }
 0x23a   :  { %v2231_v13 = vadd.f32 %v2230_v37, %v6240_v59  ;;  %v2587_v43 = vsel %vm2514_vm1, %v6454_v19, 0.0  ;;  %v6465_v35 = vadd.f32 %v2461_v46, %v2229_v41 }
 0x23b   :  { %v2463_v33 = vpop.f32.mrf.mxu1  ;;  %v2234_v15 = vpop.f32.mrf.mxu0  ;;  %v2588_v58 = vadd.f32 %v2587_v43, %v6456_v53 }
 0x23c   :  { %v6463_v36 = vadd.f32 %v2463_v33, %v2231_v13  ;;  %v2235_v6 = vadd.f32 %v2234_v15, %v6243_v8 }
 0x23d   :  { %v2467_v42 = vpop.f32.mrf.mxu1  ;;  %v2236_v54 = vpop.f32.mrf.mxu0  ;;  %2589 = vadd.xlane.f32.xlu0 %v2588_v58 }
 0x23e   :  { %v2237_v32 = vadd.f32 %v2236_v54, %v6246_v22  ;;  %v2591_v59 = vsel %vm2514_vm1, %v6463_v36, 0.0  ;;  %v6474_v13 = vadd.f32 %v2467_v42, %v2235_v6 }
 0x23f   :  { %v2469_v5 = vpop.f32.mrf.mxu1  ;;  %v2240_v16 = vpop.f32.mrf.mxu0  ;;  %v2592_v4 = vadd.f32 %v2591_v59, %v6465_v35  ;;  %v7411_v59 = vld [vmem:[#allocation2_spill] sm:$0xff] }
 0x240   :  { %v6472_v37 = vadd.f32 %v2469_v5, %v2237_v32  ;;  %7408 = vst [vmem:[#allocation11_spill] sm:$0xff] %v6474_v13  ;;  %v2241_v41 = vadd.f32 %v2240_v16, %v6249_v30 }
 0x241   :  { %v2473_v46 = vpop.f32.mrf.mxu1  ;;  %v2242_v8 = vpop.f32.mrf.mxu0  ;;  %2593 = vadd.xlane.f32.xlu1 %v2592_v4 }
 0x242   :  { %7407 = vst [vmem:[#allocation10_spill] sm:$0xff] %v6472_v37  ;;  %v2243_v43 = vadd.f32 %v2242_v8, %v6252_v2  ;;  %v2595_v22 = vsel %vm2514_vm1, %v6472_v37, 0.0  ;;  %v6483_v32 = vadd.f32 %v2473_v46, %v2241_v41  ;;  %v7413_v41 = vld [vmem:[#allocation3_spill] sm:$0xff] }
 0x243   :  { %v2475_v33 = vpop.f32.mrf.mxu1  ;;  %v2246_v15 = vpop.f32.mrf.mxu0  ;;  %v2596_v58 = vadd.f32 %v2595_v22, %v6474_v13 }
 0x244   :  { %v6481_v54 = vadd.f32 %v2475_v33, %v2243_v43  ;;  %7410 = vst [vmem:[#allocation13_spill] sm:$0xff] %v6483_v32  ;;  %v2247_v6 = vadd.f32 %v2246_v15, %v6255_v14  ;;  %v7414_v33 = vld [vmem:[#allocation4_spill] sm:$0xff] }
 0x245   :  { %v2479_v42 = vpop.f32.mrf.mxu1  ;;  %v2248_v30 = vpop.f32.mrf.mxu0  ;;  %2597 = vadd.xlane.f32.xlu0 %v2596_v58 }
 0x246   :  { %7409 = vst [vmem:[#allocation12_spill] sm:$0xff] %v6481_v54  ;;  %v2249_v5 = vadd.f32 %v2248_v30, %v7411_v59  ;;  %v2599_v2 = vsel %vm2514_vm1, %v6481_v54, 0.0  ;;  %v6492_v43 = vadd.f32 %v2479_v42, %v2247_v6  ;;  %v7416_v6 = vld [vmem:[#allocation5_spill] sm:$0xff] }
 0x247   :  { %v2481_v16 = vpop.f32.mrf.mxu1  ;;  %v2252_v4 = vpop.f32.mrf.mxu0  ;;  %v2600_v8 = vadd.f32 %v2599_v2, %v6483_v32 }
 0x248   :  { %v6490_v37 = vadd.f32 %v2481_v16, %v2249_v5  ;;  %v2253_v46 = vadd.f32 %v2252_v4, %v7413_v41  ;;  %v7417_v4 = vld [vmem:[#allocation6_spill] sm:$0xff] }
 0x249   :  { %v2485_v22 = vpop.f32.mrf.mxu1  ;;  %v2254_v14 = vpop.f32.mrf.mxu0  ;;  %2601 = vadd.xlane.f32.xlu1 %v2600_v8 }
 0x24a   :  { %7412 = vst [vmem:[#allocation2_spill] sm:$0xff] %v6490_v37  ;;  %v2255_v15 = vadd.f32 %v2254_v14, %v7414_v33  ;;  %v2603_v58 = vsel %vm2514_vm1, %v6490_v37, 0.0  ;;  %v6501_v5 = vadd.f32 %v2485_v22, %v2253_v46  ;;  %v7418_v46 = vld [vmem:[#allocation7_spill] sm:$0xff] }
 0x24b   :  { %v2487_v30 = vpop.f32.mrf.mxu1  ;;  %v2258_v59 = vpop.f32.mrf.mxu0  ;;  %v2604_v54 = vadd.f32 %v2603_v58, %v6492_v43 }
 0x24c   :  { %v6499_v13 = vadd.f32 %v2487_v30, %v2255_v15  ;;  %v2259_v42 = vadd.f32 %v2258_v59, %v7416_v6 }
 0x24d   :  { %v2491_v2 = vpop.f32.mrf.mxu1  ;;  %v2260_v16 = vpop.f32.mrf.mxu0  ;;  %2605 = vadd.xlane.f32.xlu0 %v2604_v54 }
 0x24e   :  { %7415 = vst [vmem:[#allocation3_spill] sm:$0xff] %v6499_v13  ;;  %v2261_v8 = vadd.f32 %v2260_v16, %v7417_v4  ;;  %v2607_v41 = vsel %vm2514_vm1, %v6499_v13, 0.0  ;;  %v6510_v15 = vadd.f32 %v2491_v2, %v2259_v42  ;;  %v7419_v42 = vld [vmem:[#allocation8_spill] sm:$0xff] }
 0x24f   :  { %v2493_v14 = vpop.f32.mrf.mxu1  ;;  %v2264_v33 = vpop.f32.mrf.mxu0  ;;  %v2608_v37 = vadd.f32 %v2607_v41, %v6501_v5 }
 0x250   :  { %v6508_v32 = vadd.f32 %v2493_v14, %v2261_v8  ;;  %v2265_v22 = vadd.f32 %v2264_v33, %v7418_v46  ;;  %v6522_v33 = vpop.permute.xlu0 %3250 }
 0x251   :  { %v2497_v58 = vpop.f32.mrf.mxu1  ;;  %v2266_v30 = vpop.f32.mrf.mxu0  ;;  %2609 = vadd.xlane.f32.xlu1 %v2608_v37  ;;  %7420 = vst [vmem:[#allocation4_spill] sm:$0xff] %v6522_v33 }
 0x252   :  { %v2267_v54 = vadd.f32 %v2266_v30, %v6276_v48  ;;  %v2611_v59 = vsel %vm2514_vm1, %v6508_v32, 0.0  ;;  %v6519_v8 = vadd.f32 %v2497_v58, %v2265_v22 }
 0x253   :  { %v2499_v6 = vpop.f32.mrf.mxu1  ;;  %v2270_v16 = vpop.f32.mrf.mxu0  ;;  %v2612_v4 = vadd.f32 %v2611_v59, %v6510_v15 }
 0x254   :  { %v6517_v13 = vadd.f32 %v2499_v6, %v2267_v54  ;;  %v2271_v2 = vadd.f32 %v2270_v16, %v7419_v42  ;;  %v6528_v59 = vpop.permute.xlu1 %3245  ;;  %v6537_v16 = vpop.permute.xlu0 %3260 }
 0x255   :  { %v2272_v41 = vpop.f32.mrf.mxu0  ;;  %v2503_v14 = vpop.f32.mrf.mxu1  ;;  %2613 = vadd.xlane.f32.xlu0 %v2612_v4  ;;  %7421 = vst [vmem:[#allocation5_spill] sm:$0xff] %v6528_v59  ;;  %7424 = vst [vmem:[#allocation8_spill] sm:$0xff] %v6537_v16 }
 0x256   :  { %v2273_v48 = vadd.f32 %v2272_v41, %v6282_v31  ;;  %v2615_v37 = vsel %vm2514_vm1, %v6517_v13, 0.0  ;;  %v6532_v22 = vadd.f32 %v2503_v14, %v2271_v2  ;;  %v3231_v2 = vld [vmem:[%s7332_s4 + $0x80] sm:$0xff] }
 0x257   :  { %v2505_v46 = vpop.f32.mrf.mxu1  ;;  %v2616_v30 = vadd.f32 %v2615_v37, %v6519_v8 }
 0x258   :  { %v6530_v54 = vadd.f32 %v2505_v46, %v2273_v48  ;;  %7423 = vst [vmem:[#allocation7_spill] sm:$0xff] %v6532_v22  ;;  %v6539_v31 = vpop.permute.xlu1 %3255  ;;  %v6541_v4 = vpop.permute.xlu0 %3270  ;;  %v3230_v46 = vld [vmem:[%s7332_s4 + $0x78] sm:$0xff] }
 0x259   :  { %2617 = vadd.xlane.f32.xlu1 %v2616_v30  ;;  %7425 = vst [vmem:[#allocation14_spill] sm:$0xff] %v6539_v31  ;;  %7426 = vst [vmem:[#allocation15_spill] sm:$0xff] %v6541_v4 }
 0x25a   :  { %7422 = vst [vmem:[#allocation6_spill] sm:$0xff] %v6530_v54  ;;  %v2619_v58 = vsel %vm2514_vm1, %v6530_v54, 0.0 }
 0x25b   :  { %v2620_v6 = vadd.f32 %v2619_v58, %v6532_v22 }
 0x25c   :  { %v6543_v42 = vpop.permute.xlu1 %3265  ;;  %v6548_v41 = vpop.permute.xlu0 %3280 }
 0x25d   :  { %2621 = vadd.xlane.f32.xlu0 %v2620_v6  ;;  %7427 = vst [vmem:[#allocation16_spill] sm:$0xff] %v6543_v42  ;;  %7428 = vst [vmem:[#allocation17_spill] sm:$0xff] %v6548_v41  ;;  %v2276_v6 = vpop.f32.mrf.mxu0 }
 0x260   :  { %v6550_v14 = vpop.permute.xlu1 %3275  ;;  %v6552_v48 = vpop.permute.xlu0 %3290 }
 0x261   :  { %7429 = vst [vmem:[#allocation18_spill] sm:$0xff] %v6550_v14  ;;  %7430 = vst [vmem:[#allocation19_spill] sm:$0xff] %v6552_v48  ;;  %v2278_v14 = vpop.f32.mrf.mxu0 }
 0x262   :  { %v2279_v48 = vadd.f32 %v2278_v14, %v6288_v18 }
 0x264   :  { %v6554_v37 = vpop.permute.xlu1 %3285  ;;  %v6559_v30 = vpop.permute.xlu0 %3300 }
 0x265   :  { %7431 = vst [vmem:[#allocation20_spill] sm:$0xff] %v6554_v37  ;;  %7432 = vst [vmem:[#allocation21_spill] sm:$0xff] %v6559_v30  ;;  %v7437_v30 = vld [vmem:[#allocation9_spill] sm:$0xff] }
 0x268   :  { %v6561_v58 = vpop.permute.xlu1 %3295  ;;  %v6563_v4 = vpop.permute.xlu0 %3310 }
 0x269   :  { %7433 = vst [vmem:[#allocation22_spill] sm:$0xff] %v6561_v58  ;;  %7434 = vst [vmem:[#allocation23_spill] sm:$0xff] %v6563_v4  ;;  %v2277_v4 = vadd.f32 %v2276_v6, %v7437_v30 }
 0x26a   :  { %3325 = vperm.xlu1 %3529, %v3231_v2   ;;  %v2509_v2 = vpop.f32.mrf.mxu1 }
 0x26c   :  { %v6565_v41 = vpop.permute.xlu1 %3305  ;;  %v2511_v16 = vpop.f32.mrf.mxu1 }
 0x26d   :  { %7435 = vst [vmem:[#allocation24_spill] sm:$0xff] %v6565_v41  ;;  %v6570_v59 = vadd.f32 %v2511_v16, %v2279_v48  ;;  %v6589_v16 = vadd.f32 %v2509_v2, %v2277_v4 }
 0x270   :  { %v6568_v31 = vpop.permute.xlu1 %3315 }
 0x271   :  { %7436 = vst [vmem:[#allocation25_spill] sm:$0xff] %v6568_v31 }
 0x273   :  { %3320 = vperm.xlu0 %3530, %v3230_v46  }
 0x27e   :  { %v2518_v42 = vpop.xlane.xlu0 %2517 }
 0x27f   :  { %v2627_v37 = vmul.f32 0.0051020407, %v2518_v42 }
 0x281   :  { %v6573_v58 = vsub.f32 %v6292_v28, %v2627_v37  ;;  %v6580_v18 = vsub.f32 %v6294_v24, %v2627_v37 }
 0x282   :  { %v2522_v33 = vpop.xlane.xlu0 %2521 }
 0x283   :  { %v2628_v46 = vmul.f32 0.0051020407, %v2522_v33  ;;  %v2623_v33 = vsel %vm2514_vm1, %v6570_v59, 0.0  ;;  %v2712_v28 = vmul.f32 %v6573_v58, %v6573_v58  ;;  %v2711_v37 = vmul.f32 %v6580_v18, %v6580_v18 }
 0x284   :  { %v2624_v48 = vadd.f32 %v2623_v33, %v6589_v16 }
 0x285   :  { %v6577_v41 = vsub.f32 %v6301_v60, %v2628_v46  ;;  %v6583_v42 = vsub.f32 %v6303_v7, %v2628_v46  ;;  %v2767_v30 = vsel %vm2514_vm1, %v2712_v28, 0.0 }
 0x286   :  { %v2526_v54 = vpop.xlane.xlu1 %2525  ;;  %v2768_v28 = vadd.f32 %v2767_v30, %v2711_v37 }
 0x287   :  { %v2629_v22 = vmul.f32 0.0051020407, %v2526_v54  ;;  %v2714_v60 = vmul.f32 %v6577_v41, %v6577_v41  ;;  %v2713_v4 = vmul.f32 %v6583_v42, %v6583_v42 }
 0x289   :  { %v6592_v14 = vsub.f32 %v6310_v25, %v2629_v22  ;;  %v6598_v7 = vsub.f32 %v6312_v40, %v2629_v22  ;;  %v2771_v2 = vsel %vm2514_vm1, %v2714_v60, 0.0 }
 0x28a   :  { %v2530_v54 = vpop.xlane.xlu1 %2529 }
 0x28b   :  { %v2630_v24 = vmul.f32 0.0051020407, %v2530_v54  ;;  %v2716_v40 = vmul.f32 %v6592_v14, %v6592_v14  ;;  %v2772_v54 = vadd.f32 %v2771_v2, %v2713_v4 }
 0x28d   :  { %v6606_v25 = vsub.f32 %v6321_v34, %v2630_v24  ;;  %v6609_v6 = vsub.f32 %v6319_v49, %v2630_v24  ;;  %v2715_v34 = vmul.f32 %v6598_v7, %v6598_v7 }
 0x28e   :  { %v2534_v22 = vpop.xlane.xlu0 %2533  ;;  %2625 = vadd.xlane.f32.xlu1 %v2624_v48  ;;  %v2775_v48 = vsel %vm2514_vm1, %v2716_v40, 0.0 }
 0x28f   :  { %7438 = vst [vmem:[#allocation9_spill] sm:$0xff] %v6609_v6  ;;  %v2631_v46 = vmul.f32 0.0051020407, %v2534_v22  ;;  %v2718_v33 = vmul.f32 %v6609_v6, %v6609_v6  ;;  %v2717_v49 = vmul.f32 %v6606_v25, %v6606_v25  ;;  %v2776_v4 = vadd.f32 %v2775_v48, %v2715_v34 }
 0x291   :  { %v6621_v24 = vsub.f32 %v6330_v50, %v2631_v46  ;;  %v6624_v60 = vsub.f32 %v6328_v29, %v2631_v46  ;;  %v2779_v22 = vsel %vm2514_vm1, %v2718_v33, 0.0 }
 0x292   :  { %v2538_v31 = vpop.xlane.xlu1 %2537  ;;  %2769 = vadd.xlane.f32.xlu0 %v2768_v28  ;;  %2773 = vadd.xlane.f32.xlu1 %v2772_v54  ;;  %v2780_v2 = vadd.f32 %v2779_v22, %v2717_v49 }
 0x293   :  { %v2632_v37 = vmul.f32 0.0051020407, %v2538_v31  ;;  %v2720_v30 = vmul.f32 %v6624_v60, %v6624_v60  ;;  %v2719_v50 = vmul.f32 %v6621_v24, %v6621_v24 }
 0x295   :  { %v6633_v6 = vsub.f32 %v6339_v63, %v2632_v37  ;;  %v6636_v29 = vsub.f32 %v6337_v47, %v2632_v37  ;;  %v2783_v40 = vsel %vm2514_vm1, %v2720_v30, 0.0 }
 0x296   :  { %2777 = vadd.xlane.f32.xlu0 %v2776_v4  ;;  %v2542_v46 = vpop.xlane.xlu0 %2541  ;;  %2781 = vadd.xlane.f32.xlu1 %v2780_v2  ;;  %v2784_v54 = vadd.f32 %v2783_v40, %v2719_v50 }
 0x297   :  { %v2633_v31 = vmul.f32 0.0051020407, %v2542_v46  ;;  %v2721_v33 = vmul.f32 %v6633_v6, %v6633_v6  ;;  %v2722_v28 = vmul.f32 %v6636_v29, %v6636_v29 }
 0x299   :  { %v6644_v34 = vsub.f32 %v6348_v56, %v2633_v31  ;;  %v6647_v63 = vsub.f32 %v6346_v0, %v2633_v31  ;;  %v2787_v47 = vsel %vm2514_vm1, %v2722_v28, 0.0 }
 0x29a   :  { %v2546_v49 = vpop.xlane.xlu1 %2545  ;;  %2785 = vadd.xlane.f32.xlu0 %v2784_v54  ;;  %v2788_v48 = vadd.f32 %v2787_v47, %v2721_v33 }
 0x29b   :  { %v2634_v22 = vmul.f32 0.0051020407, %v2546_v49  ;;  %v2723_v37 = vmul.f32 %v6644_v34, %v6644_v34  ;;  %v2724_v30 = vmul.f32 %v6647_v63, %v6647_v63 }
 0x29c   :  { %2789 = vadd.xlane.f32.xlu1 %v2788_v48 }
 0x29d   :  { %v6655_v4 = vsub.f32 %v6357_v61, %v2634_v22  ;;  %v6658_v56 = vsub.f32 %v6355_v55, %v2634_v22  ;;  %v2791_v0 = vsel %vm2514_vm1, %v2724_v30, 0.0 }
 0x29e   :  { %v2550_v2 = vpop.xlane.xlu0 %2549  ;;  %v2792_v50 = vadd.f32 %v2791_v0, %v2723_v37 }
 0x29f   :  { %v2635_v40 = vmul.f32 0.0051020407, %v2550_v2  ;;  %v2725_v46 = vmul.f32 %v6655_v4, %v6655_v4  ;;  %v2726_v31 = vmul.f32 %v6658_v56, %v6658_v56 }
 0x2a0   :  { %2793 = vadd.xlane.f32.xlu0 %v2792_v50 }
 0x2a1   :  { %v6666_v33 = vsub.f32 %v6366_v12, %v2635_v40  ;;  %v6669_v61 = vsub.f32 %v6364_v9, %v2635_v40  ;;  %v2795_v55 = vsel %vm2514_vm1, %v2726_v31, 0.0 }
 0x2a2   :  { %v2554_v28 = vpop.xlane.xlu1 %2553  ;;  %v2796_v54 = vadd.f32 %v2795_v55, %v2725_v46 }
 0x2a3   :  { %v2636_v47 = vmul.f32 0.0051020407, %v2554_v28  ;;  %v2727_v49 = vmul.f32 %v6666_v33, %v6666_v33  ;;  %v2728_v48 = vmul.f32 %v6669_v61, %v6669_v61 }
 0x2a4   :  { %2797 = vadd.xlane.f32.xlu1 %v2796_v54 }
 0x2a5   :  { %v6677_v22 = vsub.f32 %v6375_v27, %v2636_v47  ;;  %v6680_v12 = vsub.f32 %v6373_v45, %v2636_v47  ;;  %v2799_v9 = vsel %vm2514_vm1, %v2728_v48, 0.0 }
 0x2a6   :  { %v2558_v37 = vpop.xlane.xlu0 %2557  ;;  %v2800_v30 = vadd.f32 %v2799_v9, %v2727_v49 }
 0x2a7   :  { %v2637_v0 = vmul.f32 0.0051020407, %v2558_v37  ;;  %v2729_v2 = vmul.f32 %v6677_v22, %v6677_v22  ;;  %v2730_v50 = vmul.f32 %v6680_v12, %v6680_v12 }
 0x2a8   :  { %2801 = vadd.xlane.f32.xlu0 %v2800_v30 }
 0x2a9   :  { %v6688_v40 = vsub.f32 %v6384_v26, %v2637_v0  ;;  %v6691_v27 = vsub.f32 %v6382_v38, %v2637_v0  ;;  %v2803_v45 = vsel %vm2514_vm1, %v2730_v50, 0.0 }
 0x2aa   :  { %v2562_v46 = vpop.xlane.xlu1 %2561  ;;  %v2804_v31 = vadd.f32 %v2803_v45, %v2729_v2 }
 0x2ab   :  { %v2638_v55 = vmul.f32 0.0051020407, %v2562_v46  ;;  %v2731_v28 = vmul.f32 %v6688_v40, %v6688_v40  ;;  %v2732_v54 = vmul.f32 %v6691_v27, %v6691_v27 }
 0x2ac   :  { %2805 = vadd.xlane.f32.xlu1 %v2804_v31 }
 0x2ad   :  { %v6699_v47 = vsub.f32 %v6393_v17, %v2638_v55  ;;  %v6702_v26 = vsub.f32 %v6391_v39, %v2638_v55  ;;  %v2807_v38 = vsel %vm2514_vm1, %v2732_v54, 0.0 }
 0x2ae   :  { %v2566_v49 = vpop.xlane.xlu0 %2565  ;;  %v2808_v48 = vadd.f32 %v2807_v38, %v2731_v28 }
 0x2af   :  { %v2639_v9 = vmul.f32 0.0051020407, %v2566_v49  ;;  %v2733_v37 = vmul.f32 %v6699_v47, %v6699_v47  ;;  %v2734_v30 = vmul.f32 %v6702_v26, %v6702_v26 }
 0x2b0   :  { %2809 = vadd.xlane.f32.xlu0 %v2808_v48 }
 0x2b1   :  { %v6710_v0 = vsub.f32 %v6402_v20, %v2639_v9  ;;  %v6713_v17 = vsub.f32 %v6400_v62, %v2639_v9  ;;  %v2811_v39 = vsel %vm2514_vm1, %v2734_v30, 0.0 }
 0x2b2   :  { %v2570_v2 = vpop.xlane.xlu1 %2569  ;;  %v2812_v50 = vadd.f32 %v2811_v39, %v2733_v37 }
 0x2b3   :  { %v2640_v45 = vmul.f32 0.0051020407, %v2570_v2  ;;  %v2735_v46 = vmul.f32 %v6710_v0, %v6710_v0  ;;  %v2736_v31 = vmul.f32 %v6713_v17, %v6713_v17 }
 0x2b4   :  { %2813 = vadd.xlane.f32.xlu1 %v2812_v50 }
 0x2b5   :  { %v6721_v55 = vsub.f32 %v6411_v3, %v2640_v45  ;;  %v6724_v20 = vsub.f32 %v6409_v51, %v2640_v45  ;;  %v2815_v62 = vsel %vm2514_vm1, %v2736_v31, 0.0 }
 0x2b6   :  { %v2574_v28 = vpop.xlane.xlu0 %2573  ;;  %v2816_v54 = vadd.f32 %v2815_v62, %v2735_v46 }
 0x2b7   :  { %v2641_v38 = vmul.f32 0.0051020407, %v2574_v28  ;;  %v2737_v49 = vmul.f32 %v6721_v55, %v6721_v55  ;;  %v2738_v48 = vmul.f32 %v6724_v20, %v6724_v20 }
 0x2b8   :  { %2817 = vadd.xlane.f32.xlu0 %v2816_v54 }
 0x2b9   :  { %v6732_v9 = vsub.f32 %v6420_v52, %v2641_v38  ;;  %v6735_v3 = vsub.f32 %v6418_v1, %v2641_v38  ;;  %v2819_v51 = vsel %vm2514_vm1, %v2738_v48, 0.0 }
 0x2ba   :  { %v2578_v37 = vpop.xlane.xlu1 %2577  ;;  %v2820_v30 = vadd.f32 %v2819_v51, %v2737_v49 }
 0x2bb   :  { %v2642_v39 = vmul.f32 0.0051020407, %v2578_v37  ;;  %v2739_v2 = vmul.f32 %v6732_v9, %v6732_v9  ;;  %v2740_v50 = vmul.f32 %v6735_v3, %v6735_v3 }
 0x2bc   :  { %2821 = vadd.xlane.f32.xlu1 %v2820_v30 }
 0x2bd   :  { %v6743_v45 = vsub.f32 %v6429_v21, %v2642_v39  ;;  %v6746_v52 = vsub.f32 %v6427_v23, %v2642_v39  ;;  %v2823_v1 = vsel %vm2514_vm1, %v2740_v50, 0.0 }
 0x2be   :  { %v2582_v46 = vpop.xlane.xlu0 %2581  ;;  %v2824_v31 = vadd.f32 %v2823_v1, %v2739_v2 }
 0x2bf   :  { %v2643_v62 = vmul.f32 0.0051020407, %v2582_v46  ;;  %v2741_v28 = vmul.f32 %v6743_v45, %v6743_v45  ;;  %v2742_v54 = vmul.f32 %v6746_v52, %v6746_v52 }
 0x2c0   :  { %2825 = vadd.xlane.f32.xlu0 %v2824_v31 }
 0x2c1   :  { %v6754_v38 = vsub.f32 %v6438_v57, %v2643_v62  ;;  %v6757_v21 = vsub.f32 %v6436_v11, %v2643_v62  ;;  %v2827_v23 = vsel %vm2514_vm1, %v2742_v54, 0.0 }
 0x2c2   :  { %v2586_v49 = vpop.xlane.xlu1 %2585  ;;  %v2828_v48 = vadd.f32 %v2827_v23, %v2741_v28 }
 0x2c3   :  { %v2644_v51 = vmul.f32 0.0051020407, %v2586_v49  ;;  %v2743_v37 = vmul.f32 %v6754_v38, %v6754_v38  ;;  %v2744_v30 = vmul.f32 %v6757_v21, %v6757_v21 }
 0x2c4   :  { %2829 = vadd.xlane.f32.xlu1 %v2828_v48 }
 0x2c5   :  { %v6765_v39 = vsub.f32 %v6447_v44, %v2644_v51  ;;  %v6768_v57 = vsub.f32 %v6445_v10, %v2644_v51  ;;  %v2831_v11 = vsel %vm2514_vm1, %v2744_v30, 0.0 }
 0x2c6   :  { %v2590_v2 = vpop.xlane.xlu0 %2589  ;;  %v2832_v50 = vadd.f32 %v2831_v11, %v2743_v37 }
 0x2c7   :  { %v2645_v1 = vmul.f32 0.0051020407, %v2590_v2  ;;  %v2745_v46 = vmul.f32 %v6765_v39, %v6765_v39  ;;  %v2746_v31 = vmul.f32 %v6768_v57, %v6768_v57 }
 0x2c8   :  { %2833 = vadd.xlane.f32.xlu0 %v2832_v50 }
 0x2c9   :  { %v6776_v62 = vsub.f32 %v6456_v53, %v2645_v1  ;;  %v6779_v44 = vsub.f32 %v6454_v19, %v2645_v1  ;;  %v2835_v10 = vsel %vm2514_vm1, %v2746_v31, 0.0  ;;  %v7439_v1 = vld [vmem:[#allocation11_spill] sm:$0xff] }
 0x2ca   :  { %v2594_v28 = vpop.xlane.xlu1 %2593  ;;  %v2836_v54 = vadd.f32 %v2835_v10, %v2745_v46 }
 0x2cb   :  { %v2646_v23 = vmul.f32 0.0051020407, %v2594_v28  ;;  %v2747_v49 = vmul.f32 %v6776_v62, %v6776_v62  ;;  %v2748_v48 = vmul.f32 %v6779_v44, %v6779_v44 }
 0x2cc   :  { %2837 = vadd.xlane.f32.xlu1 %v2836_v54 }
 0x2cd   :  { %v6787_v51 = vsub.f32 %v6465_v35, %v2646_v23  ;;  %v6790_v53 = vsub.f32 %v6463_v36, %v2646_v23  ;;  %v2839_v19 = vsel %vm2514_vm1, %v2748_v48, 0.0  ;;  %v7440_v35 = vld [vmem:[#allocation10_spill] sm:$0xff]  ;;  %v7442_v48 = vld [vmem:[#allocation13_spill] sm:$0xff] }
 0x2ce   :  { %v2598_v37 = vpop.xlane.xlu0 %2597  ;;  %v2840_v30 = vadd.f32 %v2839_v19, %v2747_v49 }
 0x2cf   :  { %v2647_v11 = vmul.f32 0.0051020407, %v2598_v37  ;;  %v2749_v2 = vmul.f32 %v6787_v51, %v6787_v51  ;;  %v2750_v50 = vmul.f32 %v6790_v53, %v6790_v53  ;;  %v7443_v37 = vld [vmem:[#allocation12_spill] sm:$0xff] }
 0x2d0   :  { %2841 = vadd.xlane.f32.xlu0 %v2840_v30 }
 0x2d1   :  { %v6798_v46 = vsub.f32 %v7439_v1, %v2647_v11  ;;  %v6801_v31 = vsub.f32 %v7440_v35, %v2647_v11  ;;  %v2843_v36 = vsel %vm2514_vm1, %v2750_v50, 0.0 }
 0x2d2   :  { %v2602_v10 = vpop.xlane.xlu1 %2601  ;;  %v2844_v28 = vadd.f32 %v2843_v36, %v2749_v2 }
 0x2d3   :  { %7441 = vst [vmem:[#allocation11_spill] sm:$0xff] %v6801_v31  ;;  %v2648_v54 = vmul.f32 0.0051020407, %v2602_v10  ;;  %v2751_v23 = vmul.f32 %v6798_v46, %v6798_v46  ;;  %v2752_v49 = vmul.f32 %v6801_v31, %v6801_v31 }
 0x2d4   :  { %2845 = vadd.xlane.f32.xlu1 %v2844_v28  ;;  %v7445_v28 = vld [vmem:[#allocation2_spill] sm:$0xff] }
 0x2d5   :  { %v6809_v19 = vsub.f32 %v7442_v48, %v2648_v54  ;;  %v6812_v30 = vsub.f32 %v7443_v37, %v2648_v54  ;;  %v2847_v11 = vsel %vm2514_vm1, %v2752_v49, 0.0 }
 0x2d6   :  { %v2606_v1 = vpop.xlane.xlu0 %2605  ;;  %v2848_v50 = vadd.f32 %v2847_v11, %v2751_v23 }
 0x2d7   :  { %7444 = vst [vmem:[#allocation10_spill] sm:$0xff] %v6812_v30  ;;  %v2649_v35 = vmul.f32 0.0051020407, %v2606_v1  ;;  %v2753_v2 = vmul.f32 %v6809_v19, %v6809_v19  ;;  %v2754_v36 = vmul.f32 %v6812_v30, %v6812_v30 }
 0x2d8   :  { %2849 = vadd.xlane.f32.xlu0 %v2848_v50 }
 0x2d9   :  { %v6820_v10 = vsub.f32 %v6492_v43, %v2649_v35  ;;  %v6823_v48 = vsub.f32 %v7445_v28, %v2649_v35  ;;  %v2851_v54 = vsel %vm2514_vm1, %v2754_v36, 0.0  ;;  %v7448_v43 = vld [vmem:[#allocation3_spill] sm:$0xff] }
 0x2da   :  { %v2610_v37 = vpop.xlane.xlu1 %2609  ;;  %v2852_v49 = vadd.f32 %v2851_v54, %v2753_v2 }
 0x2db   :  { %7446 = vst [vmem:[#allocation13_spill] sm:$0xff] %v6823_v48  ;;  %v2650_v31 = vmul.f32 0.0051020407, %v2610_v37  ;;  %v2755_v23 = vmul.f32 %v6820_v10, %v6820_v10  ;;  %v2756_v11 = vmul.f32 %v6823_v48, %v6823_v48 }
 0x2dc   :  { %2853 = vadd.xlane.f32.xlu1 %v2852_v49 }
 0x2dd   :  { %v6831_v1 = vsub.f32 %v6501_v5, %v2650_v31  ;;  %v6834_v50 = vsub.f32 %v7448_v43, %v2650_v31  ;;  %v2855_v35 = vsel %vm2514_vm1, %v2756_v11, 0.0 }
 0x2de   :  { %v2614_v28 = vpop.xlane.xlu0 %2613  ;;  %v2856_v36 = vadd.f32 %v2855_v35, %v2755_v23 }
 0x2df   :  { %7447 = vst [vmem:[#allocation12_spill] sm:$0xff] %v6831_v1  ;;  %7449 = vst [vmem:[#allocation2_spill] sm:$0xff] %v6834_v50  ;;  %v2651_v30 = vmul.f32 0.0051020407, %v2614_v28  ;;  %v2757_v2 = vmul.f32 %v6831_v1, %v6831_v1  ;;  %v2758_v54 = vmul.f32 %v6834_v50, %v6834_v50 }
 0x2e0   :  { %2857 = vadd.xlane.f32.xlu0 %v2856_v36 }
 0x2e1   :  { %v6842_v37 = vsub.f32 %v6510_v15, %v2651_v30  ;;  %v6845_v5 = vsub.f32 %v6508_v32, %v2651_v30  ;;  %v2859_v31 = vsel %vm2514_vm1, %v2758_v54, 0.0 }
 0x2e2   :  { %v2618_v49 = vpop.xlane.xlu1 %2617  ;;  %v2860_v11 = vadd.f32 %v2859_v31, %v2757_v2 }
 0x2e3   :  { %7450 = vst [vmem:[#allocation3_spill] sm:$0xff] %v6842_v37  ;;  %7451 = vst [vmem:[#allocation26_spill] sm:$0xff] %v6845_v5  ;;  %v2652_v43 = vmul.f32 0.0051020407, %v2618_v49  ;;  %v2759_v23 = vmul.f32 %v6842_v37, %v6842_v37  ;;  %v2760_v35 = vmul.f32 %v6845_v5, %v6845_v5  ;;  %v7454_v49 = vld [vmem:[#allocation7_spill] sm:$0xff] }
 0x2e4   :  { %2861 = vadd.xlane.f32.xlu1 %v2860_v11 }
 0x2e5   :  { %v6853_v28 = vsub.f32 %v6519_v8, %v2652_v43  ;;  %v6856_v15 = vsub.f32 %v6517_v13, %v2652_v43  ;;  %v2863_v32 = vsel %vm2514_vm1, %v2760_v35, 0.0  ;;  %v7456_v8 = vld [vmem:[#allocation6_spill] sm:$0xff] }
 0x2e6   :  { %v2622_v30 = vpop.xlane.xlu0 %2621  ;;  %v2864_v36 = vadd.f32 %v2863_v32, %v2759_v23 }
 0x2e7   :  { %7452 = vst [vmem:[#allocation27_spill] sm:$0xff] %v6853_v28  ;;  %7453 = vst [vmem:[#allocation28_spill] sm:$0xff] %v6856_v15  ;;  %v2653_v54 = vmul.f32 0.0051020407, %v2622_v30  ;;  %v2761_v2 = vmul.f32 %v6853_v28, %v6853_v28  ;;  %v2762_v31 = vmul.f32 %v6856_v15, %v6856_v15 }
 0x2e8   :  { %2865 = vadd.xlane.f32.xlu0 %v2864_v36  ;;  %v3233_v36 = vld [vmem:[%s7332_s4 + $0x90] sm:$0xff] }
 0x2e9   :  { %v6864_v11 = vsub.f32 %v7454_v49, %v2653_v54  ;;  %v6867_v5 = vsub.f32 %v7456_v8, %v2653_v54  ;;  %v2867_v13 = vsel %vm2514_vm1, %v2762_v31, 0.0  ;;  %v3235_v54 = vld [vmem:[%s7332_s4 + $0xa0] sm:$0xff]  ;;  %v3232_v31 = vld [vmem:[%s7332_s4 + $0x88] sm:$0xff]  ;;  %v3234_v8 = vld [vmem:[%s7332_s4 + $0x98] sm:$0xff] }
 0x2ea   :  { %v2868_v43 = vadd.f32 %v2867_v13, %v2761_v2  ;;  %v3237_v2 = vld [vmem:[%s7332_s4 + $0xb0] sm:$0xff]  ;;  %v3239_v49 = vld [vmem:[%s7332_s4 + $0xc0] sm:$0xff]  ;;  %v3236_v13 = vld [vmem:[%s7332_s4 + $0xa8] sm:$0xff] }
 0x2eb   :  { %7455 = vst [vmem:[#allocation7_spill] sm:$0xff] %v6864_v11  ;;  %7457 = vst [vmem:[#allocation6_spill] sm:$0xff] %v6867_v5  ;;  %v2763_v23 = vmul.f32 %v6864_v11, %v6864_v11  ;;  %v2764_v35 = vmul.f32 %v6867_v5, %v6867_v5 }
 0x2ec   :  { %2869 = vadd.xlane.f32.xlu1 %v2868_v43  ;;  %v3238_v43 = vld [vmem:[%s7332_s4 + $0xb8] sm:$0xff] }
 0x2ed   :  { %v2871_v32 = vsel %vm2514_vm1, %v2764_v35, 0.0  ;;  %v6902_v35 = vpop.permute.xlu1 %3325 }
 0x2ee   :  { %v2872_v30 = vadd.f32 %v2871_v32, %v2763_v23  ;;  %v3240_v23 = vld [vmem:[%s7332_s4 + $0xc8] sm:$0xff]  ;;  %v6904_v32 = vpop.permute.xlu0 %3320 }
 0x2f0   :  { %2873 = vadd.xlane.f32.xlu0 %v2872_v30 }
 0x2fd   :  { %3335 = vperm.xlu1 %3529, %v3233_v36  }
 0x301   :  { %3345 = vperm.xlu1 %3529, %v3235_v54  }
 0x305   :  { %3355 = vperm.xlu1 %3529, %v3237_v2  }
 0x306   :  { %3330 = vperm.xlu0 %3530, %v3232_v31  }
 0x309   :  { %3365 = vperm.xlu1 %3529, %v3239_v49  }
 0x30a   :  { %3340 = vperm.xlu0 %3530, %v3234_v8  }
 0x30e   :  { %3350 = vperm.xlu0 %3530, %v3236_v13  }
 0x312   :  { %3360 = vperm.xlu0 %3530, %v3238_v43  }
 0x316   :  { %3370 = vperm.xlu0 %3530, %v3240_v23  }
 0x317   :  { %v2626_v30 = vpop.xlane.xlu1 %2625 }
 0x318   :  { %v2654_v54 = vmul.f32 0.0051020407, %v2626_v30 }
 0x31a   :  { %v6907_v49 = vsub.f32 %v6570_v59, %v2654_v54  ;;  %v6910_v13 = vsub.f32 %v6589_v16, %v2654_v54 }
 0x31b   :  { %v2770_v36 = vpop.xlane.xlu0 %2769  ;;  %v2774_v8 = vpop.xlane.xlu1 %2773 }
 0x31c   :  { %v2879_v2 = vmul.f32 0.0051020407, %v2770_v36  ;;  %7458 = vst [vmem:[#allocation29_spill] sm:$0xff] %v6907_v49  ;;  %7459 = vst [vmem:[#allocation30_spill] sm:$0xff] %v6910_v13  ;;  %v2880_v43 = vmul.f32 0.0051020407, %v2774_v8  ;;  %v2766_v5 = vmul.f32 %v6907_v49, %v6907_v49  ;;  %v2765_v11 = vmul.f32 %v6910_v13, %v6910_v13 }
 0x31e   :  { %v2907_v31 = vadd.f32 1e-05, %v2879_v2  ;;  %v2908_v15 = vadd.f32 1e-05, %v2880_v43  ;;  %v2875_v36 = vsel %vm2514_vm1, %v2766_v5, 0.0 }
 0x31f   :  { %v2778_v23 = vpop.xlane.xlu0 %2777  ;;  %v2782_v2 = vpop.xlane.xlu1 %2781  ;;  %v2876_v59 = vadd.f32 %v2875_v36, %v2765_v11 }
 0x320   :  { %3531 = vrsqrt.f32 %v2907_v31  ;;  %v2881_v30 = vmul.f32 0.0051020407, %v2778_v23  ;;  %v2963_v31 = vld [vmem:[%s7333_s3] sm:$0xff]  ;;  %v2882_v54 = vmul.f32 0.0051020407, %v2782_v2 }
 0x321   :  { %3533 = vrsqrt.f32 %v2908_v15 }
 0x322   :  { %v2909_v16 = vadd.f32 1e-05, %v2881_v30  ;;  %v2910_v43 = vadd.f32 1e-05, %v2882_v54 }
 0x323   :  { %v2786_v8 = vpop.xlane.xlu0 %2785 }
 0x324   :  { %v2883_v50 = vmul.f32 0.0051020407, %v2786_v8  ;;  %3535 = vrsqrt.f32 %v2909_v16 }
 0x325   :  { %v2790_v49 = vpop.xlane.xlu1 %2789  ;;  %3537 = vrsqrt.f32 %v2910_v43 }
 0x326   :  { %v2911_v5 = vadd.f32 1e-05, %v2883_v50  ;;  %v2884_v11 = vmul.f32 0.0051020407, %v2790_v49 }
 0x328   :  { %3539 = vrsqrt.f32 %v2911_v5  ;;  %v2912_v30 = vadd.f32 1e-05, %v2884_v11 }
 0x329   :  { %v2794_v36 = vpop.xlane.xlu0 %2793 }
 0x32a   :  { %v2885_v15 = vmul.f32 0.0051020407, %v2794_v36 }
 0x32d   :  { %v3532_v28 = vpop.eup %3531  ;;  %2877 = vadd.xlane.f32.xlu1 %v2876_v59  ;;  %v2798_v23 = vpop.xlane.xlu1 %2797  ;;  %v2913_v59 = vadd.f32 1e-05, %v2885_v15 }
 0x32e   :  { %v2991_v37 = vmul.f32 %v3532_v28, %v2963_v31  ;;  %v3534_v48 = vpop.eup %3533  ;;  %v2964_v28 = vld [vmem:[%s7333_s3 + $0x8] sm:$0xff] }
 0x32f   :  { %v2992_v50 = vmul.f32 %v3534_v48, %v2964_v28  ;;  %v2967_v28 = vld [vmem:[%s7333_s3 + $0x20] sm:$0xff] }
 0x330   :  { %3021 = vperm.xlu0 %3530, %v2991_v37   ;;  %v2886_v37 = vmul.f32 0.0051020407, %v2798_v23  ;;  %v2966_v23 = vld [vmem:[%s7333_s3 + $0x18] sm:$0xff] }
 0x331   :  { %v2802_v31 = vpop.xlane.xlu0 %2801  ;;  %v3536_v16 = vpop.eup %3535 }
 0x332   :  { %v2914_v8 = vadd.f32 1e-05, %v2886_v37  ;;  %v3538_v11 = vpop.eup %3537 }
 0x335   :  { %v2806_v13 = vpop.xlane.xlu1 %2805  ;;  %v3540_v15 = vpop.eup %3539 }
 0x336   :  { %v2888_v1 = vmul.f32 0.0051020407, %v2806_v13  ;;  %v2965_v13 = vld [vmem:[%s7333_s3 + $0x10] sm:$0xff] }
 0x337   :  { %v2993_v5 = vmul.f32 %v3536_v16, %v2965_v13 }
 0x338   :  { %v2916_v2 = vadd.f32 1e-05, %v2888_v1  ;;  %v2887_v1 = vmul.f32 0.0051020407, %v2802_v31  ;;  %v2972_v31 = vld [vmem:[%s7333_s3 + $0x48] sm:$0xff] }
 0x339   :  { %v2810_v36 = vpop.xlane.xlu0 %2809 }
 0x33a   :  { %3541 = vrsqrt.f32 %v2916_v2  ;;  %v2915_v48 = vadd.f32 1e-05, %v2887_v1  ;;  %v2994_v2 = vmul.f32 %v3538_v11, %v2966_v23  ;;  %v2968_v11 = vld [vmem:[%s7333_s3 + $0x28] sm:$0xff] }
 0x33b   :  { %3543 = vrsqrt.f32 %v2912_v30  ;;  %v2889_v30 = vmul.f32 0.0051020407, %v2810_v36 }
 0x33c   :  { %3545 = vrsqrt.f32 %v2913_v59 }
 0x33d   :  { %v2814_v49 = vpop.xlane.xlu1 %2813  ;;  %v2917_v13 = vadd.f32 1e-05, %v2889_v30  ;;  %v2974_v30 = vld [vmem:[%s7333_s3 + $0x58] sm:$0xff] }
 0x33e   :  { %v2890_v54 = vmul.f32 0.0051020407, %v2814_v49  ;;  %3026 = vperm.xlu1 %3529, %v2992_v50   ;;  %v2995_v49 = vmul.f32 %v3540_v15, %v2967_v28 }
 0x340   :  { %v2918_v43 = vadd.f32 1e-05, %v2890_v54 }
 0x341   :  { %v2818_v59 = vpop.xlane.xlu0 %2817 }
 0x342   :  { %3547 = vrsqrt.f32 %v2918_v43  ;;  %3031 = vperm.xlu1 %3529, %v2993_v5   ;;  %v2891_v54 = vmul.f32 0.0051020407, %v2818_v59 }
 0x343   :  { %3549 = vrsqrt.f32 %v2914_v8 }
 0x344   :  { %3551 = vrsqrt.f32 %v2915_v48  ;;  %v2919_v23 = vadd.f32 1e-05, %v2891_v54  ;;  %v2969_v48 = vld [vmem:[%s7333_s3 + $0x30] sm:$0xff] }
 0x345   :  { %v2822_v37 = vpop.xlane.xlu1 %2821 }
 0x346   :  { %v2892_v50 = vmul.f32 0.0051020407, %v2822_v37  ;;  %3036 = vperm.xlu1 %3529, %v2994_v2  }
 0x347   :  { %v3542_v16 = vpop.eup %3541 }
 0x348   :  { %v2920_v1 = vadd.f32 1e-05, %v2892_v50  ;;  %v3000_v8 = vmul.f32 %v3542_v16, %v2972_v31  ;;  %v3544_v43 = vpop.eup %3543 }
 0x349   :  { %v2826_v5 = vpop.xlane.xlu0 %2825  ;;  %v3546_v36 = vpop.eup %3545  ;;  %v2996_v37 = vmul.f32 %v3544_v43, %v2968_v11 }
 0x34a   :  { %3553 = vrsqrt.f32 %v2920_v1  ;;  %3041 = vperm.xlu1 %3529, %v2995_v49   ;;  %3066 = vperm.xlu0 %3530, %v3000_v8   ;;  %v2893_v2 = vmul.f32 0.0051020407, %v2826_v5  ;;  %v2997_v31 = vmul.f32 %v3546_v36, %v2969_v48  ;;  %v2970_v1 = vld [vmem:[%s7333_s3 + $0x38] sm:$0xff]  ;;  %v2971_v36 = vld [vmem:[%s7333_s3 + $0x40] sm:$0xff] }
 0x34b   :  { %3555 = vrsqrt.f32 %v2917_v13 }
 0x34c   :  { %3557 = vrsqrt.f32 %v2919_v23  ;;  %v2921_v50 = vadd.f32 1e-05, %v2893_v2  ;;  %v2976_v23 = vld [vmem:[%s7333_s3 + $0x68] sm:$0xff] }
 0x34d   :  { %v2830_v15 = vpop.xlane.xlu1 %2829 }
 0x34e   :  { %v2894_v28 = vmul.f32 0.0051020407, %v2830_v15  ;;  %3046 = vperm.xlu1 %3529, %v2996_v37  }
 0x34f   :  { %v3548_v59 = vpop.eup %3547 }
 0x350   :  { %v2922_v16 = vadd.f32 1e-05, %v2894_v28  ;;  %v3002_v49 = vmul.f32 %v3548_v59, %v2974_v30  ;;  %v3550_v13 = vpop.eup %3549 }
 0x351   :  { %v2834_v54 = vpop.xlane.xlu0 %2833  ;;  %v3552_v43 = vpop.eup %3551  ;;  %v2998_v11 = vmul.f32 %v3550_v13, %v2970_v1 }
 0x352   :  { %3559 = vrsqrt.f32 %v2922_v16  ;;  %v2895_v8 = vmul.f32 0.0051020407, %v2834_v54  ;;  %3051 = vperm.xlu1 %3529, %v2997_v31   ;;  %3076 = vperm.xlu0 %3530, %v3002_v49   ;;  %v2999_v30 = vmul.f32 %v3552_v43, %v2971_v36  ;;  %v2978_v43 = vld [vmem:[%s7333_s3 + $0x78] sm:$0xff] }
 0x353   :  { %3561 = vrsqrt.f32 %v2921_v50  ;;  %v2973_v50 = vld [vmem:[%s7333_s3 + $0x50] sm:$0xff] }
 0x354   :  { %v2923_v5 = vadd.f32 1e-05, %v2895_v8  ;;  %v2975_v8 = vld [vmem:[%s7333_s3 + $0x60] sm:$0xff] }
 0x355   :  { %v2838_v37 = vpop.xlane.xlu1 %2837 }
 0x356   :  { %v2896_v2 = vmul.f32 0.0051020407, %v2838_v37  ;;  %3056 = vperm.xlu1 %3529, %v2998_v11   ;;  %3563 = vrsqrt.f32 %v2923_v5 }
 0x357   :  { %v3554_v48 = vpop.eup %3553 }
 0x358   :  { %v2924_v15 = vadd.f32 1e-05, %v2896_v2  ;;  %v3004_v28 = vmul.f32 %v3554_v48, %v2976_v23  ;;  %v3556_v59 = vpop.eup %3555 }
 0x359   :  { %v2842_v31 = vpop.xlane.xlu0 %2841  ;;  %v3001_v13 = vmul.f32 %v3556_v59, %v2973_v50  ;;  %v3558_v54 = vpop.eup %3557 }
 0x35a   :  { %3565 = vrsqrt.f32 %v2924_v15  ;;  %v2897_v16 = vmul.f32 0.0051020407, %v2842_v31  ;;  %3061 = vperm.xlu1 %3529, %v2999_v30   ;;  %3086 = vperm.xlu0 %3530, %v3004_v28   ;;  %v3003_v36 = vmul.f32 %v3558_v54, %v2975_v8  ;;  %v2977_v15 = vld [vmem:[%s7333_s3 + $0x70] sm:$0xff] }
 0x35c   :  { %v2925_v49 = vadd.f32 1e-05, %v2897_v16  ;;  %v2979_v16 = vld [vmem:[%s7333_s3 + $0x80] sm:$0xff] }
 0x35d   :  { %v2846_v1 = vpop.xlane.xlu1 %2845 }
 0x35e   :  { %3567 = vrsqrt.f32 %v2925_v49  ;;  %v2898_v5 = vmul.f32 0.0051020407, %v2846_v1  ;;  %3071 = vperm.xlu1 %3529, %v3001_v13   ;;  %v2980_v49 = vld [vmem:[%s7333_s3 + $0x88] sm:$0xff] }
 0x35f   :  { %v3560_v11 = vpop.eup %3559 }
 0x360   :  { %v2926_v37 = vadd.f32 1e-05, %v2898_v5  ;;  %v3006_v23 = vmul.f32 %v3560_v11, %v2978_v43  ;;  %v3562_v2 = vpop.eup %3561  ;;  %v2981_v11 = vld [vmem:[%s7333_s3 + $0x90] sm:$0xff] }
 0x361   :  { %v2850_v48 = vpop.xlane.xlu0 %2849  ;;  %v3005_v59 = vmul.f32 %v3562_v2, %v2977_v15  ;;  %v2982_v15 = vld [vmem:[%s7333_s3 + $0x98] sm:$0xff] }
 0x362   :  { %3569 = vrsqrt.f32 %v2926_v37  ;;  %v2899_v30 = vmul.f32 0.0051020407, %v2850_v48  ;;  %3081 = vperm.xlu1 %3529, %v3003_v36   ;;  %3096 = vperm.xlu0 %3530, %v3006_v23  }
 0x363   :  { %v3564_v31 = vpop.eup %3563 }
 0x364   :  { %v2927_v28 = vadd.f32 1e-05, %v2899_v30  ;;  %v3007_v8 = vmul.f32 %v3564_v31, %v2979_v16  ;;  %v2983_v16 = vld [vmem:[%s7333_s3 + $0xa0] sm:$0xff] }
 0x365   :  { %v2854_v50 = vpop.xlane.xlu1 %2853 }
 0x366   :  { %3571 = vrsqrt.f32 %v2927_v28  ;;  %v2900_v13 = vmul.f32 0.0051020407, %v2854_v50  ;;  %3091 = vperm.xlu1 %3529, %v3005_v59  }
 0x367   :  { %v3566_v54 = vpop.eup %3565 }
 0x368   :  { %v2928_v1 = vadd.f32 1e-05, %v2900_v13  ;;  %v3008_v43 = vmul.f32 %v3566_v54, %v2980_v49 }
 0x369   :  { %v2858_v5 = vpop.xlane.xlu0 %2857 }
 0x36a   :  { %3573 = vrsqrt.f32 %v2928_v1  ;;  %v2901_v37 = vmul.f32 0.0051020407, %v2858_v5  ;;  %3101 = vperm.xlu1 %3529, %v3007_v8   ;;  %3106 = vperm.xlu0 %3530, %v3008_v43   ;;  %v2984_v43 = vld [vmem:[%s7333_s3 + $0xa8] sm:$0xff] }
 0x36b   :  { %v3568_v36 = vpop.eup %3567 }
 0x36c   :  { %v2929_v23 = vadd.f32 1e-05, %v2901_v37  ;;  %v3009_v2 = vmul.f32 %v3568_v36, %v2981_v11 }
 0x36d   :  { %v2862_v48 = vpop.xlane.xlu1 %2861 }
 0x36e   :  { %3575 = vrsqrt.f32 %v2929_v23  ;;  %v2902_v30 = vmul.f32 0.0051020407, %v2862_v48  ;;  %3111 = vperm.xlu1 %3529, %v3009_v2   ;;  %v2985_v2 = vld [vmem:[%s7333_s3 + $0xb0] sm:$0xff] }
 0x36f   :  { %v3570_v28 = vpop.eup %3569 }
 0x370   :  { %v2930_v59 = vadd.f32 1e-05, %v2902_v30  ;;  %v3010_v31 = vmul.f32 %v3570_v28, %v2982_v15 }
 0x371   :  { %v2866_v50 = vpop.xlane.xlu0 %2865 }
 0x372   :  { %3577 = vrsqrt.f32 %v2930_v59  ;;  %v2903_v49 = vmul.f32 0.0051020407, %v2866_v50  ;;  %3116 = vperm.xlu0 %3530, %v3010_v31   ;;  %v2986_v59 = vld [vmem:[%s7333_s3 + $0xb8] sm:$0xff] }
 0x373   :  { %v3572_v13 = vpop.eup %3571 }
 0x374   :  { %v2931_v54 = vadd.f32 1e-05, %v2903_v49  ;;  %v3011_v1 = vmul.f32 %v3572_v13, %v2983_v16  ;;  %v2987_v16 = vld [vmem:[%s7333_s3 + $0xc0] sm:$0xff] }
 0x375   :  { %v2870_v8 = vpop.xlane.xlu1 %2869 }
 0x376   :  { %3579 = vrsqrt.f32 %v2931_v54  ;;  %v2904_v5 = vmul.f32 0.0051020407, %v2870_v8  ;;  %3121 = vperm.xlu1 %3529, %v3011_v1   ;;  %v2988_v54 = vld [vmem:[%s7333_s3 + $0xc8] sm:$0xff] }
 0x377   :  { %v3574_v11 = vpop.eup %3573 }
 0x378   :  { %v2932_v37 = vadd.f32 1e-05, %v2904_v5  ;;  %v3012_v36 = vmul.f32 %v3574_v11, %v2984_v43  ;;  %v2989_v43 = vld [vmem:[%s7333_s3 + $0xd0] sm:$0xff] }
 0x379   :  { %v2874_v23 = vpop.xlane.xlu0 %2873 }
 0x37a   :  { %3581 = vrsqrt.f32 %v2932_v37  ;;  %v2905_v48 = vmul.f32 0.0051020407, %v2874_v23  ;;  %3126 = vperm.xlu0 %3530, %v3012_v36   ;;  %v3241_v36 = vld [vmem:[%s7332_s4 + $0xd0] sm:$0xff] }
 0x37b   :  { %v3576_v15 = vpop.eup %3575 }
 0x37c   :  { %v2933_v30 = vadd.f32 1e-05, %v2905_v48  ;;  %v3013_v28 = vmul.f32 %v3576_v15, %v2985_v2  ;;  %v7007_v48 = vpop.permute.xlu1 %3335 }
 0x37e   :  { %3583 = vrsqrt.f32 %v2933_v30  ;;  %3131 = vperm.xlu1 %3529, %v3013_v28  }
 0x37f   :  { %v3578_v31 = vpop.eup %3577 }
 0x380   :  { %v3014_v50 = vmul.f32 %v3578_v31, %v2986_v59  ;;  %v7011_v30 = vpop.permute.xlu1 %3345 }
 0x381   :  { %v6998_v37 = vpop.permute.xlu0 %3330 }
 0x382   :  { %3136 = vperm.xlu0 %3530, %v3014_v50  }
 0x383   :  { %v3580_v49 = vpop.eup %3579 }
 0x384   :  { %v3015_v13 = vmul.f32 %v3580_v49, %v2987_v16  ;;  %v7015_v31 = vpop.permute.xlu1 %3355  ;;  %v7460_v49 = vld [vmem:[#allocation5_spill] sm:$0xff] }
 0x385   :  { %v7003_v23 = vpop.permute.xlu0 %3340 }
 0x386   :  { %3141 = vperm.xlu1 %3529, %v3015_v13  }
 0x387   :  { %v3582_v1 = vpop.eup %3581 }
 0x388   :  { %v3016_v8 = vmul.f32 %v3582_v1, %v2988_v54  ;;  %v7028_v1 = vpop.permute.xlu1 %3365 }
 0x389   :  { %v7005_v2 = vpop.permute.xlu0 %3350 }
 0x38a   :  { %3146 = vperm.xlu0 %3530, %v3016_v8  }
 0x38b   :  { %v3584_v5 = vpop.eup %3583 }
 0x38c   :  { %v3017_v11 = vmul.f32 %v3584_v5, %v2989_v43 }
 0x38d   :  { %v7009_v15 = vpop.permute.xlu0 %3360 }
 0x38e   :  { %3151 = vperm.xlu1 %3529, %v3017_v11  }
 0x391   :  { %v7013_v28 = vpop.permute.xlu0 %3370 }
 0x392   :  { %3375 = vperm.xlu1 %3529, %v3241_v36   ;;  %v7461_v36 = vld [vmem:[#allocation4_spill] sm:$0xff] }
 0x3ab   :  { %v3022_v59 = vpop.permute.xlu0 %3021 }
 0x3ac   :  { %v3159_v50 = vmul.f32 %v3022_v59, %v6580_v18  ;;  %v3160_v16 = vmul.f32 %v3022_v59, %v6573_v58 }
 0x3ae   :  { %v3383_v13 = vadd.f32 %v7460_v49, %v3159_v50  ;;  %v3384_v54 = vadd.f32 %v7460_v49, %v3160_v16 }
 0x3b0   :  { %3439 = vst [vmem:[%s7334_s5] sm:$0xff] %v3383_v13  ;;  %3440 = vst.msk [vmem:[%s7334_s5 + $0x8] sm:$0xff] %vm2514_vm1, %v3384_v54  ;;  %v7462_v13 = vld [vmem:[#allocation14_spill] sm:$0xff] }
 0x3b6   :  { %v2878_v8 = vpop.xlane.xlu1 %2877 }
 0x3b7   :  { %v2906_v43 = vmul.f32 0.0051020407, %v2878_v8 }
 0x3b9   :  { %v2934_v18 = vadd.f32 1e-05, %v2906_v43 }
 0x3ba   :  { %v3027_v5 = vpop.permute.xlu1 %3026 }
 0x3bb   :  { %3585 = vrsqrt.f32 %v2934_v18  ;;  %v3161_v58 = vmul.f32 %v3027_v5, %v6583_v42  ;;  %v3162_v11 = vmul.f32 %v3027_v5, %v6577_v41  ;;  %v7463_v18 = vld [vmem:[#allocation9_spill] sm:$0xff]  ;;  %v7464_v5 = vld [vmem:[#allocation8_spill] sm:$0xff] }
 0x3bd   :  { %v3385_v59 = vadd.f32 %v7461_v36, %v3161_v58  ;;  %v3386_v50 = vadd.f32 %v7461_v36, %v3162_v11 }
 0x3be   :  { %v3032_v16 = vpop.permute.xlu1 %3031 }
 0x3bf   :  { %3441 = vst [vmem:[%s7334_s5 + $0x10] sm:$0xff] %v3385_v59  ;;  %3442 = vst.msk [vmem:[%s7334_s5 + $0x18] sm:$0xff] %vm2514_vm1, %v3386_v50  ;;  %v3163_v49 = vmul.f32 %v3032_v16, %v6598_v7  ;;  %v3164_v42 = vmul.f32 %v3032_v16, %v6592_v14  ;;  %v2990_v16 = vld [vmem:[%s7333_s3 + $0xd8] sm:$0xff] }
 0x3c1   :  { %v3387_v41 = vadd.f32 %v7462_v13, %v3163_v49  ;;  %v3388_v54 = vadd.f32 %v7462_v13, %v3164_v42 }
 0x3c2   :  { %v3037_v8 = vpop.permute.xlu1 %3036 }
 0x3c3   :  { %3443 = vst [vmem:[%s7334_s5 + $0x20] sm:$0xff] %v3387_v41  ;;  %3444 = vst.msk [vmem:[%s7334_s5 + $0x28] sm:$0xff] %vm2514_vm1, %v3388_v54  ;;  %v3165_v43 = vmul.f32 %v3037_v8, %v6606_v25  ;;  %v3166_v7 = vmul.f32 %v3037_v8, %v7463_v18  ;;  %v7466_v41 = vld [vmem:[#allocation16_spill] sm:$0xff] }
 0x3c5   :  { %v3389_v14 = vadd.f32 %v7464_v5, %v3165_v43  ;;  %v3390_v58 = vadd.f32 %v7464_v5, %v3166_v7  ;;  %v3067_v11 = vpop.permute.xlu0 %3066  ;;  %v3242_v7 = vld [vmem:[%s7332_s4 + $0xd8] sm:$0xff]  ;;  %v7467_v5 = vld [vmem:[#allocation15_spill] sm:$0xff] }
 0x3c6   :  { %v3177_v36 = vmul.f32 %v3067_v11, %v6677_v22  ;;  %v3178_v59 = vmul.f32 %v3067_v11, %v6680_v12  ;;  %v3042_v50 = vpop.permute.xlu1 %3041  ;;  %v7465_v12 = vld [vmem:[#allocation19_spill] sm:$0xff] }
 0x3c7   :  { %3445 = vst [vmem:[%s7334_s5 + $0x30] sm:$0xff] %v3389_v14  ;;  %3446 = vst.msk [vmem:[%s7334_s5 + $0x38] sm:$0xff] %vm2514_vm1, %v3390_v58  ;;  %v3167_v25 = vmul.f32 %v3042_v50, %v6621_v24  ;;  %v3168_v22 = vmul.f32 %v3042_v50, %v6624_v60 }
 0x3c8   :  { %v3586_v49 = vpop.eup %3585  ;;  %v3401_v42 = vadd.f32 %v7465_v12, %v3177_v36  ;;  %v3402_v13 = vadd.f32 %v7465_v12, %v3178_v59 }
 0x3c9   :  { %v3391_v54 = vadd.f32 %v7466_v41, %v3167_v25  ;;  %v3392_v8 = vadd.f32 %v7466_v41, %v3168_v22  ;;  %v3018_v43 = vmul.f32 %v3586_v49, %v2990_v16  ;;  %v7468_v16 = vld [vmem:[#allocation21_spill] sm:$0xff] }
 0x3ca   :  { %3457 = vst [vmem:[%s7334_s5 + $0x90] sm:$0xff] %v3401_v42  ;;  %3458 = vst.msk [vmem:[%s7334_s5 + $0x98] sm:$0xff] %vm2514_vm1, %v3402_v13  ;;  %v3047_v24 = vpop.permute.xlu1 %3046  ;;  %v7470_v42 = vld [vmem:[#allocation17_spill] sm:$0xff] }
 0x3cb   :  { %3447 = vst [vmem:[%s7334_s5 + $0x40] sm:$0xff] %v3391_v54  ;;  %3448 = vst.msk [vmem:[%s7334_s5 + $0x48] sm:$0xff] %vm2514_vm1, %v3392_v8  ;;  %v3169_v60 = vmul.f32 %v3047_v24, %v6633_v6  ;;  %v3170_v18 = vmul.f32 %v3047_v24, %v6636_v29  ;;  %3156 = vperm.xlu0 %3530, %v3018_v43  }
 0x3cd   :  { %v3393_v14 = vadd.f32 %v7467_v5, %v3169_v60  ;;  %v3394_v58 = vadd.f32 %v7467_v5, %v3170_v18  ;;  %v3077_v11 = vpop.permute.xlu0 %3076  ;;  %v7471_v60 = vld [vmem:[#allocation23_spill] sm:$0xff] }
 0x3ce   :  { %v3181_v36 = vmul.f32 %v3077_v11, %v6699_v47  ;;  %v3182_v59 = vmul.f32 %v3077_v11, %v6702_v26  ;;  %v3052_v50 = vpop.permute.xlu1 %3051  ;;  %v7469_v26 = vld [vmem:[#allocation18_spill] sm:$0xff] }
 0x3cf   :  { %3449 = vst [vmem:[%s7334_s5 + $0x50] sm:$0xff] %v3393_v14  ;;  %3450 = vst.msk [vmem:[%s7334_s5 + $0x58] sm:$0xff] %vm2514_vm1, %v3394_v58  ;;  %v3171_v6 = vmul.f32 %v3052_v50, %v6644_v34  ;;  %v3172_v29 = vmul.f32 %v3052_v50, %v6647_v63  ;;  %3380 = vperm.xlu0 %3530, %v3242_v7   ;;  %v7472_v7 = vld [vmem:[#allocation20_spill] sm:$0xff]  ;;  %v7473_v58 = vld [vmem:[#allocation22_spill] sm:$0xff] }
 0x3d0   :  { %v3405_v25 = vadd.f32 %v7468_v16, %v3181_v36  ;;  %v3406_v47 = vadd.f32 %v7468_v16, %v3182_v59 }
 0x3d1   :  { %v3395_v22 = vadd.f32 %v7469_v26, %v3171_v6  ;;  %v3396_v49 = vadd.f32 %v7469_v26, %v3172_v29  ;;  %v7475_v26 = vld [vmem:[#allocation25_spill] sm:$0xff] }
 0x3d2   :  { %3461 = vst [vmem:[%s7334_s5 + $0xb0] sm:$0xff] %v3405_v25  ;;  %3462 = vst.msk [vmem:[%s7334_s5 + $0xb8] sm:$0xff] %vm2514_vm1, %v3406_v47  ;;  %v3057_v34 = vpop.permute.xlu1 %3056  ;;  %v7474_v25 = vld [vmem:[#allocation24_spill] sm:$0xff] }
 0x3d3   :  { %3451 = vst [vmem:[%s7334_s5 + $0x60] sm:$0xff] %v3395_v22  ;;  %3452 = vst.msk [vmem:[%s7334_s5 + $0x68] sm:$0xff] %vm2514_vm1, %v3396_v49  ;;  %v3173_v63 = vmul.f32 %v3057_v34, %v6655_v4  ;;  %v3174_v12 = vmul.f32 %v3057_v34, %v6658_v56 }
 0x3d5   :  { %v3397_v13 = vadd.f32 %v7470_v42, %v3173_v63  ;;  %v3398_v41 = vadd.f32 %v7470_v42, %v3174_v12  ;;  %v3087_v54 = vpop.permute.xlu0 %3086 }
 0x3d6   :  { %v3185_v8 = vmul.f32 %v3087_v54, %v6721_v55  ;;  %v3186_v43 = vmul.f32 %v3087_v54, %v6724_v20  ;;  %v3062_v24 = vpop.permute.xlu1 %3061 }
 0x3d7   :  { %3453 = vst [vmem:[%s7334_s5 + $0x70] sm:$0xff] %v3397_v13  ;;  %3454 = vst.msk [vmem:[%s7334_s5 + $0x78] sm:$0xff] %vm2514_vm1, %v3398_v41  ;;  %v3175_v4 = vmul.f32 %v3062_v24, %v6666_v33  ;;  %v3176_v56 = vmul.f32 %v3062_v24, %v6669_v61 }
 0x3d8   :  { %v3409_v18 = vadd.f32 %v7471_v60, %v3185_v8  ;;  %v3410_v55 = vadd.f32 %v7471_v60, %v3186_v43 }
 0x3d9   :  { %v3399_v20 = vadd.f32 %v7472_v7, %v3175_v4  ;;  %v3400_v5 = vadd.f32 %v7472_v7, %v3176_v56 }
 0x3da   :  { %3465 = vst [vmem:[%s7334_s5 + $0xd0] sm:$0xff] %v3409_v18  ;;  %3466 = vst.msk [vmem:[%s7334_s5 + $0xd8] sm:$0xff] %vm2514_vm1, %v3410_v55  ;;  %v3072_v33 = vpop.permute.xlu1 %3071  ;;  %v7477_v55 = vld [vmem:[#allocation10_spill] sm:$0xff] }
 0x3db   :  { %3455 = vst [vmem:[%s7334_s5 + $0x80] sm:$0xff] %v3399_v20  ;;  %3456 = vst.msk [vmem:[%s7334_s5 + $0x88] sm:$0xff] %vm2514_vm1, %v3400_v5  ;;  %v3179_v61 = vmul.f32 %v3072_v33, %v6688_v40  ;;  %v3180_v14 = vmul.f32 %v3072_v33, %v6691_v27  ;;  %v7478_v33 = vld [vmem:[#allocation13_spill] sm:$0xff] }
 0x3dd   :  { %v3403_v11 = vadd.f32 %v7473_v58, %v3179_v61  ;;  %v3404_v36 = vadd.f32 %v7473_v58, %v3180_v14  ;;  %v3097_v59 = vpop.permute.xlu0 %3096 }
 0x3de   :  { %v3189_v50 = vmul.f32 %v3097_v59, %v6743_v45  ;;  %v3190_v6 = vmul.f32 %v3097_v59, %v6746_v52  ;;  %v3082_v29 = vpop.permute.xlu1 %3081 }
 0x3df   :  { %3459 = vst [vmem:[%s7334_s5 + $0xa0] sm:$0xff] %v3403_v11  ;;  %3460 = vst.msk [vmem:[%s7334_s5 + $0xa8] sm:$0xff] %vm2514_vm1, %v3404_v36  ;;  %v3183_v40 = vmul.f32 %v3082_v29, %v6710_v0  ;;  %v3184_v27 = vmul.f32 %v3082_v29, %v6713_v17  ;;  %v7480_v36 = vld [vmem:[#allocation2_spill] sm:$0xff] }
 0x3e0   :  { %v3413_v16 = vadd.f32 %v6904_v32, %v3189_v50  ;;  %v3414_v45 = vadd.f32 %v6904_v32, %v3190_v6 }
 0x3e1   :  { %v3407_v52 = vadd.f32 %v7474_v25, %v3183_v40  ;;  %v3408_v47 = vadd.f32 %v7474_v25, %v3184_v27  ;;  %v7482_v40 = vld [vmem:[#allocation26_spill] sm:$0xff] }
 0x3e2   :  { %3469 = vst [vmem:[%s7334_s5 + $0xf0] sm:$0xff] %v3413_v16  ;;  %3470 = vst.msk [vmem:[%s7334_s5 + $0xf8] sm:$0xff] %vm2514_vm1, %v3414_v45  ;;  %v3092_v0 = vpop.permute.xlu1 %3091 }
 0x3e3   :  { %3463 = vst [vmem:[%s7334_s5 + $0xc0] sm:$0xff] %v3407_v52  ;;  %3464 = vst.msk [vmem:[%s7334_s5 + $0xc8] sm:$0xff] %vm2514_vm1, %v3408_v47  ;;  %v3187_v17 = vmul.f32 %v3092_v0, %v6732_v9  ;;  %v3188_v32 = vmul.f32 %v3092_v0, %v6735_v3  ;;  %v7484_v47 = vld [vmem:[#allocation28_spill] sm:$0xff] }
 0x3e5   :  { %v3411_v22 = vadd.f32 %v7475_v26, %v3187_v17  ;;  %v3412_v49 = vadd.f32 %v7475_v26, %v3188_v32  ;;  %v3107_v34 = vpop.permute.xlu0 %3106 }
 0x3e6   :  { %v3193_v63 = vmul.f32 %v3107_v34, %v6765_v39  ;;  %v3194_v12 = vmul.f32 %v3107_v34, %v6768_v57  ;;  %v3102_v42 = vpop.permute.xlu1 %3101 }
 0x3e7   :  { %3467 = vst [vmem:[%s7334_s5 + $0xe0] sm:$0xff] %v3411_v22  ;;  %3468 = vst.msk [vmem:[%s7334_s5 + $0xe8] sm:$0xff] %vm2514_vm1, %v3412_v49  ;;  %v3191_v9 = vmul.f32 %v3102_v42, %v6754_v38  ;;  %v3192_v3 = vmul.f32 %v3102_v42, %v6757_v21  ;;  %v7486_v49 = vld [vmem:[#allocation6_spill] sm:$0xff] }
 0x3e8   :  { %v3417_v13 = vadd.f32 %v6998_v37, %v3193_v63  ;;  %v3418_v39 = vadd.f32 %v6998_v37, %v3194_v12 }
 0x3e9   :  { %v3415_v57 = vadd.f32 %v6902_v35, %v3191_v9  ;;  %v3416_v41 = vadd.f32 %v6902_v35, %v3192_v3  ;;  %v7487_v9 = vld [vmem:[#allocation30_spill] sm:$0xff] }
 0x3ea   :  { %3473 = vst [vmem:[%s7334_s5 + $0x110] sm:$0xff] %v3417_v13  ;;  %3474 = vst.msk [vmem:[%s7334_s5 + $0x118] sm:$0xff] %vm2514_vm1, %v3418_v39  ;;  %v3112_v38 = vpop.permute.xlu1 %3111  ;;  %v7488_v13 = vld [vmem:[#allocation29_spill] sm:$0xff] }
 0x3eb   :  { %3471 = vst [vmem:[%s7334_s5 + $0x100] sm:$0xff] %v3415_v57  ;;  %3472 = vst.msk [vmem:[%s7334_s5 + $0x108] sm:$0xff] %vm2514_vm1, %v3416_v41  ;;  %v3195_v21 = vmul.f32 %v3112_v38, %v6776_v62  ;;  %v3196_v35 = vmul.f32 %v3112_v38, %v6779_v44 }
 0x3ed   :  { %v3419_v37 = vadd.f32 %v7007_v48, %v3195_v21  ;;  %v3420_v54 = vadd.f32 %v7007_v48, %v3196_v35  ;;  %v3117_v8 = vpop.permute.xlu0 %3116 }
 0x3ee   :  { %v3197_v43 = vmul.f32 %v3117_v8, %v6787_v51  ;;  %v3198_v24 = vmul.f32 %v3117_v8, %v6790_v53  ;;  %v7476_v53 = vld [vmem:[#allocation11_spill] sm:$0xff] }
 0x3ef   :  { %3475 = vst [vmem:[%s7334_s5 + $0x120] sm:$0xff] %v3419_v37  ;;  %3476 = vst.msk [vmem:[%s7334_s5 + $0x128] sm:$0xff] %vm2514_vm1, %v3420_v54 }
 0x3f0   :  { %v3421_v62 = vadd.f32 %v7003_v23, %v3197_v43  ;;  %v3422_v44 = vadd.f32 %v7003_v23, %v3198_v24 }
 0x3f1   :  { %v3122_v4 = vpop.permute.xlu1 %3121 }
 0x3f2   :  { %3477 = vst [vmem:[%s7334_s5 + $0x130] sm:$0xff] %v3421_v62  ;;  %3478 = vst.msk [vmem:[%s7334_s5 + $0x138] sm:$0xff] %vm2514_vm1, %v3422_v44  ;;  %v3199_v51 = vmul.f32 %v3122_v4, %v6798_v46  ;;  %v3200_v48 = vmul.f32 %v3122_v4, %v7476_v53 }
 0x3f4   :  { %v3423_v56 = vadd.f32 %v7011_v30, %v3199_v51  ;;  %v3424_v60 = vadd.f32 %v7011_v30, %v3200_v48 }
 0x3f5   :  { %v3127_v18 = vpop.permute.xlu0 %3126 }
 0x3f6   :  { %3479 = vst [vmem:[%s7334_s5 + $0x140] sm:$0xff] %v3423_v56  ;;  %3480 = vst.msk [vmem:[%s7334_s5 + $0x148] sm:$0xff] %vm2514_vm1, %v3424_v60  ;;  %v3201_v23 = vmul.f32 %v3127_v18, %v6809_v19  ;;  %v3202_v46 = vmul.f32 %v3127_v18, %v7477_v55 }
 0x3f8   :  { %v3425_v7 = vadd.f32 %v7005_v2, %v3201_v23  ;;  %v3426_v20 = vadd.f32 %v7005_v2, %v3202_v46  ;;  %v7479_v2 = vld [vmem:[#allocation12_spill] sm:$0xff] }
 0x3f9   :  { %v3132_v5 = vpop.permute.xlu1 %3131 }
 0x3fa   :  { %3481 = vst [vmem:[%s7334_s5 + $0x150] sm:$0xff] %v3425_v7  ;;  %3482 = vst.msk [vmem:[%s7334_s5 + $0x158] sm:$0xff] %vm2514_vm1, %v3426_v20  ;;  %v3203_v30 = vmul.f32 %v3132_v5, %v6820_v10  ;;  %v3204_v19 = vmul.f32 %v3132_v5, %v7478_v33 }
 0x3fc   :  { %v3427_v61 = vadd.f32 %v7015_v31, %v3203_v30  ;;  %v3428_v14 = vadd.f32 %v7015_v31, %v3204_v19  ;;  %v7481_v31 = vld [vmem:[#allocation3_spill] sm:$0xff] }
 0x3fd   :  { %v3137_v58 = vpop.permute.xlu0 %3136 }
 0x3fe   :  { %3483 = vst [vmem:[%s7334_s5 + $0x160] sm:$0xff] %v3427_v61  ;;  %3484 = vst.msk [vmem:[%s7334_s5 + $0x168] sm:$0xff] %vm2514_vm1, %v3428_v14  ;;  %v3205_v11 = vmul.f32 %v3137_v58, %v7479_v2  ;;  %v3206_v10 = vmul.f32 %v3137_v58, %v7480_v36 }
 0x400   :  { %v3429_v59 = vadd.f32 %v7009_v15, %v3205_v11  ;;  %v3430_v50 = vadd.f32 %v7009_v15, %v3206_v10  ;;  %v7483_v15 = vld [vmem:[#allocation27_spill] sm:$0xff] }
 0x401   :  { %v3142_v6 = vpop.permute.xlu1 %3141 }
 0x402   :  { %3485 = vst [vmem:[%s7334_s5 + $0x170] sm:$0xff] %v3429_v59  ;;  %3486 = vst.msk [vmem:[%s7334_s5 + $0x178] sm:$0xff] %vm2514_vm1, %v3430_v50  ;;  %v3207_v29 = vmul.f32 %v3142_v6, %v7481_v31  ;;  %v3208_v27 = vmul.f32 %v3142_v6, %v7482_v40 }
 0x404   :  { %v3431_v16 = vadd.f32 %v7028_v1, %v3207_v29  ;;  %v3432_v45 = vadd.f32 %v7028_v1, %v3208_v27  ;;  %v7485_v1 = vld [vmem:[#allocation7_spill] sm:$0xff] }
 0x405   :  { %v3147_v25 = vpop.permute.xlu0 %3146 }
 0x406   :  { %3487 = vst [vmem:[%s7334_s5 + $0x180] sm:$0xff] %v3431_v16  ;;  %3488 = vst.msk [vmem:[%s7334_s5 + $0x188] sm:$0xff] %vm2514_vm1, %v3432_v45  ;;  %v3209_v52 = vmul.f32 %v3147_v25, %v7483_v15  ;;  %v3210_v0 = vmul.f32 %v3147_v25, %v7484_v47 }
 0x408   :  { %v3433_v17 = vadd.f32 %v7013_v28, %v3209_v52  ;;  %v3434_v32 = vadd.f32 %v7013_v28, %v3210_v0 }
 0x409   :  { %v3152_v26 = vpop.permute.xlu1 %3151 }
 0x40a   :  { %3489 = vst [vmem:[%s7334_s5 + $0x190] sm:$0xff] %v3433_v17  ;;  %3490 = vst.msk [vmem:[%s7334_s5 + $0x198] sm:$0xff] %vm2514_vm1, %v3434_v32  ;;  %v3211_v22 = vmul.f32 %v3152_v26, %v7485_v1  ;;  %v3212_v34 = vmul.f32 %v3152_v26, %v7486_v49 }
 0x40d   :  { %v3376_v63 = vpop.permute.xlu1 %3375 }
 0x40e   :  { %v3435_v12 = vadd.f32 %v3376_v63, %v3211_v22  ;;  %v3436_v42 = vadd.f32 %v3376_v63, %v3212_v34 }
 0x410   :  { %3491 = vst [vmem:[%s7334_s5 + $0x1a0] sm:$0xff] %v3435_v12  ;;  %3492 = vst.msk [vmem:[%s7334_s5 + $0x1a8] sm:$0xff] %vm2514_vm1, %v3436_v42 }
 0x446   :  { %v3157_v28 = vpop.permute.xlu0 %3156 }
 0x447   :  { %v3213_v3 = vmul.f32 %v3157_v28, %v7487_v9  ;;  %v3214_v39 = vmul.f32 %v3157_v28, %v7488_v13 }
 0x44a   :  { %v3381_v57 = vpop.permute.xlu0 %3380 }
 0x44b   :  { %v3437_v41 = vadd.f32 %v3381_v57, %v3213_v3  ;;  %v3438_v38 = vadd.f32 %v3381_v57, %v3214_v39 }
 0x44d   :  { %3493 = vst [vmem:[%s7334_s5 + $0x1b0] sm:$0xff] %v3437_v41  ;;  %3494 = vst.msk [vmem:[%s7334_s5 + $0x1b8] sm:$0xff] %vm2514_vm1, %v3438_v38 }

</bundles_post_ra>
